<compile_context>
chip_gen: v7x
topology: tpu7x:2x2x1
jax: 0.10.0
libtpu: 0.0.40
codegen_flags: <defaults>
</compile_context>

<pallas_src>
import functools

import jax
import jax.numpy as jnp
from jax.experimental import pallas as pl
from jax.experimental.pallas import tpu as pltpu


# ----------------------------- Pallas kernel ------------------------------- #

def _spatial_attention_kernel(w_ref, b_ref, xp_ref, o_ref, *, H, W, K):
    """Fused: channel max/mean pool -> KxK conv (2->1) -> sigmoid -> x*Ms + x.

    w_ref : SMEM (2*K*K,) f32  -- conv weight, layout [in_channel, ky, kx]
                                  (in_channel 0 = MaxPool, 1 = AvgPool)
    b_ref : SMEM (1,)     f32  -- conv bias
    xp_ref: VMEM (1, C, H+2P, W+2P) f32 -- zero-padded input, one sample
    o_ref : VMEM (1, C, H, W) f32
    """
    P = K // 2
    xp = xp_ref[0]                      # (C, Hp, Wp)
    C = xp.shape[0]

    # Channel-wise max / mean pooling (unrolled over the small C axis).
    mx = xp[0]
    sm = xp[0]
    for c in range(1, C):
        mx = jnp.maximum(mx, xp[c])
        sm = sm + xp[c]
    av = sm * (1.0 / C)                 # (Hp, Wp)

    # 7x7 cross-correlation over the 2 pooled maps, bias included.
    # Static unrolled tap loop: scalar (SMEM) * shifted tile FMAs on the VPU.
    acc = jnp.zeros((H, W), jnp.float32) + b_ref[0]
    for dy in range(K):
        for dx in range(K):
            w_max = w_ref[dy * K + dx]            # weight for MaxPool channel
            w_avg = w_ref[K * K + dy * K + dx]    # weight for AvgPool channel
            acc = (acc
                   + w_max * mx[dy:dy + H, dx:dx + W]
                   + w_avg * av[dy:dy + H, dx:dx + W])

    ms = jax.nn.sigmoid(acc)            # (H, W)

    # Residual gating on the (unpadded) interior of x.
    x_int = xp[:, P:P + H, P:P + W]     # (C, H, W)
    o_ref[0] = x_int * ms[None, :, :] + x_int


# ------------------------------ Wrapper ------------------------------------ #

def spatial_attention(x_nchw, w_conv, b_conv):
    """x: (N, C, H, W) f32; w_conv: (1, 2, K, K); b_conv: (1,). Returns NCHW."""
    N, C, H, W = x_nchw.shape
    K = w_conv.shape[-1]
    P = K // 2
    Hp, Wp = H + 2 * P, W + 2 * P

    # Zero pad in plain JAX (tiny); pooling of zero-padded x == zero-padded
    # pooling of x, which is exactly torch's Conv2d(padding=P) behaviour.
    xp = jnp.pad(x_nchw.astype(jnp.float32),
                 ((0, 0), (0, 0), (P, P), (P, P)))

    w_flat = w_conv.astype(jnp.float32).reshape(-1)   # (2*K*K,) = 98
    bias = b_conv.astype(jnp.float32).reshape(1)      # (1,)

    kernel = functools.partial(_spatial_attention_kernel, H=H, W=W, K=K)

    return pl.pallas_call(
        kernel,
        out_shape=jax.ShapeDtypeStruct((N, C, H, W), jnp.float32),
        grid=(N,),
        in_specs=[
            pl.BlockSpec(memory_space=pltpu.MemorySpace.SMEM),   # conv weights
            pl.BlockSpec(memory_space=pltpu.MemorySpace.SMEM),   # conv bias
            pl.BlockSpec((1, C, Hp, Wp), lambda n: (n, 0, 0, 0)),
        ],
        out_specs=pl.BlockSpec((1, C, H, W), lambda n: (n, 0, 0, 0)),
        compiler_params=pltpu.CompilerParams(
            dimension_semantics=("parallel",)),
    )(w_flat, bias, xp)


# --------------------------- Pure-JAX reference ----------------------------- #

def spatial_attention_ref(x, w, b):
    mx = jnp.max(x, axis=1, keepdims=True)
    av = jnp.mean(x, axis=1, keepdims=True)
    cat = jnp.concatenate([mx, av], axis=1)
    P = w.shape[-1] // 2
    conv = jax.lax.conv_general_dilated(
        cat, w, window_strides=(1, 1), padding=((P, P), (P, P)),
        dimension_numbers=("NCHW", "OIHW", "NCHW"),
        precision=jax.lax.Precision.HIGHEST)
    ms = jax.nn.sigmoid(conv + b.reshape(1, 1, 1, 1))
    return ms * x + x


# ---------------------------------- main ------------------------------------ #

if __name__ == "__main__":
    key = jax.random.PRNGKey(0)
    kx, kw, kb = jax.random.split(key, 3)

    N, C, H, W = 2, 4, 16, 16
    x = jax.random.normal(kx, (N, C, H, W), jnp.float32)
    w = jax.random.normal(kw, (1, 2, 7, 7), jnp.float32) * 0.1   # Conv2d(2,1,7)
    b = jax.random.normal(kb, (1,), jnp.float32) * 0.1           # conv bias

    fwd = jax.jit(spatial_attention)
    y = fwd(x, w, b)
    jax.block_until_ready(y)

    y_ref = spatial_attention_ref(x, w, b)

    assert y.shape == (N, C, H, W), y.shape
    assert bool(jnp.all(jnp.isfinite(y)))
    assert bool(jnp.allclose(y, y_ref, rtol=1e-4, atol=1e-4)), \
        float(jnp.max(jnp.abs(y - y_ref)))
    print("KERNEL_OK")
</pallas_src>

<mosaic_0001>
module attributes {stable_mosaic.version = 11 : i64} {
  func.func @_spatial_attention_kernel(%arg0: i32, %arg1: memref<98xf32, #tpu.memory_space<smem>>, %arg2: memref<1xf32, #tpu.memory_space<smem>>, %arg3: memref<1x4x22x22xf32, #tpu.memory_space<vmem>>, %arg4: memref<1x4x16x16xf32, #tpu.memory_space<vmem>>) attributes {dimension_semantics = [#tpu.dimension_semantics<parallel>], iteration_bounds = array<i64: 2>, scalar_prefetch = 0 : i64, scratch_operands = 0 : i64, tpu.core_type = #tpu.core_type<tc>, window_params = [{transform_indices = @transform_0, window_bounds = array<i64: 98>}, {transform_indices = @transform_1, window_bounds = array<i64: 1>}, {transform_indices = @transform_2, window_bounds = array<i64: 1, 4, 22, 22>}, {transform_indices = @transform_3, window_bounds = array<i64: 1, 4, 16, 16>}]} {
    %c0 = arith.constant 0 : index
    %c0_0 = arith.constant 0 : index
    %c0_1 = arith.constant 0 : index
    %c0_2 = arith.constant 0 : index
    %0 = vector.load %arg3[%c0, %c0_0, %c0_1, %c0_2] : memref<1x4x22x22xf32, #tpu.memory_space<vmem>>, vector<1x4x22x22xf32>
    %1 = vector.shape_cast %0 : vector<1x4x22x22xf32> to vector<4x22x22xf32>
    %2 = vector.extract_strided_slice %1 {offsets = [0, 0, 0], sizes = [1, 22, 22], strides = [1, 1, 1]} : vector<4x22x22xf32> to vector<1x22x22xf32>
    %3 = vector.shape_cast %2 : vector<1x22x22xf32> to vector<22x22xf32>
    %4 = vector.extract_strided_slice %1 {offsets = [0, 0, 0], sizes = [1, 22, 22], strides = [1, 1, 1]} : vector<4x22x22xf32> to vector<1x22x22xf32>
    %5 = vector.shape_cast %4 : vector<1x22x22xf32> to vector<22x22xf32>
    %6 = vector.extract_strided_slice %1 {offsets = [1, 0, 0], sizes = [1, 22, 22], strides = [1, 1, 1]} : vector<4x22x22xf32> to vector<1x22x22xf32>
    %7 = vector.shape_cast %6 : vector<1x22x22xf32> to vector<22x22xf32>
    %8 = arith.maximumf %3, %7 : vector<22x22xf32>
    %9 = vector.extract_strided_slice %1 {offsets = [1, 0, 0], sizes = [1, 22, 22], strides = [1, 1, 1]} : vector<4x22x22xf32> to vector<1x22x22xf32>
    %10 = vector.shape_cast %9 : vector<1x22x22xf32> to vector<22x22xf32>
    %11 = arith.addf %5, %10 : vector<22x22xf32>
    %12 = vector.extract_strided_slice %1 {offsets = [2, 0, 0], sizes = [1, 22, 22], strides = [1, 1, 1]} : vector<4x22x22xf32> to vector<1x22x22xf32>
    %13 = vector.shape_cast %12 : vector<1x22x22xf32> to vector<22x22xf32>
    %14 = arith.maximumf %8, %13 : vector<22x22xf32>
    %15 = vector.extract_strided_slice %1 {offsets = [2, 0, 0], sizes = [1, 22, 22], strides = [1, 1, 1]} : vector<4x22x22xf32> to vector<1x22x22xf32>
    %16 = vector.shape_cast %15 : vector<1x22x22xf32> to vector<22x22xf32>
    %17 = arith.addf %11, %16 : vector<22x22xf32>
    %18 = vector.extract_strided_slice %1 {offsets = [3, 0, 0], sizes = [1, 22, 22], strides = [1, 1, 1]} : vector<4x22x22xf32> to vector<1x22x22xf32>
    %19 = vector.shape_cast %18 : vector<1x22x22xf32> to vector<22x22xf32>
    %20 = arith.maximumf %14, %19 : vector<22x22xf32>
    %21 = vector.extract_strided_slice %1 {offsets = [3, 0, 0], sizes = [1, 22, 22], strides = [1, 1, 1]} : vector<4x22x22xf32> to vector<1x22x22xf32>
    %22 = vector.shape_cast %21 : vector<1x22x22xf32> to vector<22x22xf32>
    %23 = arith.addf %17, %22 : vector<22x22xf32>
    %cst = arith.constant 2.500000e-01 : f32
    %24 = vector.broadcast %cst : f32 to vector<22x22xf32>
    %25 = arith.mulf %23, %24 : vector<22x22xf32>
    %cst_3 = arith.constant 0.000000e+00 : f32
    %26 = vector.broadcast %cst_3 : f32 to vector<16x16xf32>
    %c0_4 = arith.constant 0 : index
    %27 = memref.load %arg2[%c0_4] : memref<1xf32, #tpu.memory_space<smem>>
    %28 = vector.broadcast %27 : f32 to vector<16x16xf32>
    %29 = arith.addf %26, %28 : vector<16x16xf32>
    %c0_5 = arith.constant 0 : index
    %30 = memref.load %arg1[%c0_5] : memref<98xf32, #tpu.memory_space<smem>>
    %c49 = arith.constant 49 : index
    %31 = memref.load %arg1[%c49] : memref<98xf32, #tpu.memory_space<smem>>
    %32 = vector.extract_strided_slice %20 {offsets = [0, 0], sizes = [16, 16], strides = [1, 1]} : vector<22x22xf32> to vector<16x16xf32>
    %33 = vector.broadcast %30 : f32 to vector<16x16xf32>
    %34 = arith.mulf %33, %32 : vector<16x16xf32>
    %35 = arith.addf %29, %34 : vector<16x16xf32>
    %36 = vector.extract_strided_slice %25 {offsets = [0, 0], sizes = [16, 16], strides = [1, 1]} : vector<22x22xf32> to vector<16x16xf32>
    %37 = vector.broadcast %31 : f32 to vector<16x16xf32>
    %38 = arith.mulf %37, %36 : vector<16x16xf32>
    %39 = arith.addf %35, %38 : vector<16x16xf32>
    %c1 = arith.constant 1 : index
    %40 = memref.load %arg1[%c1] : memref<98xf32, #tpu.memory_space<smem>>
    %c50 = arith.constant 50 : index
    %41 = memref.load %arg1[%c50] : memref<98xf32, #tpu.memory_space<smem>>
    %42 = vector.extract_strided_slice %20 {offsets = [0, 1], sizes = [16, 16], strides = [1, 1]} : vector<22x22xf32> to vector<16x16xf32>
    %43 = vector.broadcast %40 : f32 to vector<16x16xf32>
    %44 = arith.mulf %43, %42 : vector<16x16xf32>
    %45 = arith.addf %39, %44 : vector<16x16xf32>
    %46 = vector.extract_strided_slice %25 {offsets = [0, 1], sizes = [16, 16], strides = [1, 1]} : vector<22x22xf32> to vector<16x16xf32>
    %47 = vector.broadcast %41 : f32 to vector<16x16xf32>
    %48 = arith.mulf %47, %46 : vector<16x16xf32>
    %49 = arith.addf %45, %48 : vector<16x16xf32>
    %c2 = arith.constant 2 : index
    %50 = memref.load %arg1[%c2] : memref<98xf32, #tpu.memory_space<smem>>
    %c51 = arith.constant 51 : index
    %51 = memref.load %arg1[%c51] : memref<98xf32, #tpu.memory_space<smem>>
    %52 = vector.extract_strided_slice %20 {offsets = [0, 2], sizes = [16, 16], strides = [1, 1]} : vector<22x22xf32> to vector<16x16xf32>
    %53 = vector.broadcast %50 : f32 to vector<16x16xf32>
    %54 = arith.mulf %53, %52 : vector<16x16xf32>
    %55 = arith.addf %49, %54 : vector<16x16xf32>
    %56 = vector.extract_strided_slice %25 {offsets = [0, 2], sizes = [16, 16], strides = [1, 1]} : vector<22x22xf32> to vector<16x16xf32>
    %57 = vector.broadcast %51 : f32 to vector<16x16xf32>
    %58 = arith.mulf %57, %56 : vector<16x16xf32>
    %59 = arith.addf %55, %58 : vector<16x16xf32>
    %c3 = arith.constant 3 : index
    %60 = memref.load %arg1[%c3] : memref<98xf32, #tpu.memory_space<smem>>
    %c52 = arith.constant 52 : index
    %61 = memref.load %arg1[%c52] : memref<98xf32, #tpu.memory_space<smem>>
    %62 = vector.extract_strided_slice %20 {offsets = [0, 3], sizes = [16, 16], strides = [1, 1]} : vector<22x22xf32> to vector<16x16xf32>
    %63 = vector.broadcast %60 : f32 to vector<16x16xf32>
    %64 = arith.mulf %63, %62 : vector<16x16xf32>
    %65 = arith.addf %59, %64 : vector<16x16xf32>
    %66 = vector.extract_strided_slice %25 {offsets = [0, 3], sizes = [16, 16], strides = [1, 1]} : vector<22x22xf32> to vector<16x16xf32>
    %67 = vector.broadcast %61 : f32 to vector<16x16xf32>
    %68 = arith.mulf %67, %66 : vector<16x16xf32>
    %69 = arith.addf %65, %68 : vector<16x16xf32>
    %c4 = arith.constant 4 : index
    %70 = memref.load %arg1[%c4] : memref<98xf32, #tpu.memory_space<smem>>
    %c53 = arith.constant 53 : index
    %71 = memref.load %arg1[%c53] : memref<98xf32, #tpu.memory_space<smem>>
    %72 = vector.extract_strided_slice %20 {offsets = [0, 4], sizes = [16, 16], strides = [1, 1]} : vector<22x22xf32> to vector<16x16xf32>
    %73 = vector.broadcast %70 : f32 to vector<16x16xf32>
    %74 = arith.mulf %73, %72 : vector<16x16xf32>
    %75 = arith.addf %69, %74 : vector<16x16xf32>
    %76 = vector.extract_strided_slice %25 {offsets = [0, 4], sizes = [16, 16], strides = [1, 1]} : vector<22x22xf32> to vector<16x16xf32>
    %77 = vector.broadcast %71 : f32 to vector<16x16xf32>
    %78 = arith.mulf %77, %76 : vector<16x16xf32>
    %79 = arith.addf %75, %78 : vector<16x16xf32>
    %c5 = arith.constant 5 : index
    %80 = memref.load %arg1[%c5] : memref<98xf32, #tpu.memory_space<smem>>
    %c54 = arith.constant 54 : index
    %81 = memref.load %arg1[%c54] : memref<98xf32, #tpu.memory_space<smem>>
    %82 = vector.extract_strided_slice %20 {offsets = [0, 5], sizes = [16, 16], strides = [1, 1]} : vector<22x22xf32> to vector<16x16xf32>
    %83 = vector.broadcast %80 : f32 to vector<16x16xf32>
    %84 = arith.mulf %83, %82 : vector<16x16xf32>
    %85 = arith.addf %79, %84 : vector<16x16xf32>
    %86 = vector.extract_strided_slice %25 {offsets = [0, 5], sizes = [16, 16], strides = [1, 1]} : vector<22x22xf32> to vector<16x16xf32>
    %87 = vector.broadcast %81 : f32 to vector<16x16xf32>
    %88 = arith.mulf %87, %86 : vector<16x16xf32>
    %89 = arith.addf %85, %88 : vector<16x16xf32>
    %c6 = arith.constant 6 : index
    %90 = memref.load %arg1[%c6] : memref<98xf32, #tpu.memory_space<smem>>
    %c55 = arith.constant 55 : index
    %91 = memref.load %arg1[%c55] : memref<98xf32, #tpu.memory_space<smem>>
    %92 = vector.extract_strided_slice %20 {offsets = [0, 6], sizes = [16, 16], strides = [1, 1]} : vector<22x22xf32> to vector<16x16xf32>
    %93 = vector.broadcast %90 : f32 to vector<16x16xf32>
    %94 = arith.mulf %93, %92 : vector<16x16xf32>
    %95 = arith.addf %89, %94 : vector<16x16xf32>
    %96 = vector.extract_strided_slice %25 {offsets = [0, 6], sizes = [16, 16], strides = [1, 1]} : vector<22x22xf32> to vector<16x16xf32>
    %97 = vector.broadcast %91 : f32 to vector<16x16xf32>
    %98 = arith.mulf %97, %96 : vector<16x16xf32>
    %99 = arith.addf %95, %98 : vector<16x16xf32>
    %c7 = arith.constant 7 : index
    %100 = memref.load %arg1[%c7] : memref<98xf32, #tpu.memory_space<smem>>
    %c56 = arith.constant 56 : index
    %101 = memref.load %arg1[%c56] : memref<98xf32, #tpu.memory_space<smem>>
    %102 = vector.extract_strided_slice %20 {offsets = [1, 0], sizes = [16, 16], strides = [1, 1]} : vector<22x22xf32> to vector<16x16xf32>
    %103 = vector.broadcast %100 : f32 to vector<16x16xf32>
    %104 = arith.mulf %103, %102 : vector<16x16xf32>
    %105 = arith.addf %99, %104 : vector<16x16xf32>
    %106 = vector.extract_strided_slice %25 {offsets = [1, 0], sizes = [16, 16], strides = [1, 1]} : vector<22x22xf32> to vector<16x16xf32>
    %107 = vector.broadcast %101 : f32 to vector<16x16xf32>
    %108 = arith.mulf %107, %106 : vector<16x16xf32>
    %109 = arith.addf %105, %108 : vector<16x16xf32>
    %c8 = arith.constant 8 : index
    %110 = memref.load %arg1[%c8] : memref<98xf32, #tpu.memory_space<smem>>
    %c57 = arith.constant 57 : index
    %111 = memref.load %arg1[%c57] : memref<98xf32, #tpu.memory_space<smem>>
    %112 = vector.extract_strided_slice %20 {offsets = [1, 1], sizes = [16, 16], strides = [1, 1]} : vector<22x22xf32> to vector<16x16xf32>
    %113 = vector.broadcast %110 : f32 to vector<16x16xf32>
    %114 = arith.mulf %113, %112 : vector<16x16xf32>
    %115 = arith.addf %109, %114 : vector<16x16xf32>
    %116 = vector.extract_strided_slice %25 {offsets = [1, 1], sizes = [16, 16], strides = [1, 1]} : vector<22x22xf32> to vector<16x16xf32>
    %117 = vector.broadcast %111 : f32 to vector<16x16xf32>
    %118 = arith.mulf %117, %116 : vector<16x16xf32>
    %119 = arith.addf %115, %118 : vector<16x16xf32>
    %c9 = arith.constant 9 : index
    %120 = memref.load %arg1[%c9] : memref<98xf32, #tpu.memory_space<smem>>
    %c58 = arith.constant 58 : index
    %121 = memref.load %arg1[%c58] : memref<98xf32, #tpu.memory_space<smem>>
    %122 = vector.extract_strided_slice %20 {offsets = [1, 2], sizes = [16, 16], strides = [1, 1]} : vector<22x22xf32> to vector<16x16xf32>
    %123 = vector.broadcast %120 : f32 to vector<16x16xf32>
    %124 = arith.mulf %123, %122 : vector<16x16xf32>
    %125 = arith.addf %119, %124 : vector<16x16xf32>
    %126 = vector.extract_strided_slice %25 {offsets = [1, 2], sizes = [16, 16], strides = [1, 1]} : vector<22x22xf32> to vector<16x16xf32>
    %127 = vector.broadcast %121 : f32 to vector<16x16xf32>
    %128 = arith.mulf %127, %126 : vector<16x16xf32>
    %129 = arith.addf %125, %128 : vector<16x16xf32>
    %c10 = arith.constant 10 : index
    %130 = memref.load %arg1[%c10] : memref<98xf32, #tpu.memory_space<smem>>
    %c59 = arith.constant 59 : index
    %131 = memref.load %arg1[%c59] : memref<98xf32, #tpu.memory_space<smem>>
    %132 = vector.extract_strided_slice %20 {offsets = [1, 3], sizes = [16, 16], strides = [1, 1]} : vector<22x22xf32> to vector<16x16xf32>
    %133 = vector.broadcast %130 : f32 to vector<16x16xf32>
    %134 = arith.mulf %133, %132 : vector<16x16xf32>
    %135 = arith.addf %129, %134 : vector<16x16xf32>
    %136 = vector.extract_strided_slice %25 {offsets = [1, 3], sizes = [16, 16], strides = [1, 1]} : vector<22x22xf32> to vector<16x16xf32>
    %137 = vector.broadcast %131 : f32 to vector<16x16xf32>
    %138 = arith.mulf %137, %136 : vector<16x16xf32>
    %139 = arith.addf %135, %138 : vector<16x16xf32>
    %c11 = arith.constant 11 : index
    %140 = memref.load %arg1[%c11] : memref<98xf32, #tpu.memory_space<smem>>
    %c60 = arith.constant 60 : index
    %141 = memref.load %arg1[%c60] : memref<98xf32, #tpu.memory_space<smem>>
    %142 = vector.extract_strided_slice %20 {offsets = [1, 4], sizes = [16, 16], strides = [1, 1]} : vector<22x22xf32> to vector<16x16xf32>
    %143 = vector.broadcast %140 : f32 to vector<16x16xf32>
    %144 = arith.mulf %143, %142 : vector<16x16xf32>
    %145 = arith.addf %139, %144 : vector<16x16xf32>
    %146 = vector.extract_strided_slice %25 {offsets = [1, 4], sizes = [16, 16], strides = [1, 1]} : vector<22x22xf32> to vector<16x16xf32>
    %147 = vector.broadcast %141 : f32 to vector<16x16xf32>
    %148 = arith.mulf %147, %146 : vector<16x16xf32>
    %149 = arith.addf %145, %148 : vector<16x16xf32>
    %c12 = arith.constant 12 : index
    %150 = memref.load %arg1[%c12] : memref<98xf32, #tpu.memory_space<smem>>
    %c61 = arith.constant 61 : index
    %151 = memref.load %arg1[%c61] : memref<98xf32, #tpu.memory_space<smem>>
    %152 = vector.extract_strided_slice %20 {offsets = [1, 5], sizes = [16, 16], strides = [1, 1]} : vector<22x22xf32> to vector<16x16xf32>
    %153 = vector.broadcast %150 : f32 to vector<16x16xf32>
    %154 = arith.mulf %153, %152 : vector<16x16xf32>
    %155 = arith.addf %149, %154 : vector<16x16xf32>
    %156 = vector.extract_strided_slice %25 {offsets = [1, 5], sizes = [16, 16], strides = [1, 1]} : vector<22x22xf32> to vector<16x16xf32>
    %157 = vector.broadcast %151 : f32 to vector<16x16xf32>
    %158 = arith.mulf %157, %156 : vector<16x16xf32>
    %159 = arith.addf %155, %158 : vector<16x16xf32>
    %c13 = arith.constant 13 : index
    %160 = memref.load %arg1[%c13] : memref<98xf32, #tpu.memory_space<smem>>
    %c62 = arith.constant 62 : index
    %161 = memref.load %arg1[%c62] : memref<98xf32, #tpu.memory_space<smem>>
    %162 = vector.extract_strided_slice %20 {offsets = [1, 6], sizes = [16, 16], strides = [1, 1]} : vector<22x22xf32> to vector<16x16xf32>
    %163 = vector.broadcast %160 : f32 to vector<16x16xf32>
    %164 = arith.mulf %163, %162 : vector<16x16xf32>
    %165 = arith.addf %159, %164 : vector<16x16xf32>
    %166 = vector.extract_strided_slice %25 {offsets = [1, 6], sizes = [16, 16], strides = [1, 1]} : vector<22x22xf32> to vector<16x16xf32>
    %167 = vector.broadcast %161 : f32 to vector<16x16xf32>
    %168 = arith.mulf %167, %166 : vector<16x16xf32>
    %169 = arith.addf %165, %168 : vector<16x16xf32>
    %c14 = arith.constant 14 : index
    %170 = memref.load %arg1[%c14] : memref<98xf32, #tpu.memory_space<smem>>
    %c63 = arith.constant 63 : index
    %171 = memref.load %arg1[%c63] : memref<98xf32, #tpu.memory_space<smem>>
    %172 = vector.extract_strided_slice %20 {offsets = [2, 0], sizes = [16, 16], strides = [1, 1]} : vector<22x22xf32> to vector<16x16xf32>
    %173 = vector.broadcast %170 : f32 to vector<16x16xf32>
    %174 = arith.mulf %173, %172 : vector<16x16xf32>
    %175 = arith.addf %169, %174 : vector<16x16xf32>
    %176 = vector.extract_strided_slice %25 {offsets = [2, 0], sizes = [16, 16], strides = [1, 1]} : vector<22x22xf32> to vector<16x16xf32>
    %177 = vector.broadcast %171 : f32 to vector<16x16xf32>
    %178 = arith.mulf %177, %176 : vector<16x16xf32>
    %179 = arith.addf %175, %178 : vector<16x16xf32>
    %c15 = arith.constant 15 : index
    %180 = memref.load %arg1[%c15] : memref<98xf32, #tpu.memory_space<smem>>
    %c64 = arith.constant 64 : index
    %181 = memref.load %arg1[%c64] : memref<98xf32, #tpu.memory_space<smem>>
    %182 = vector.extract_strided_slice %20 {offsets = [2, 1], sizes = [16, 16], strides = [1, 1]} : vector<22x22xf32> to vector<16x16xf32>
    %183 = vector.broadcast %180 : f32 to vector<16x16xf32>
    %184 = arith.mulf %183, %182 : vector<16x16xf32>
    %185 = arith.addf %179, %184 : vector<16x16xf32>
    %186 = vector.extract_strided_slice %25 {offsets = [2, 1], sizes = [16, 16], strides = [1, 1]} : vector<22x22xf32> to vector<16x16xf32>
    %187 = vector.broadcast %181 : f32 to vector<16x16xf32>
    %188 = arith.mulf %187, %186 : vector<16x16xf32>
    %189 = arith.addf %185, %188 : vector<16x16xf32>
    %c16 = arith.constant 16 : index
    %190 = memref.load %arg1[%c16] : memref<98xf32, #tpu.memory_space<smem>>
    %c65 = arith.constant 65 : index
    %191 = memref.load %arg1[%c65] : memref<98xf32, #tpu.memory_space<smem>>
    %192 = vector.extract_strided_slice %20 {offsets = [2, 2], sizes = [16, 16], strides = [1, 1]} : vector<22x22xf32> to vector<16x16xf32>
    %193 = vector.broadcast %190 : f32 to vector<16x16xf32>
    %194 = arith.mulf %193, %192 : vector<16x16xf32>
    %195 = arith.addf %189, %194 : vector<16x16xf32>
    %196 = vector.extract_strided_slice %25 {offsets = [2, 2], sizes = [16, 16], strides = [1, 1]} : vector<22x22xf32> to vector<16x16xf32>
    %197 = vector.broadcast %191 : f32 to vector<16x16xf32>
    %198 = arith.mulf %197, %196 : vector<16x16xf32>
    %199 = arith.addf %195, %198 : vector<16x16xf32>
    %c17 = arith.constant 17 : index
    %200 = memref.load %arg1[%c17] : memref<98xf32, #tpu.memory_space<smem>>
    %c66 = arith.constant 66 : index
    %201 = memref.load %arg1[%c66] : memref<98xf32, #tpu.memory_space<smem>>
    %202 = vector.extract_strided_slice %20 {offsets = [2, 3], sizes = [16, 16], strides = [1, 1]} : vector<22x22xf32> to vector<16x16xf32>
    %203 = vector.broadcast %200 : f32 to vector<16x16xf32>
    %204 = arith.mulf %203, %202 : vector<16x16xf32>
    %205 = arith.addf %199, %204 : vector<16x16xf32>
    %206 = vector.extract_strided_slice %25 {offsets = [2, 3], sizes = [16, 16], strides = [1, 1]} : vector<22x22xf32> to vector<16x16xf32>
    %207 = vector.broadcast %201 : f32 to vector<16x16xf32>
    %208 = arith.mulf %207, %206 : vector<16x16xf32>
    %209 = arith.addf %205, %208 : vector<16x16xf32>
    %c18 = arith.constant 18 : index
    %210 = memref.load %arg1[%c18] : memref<98xf32, #tpu.memory_space<smem>>
    %c67 = arith.constant 67 : index
    %211 = memref.load %arg1[%c67] : memref<98xf32, #tpu.memory_space<smem>>
    %212 = vector.extract_strided_slice %20 {offsets = [2, 4], sizes = [16, 16], strides = [1, 1]} : vector<22x22xf32> to vector<16x16xf32>
    %213 = vector.broadcast %210 : f32 to vector<16x16xf32>
    %214 = arith.mulf %213, %212 : vector<16x16xf32>
    %215 = arith.addf %209, %214 : vector<16x16xf32>
    %216 = vector.extract_strided_slice %25 {offsets = [2, 4], sizes = [16, 16], strides = [1, 1]} : vector<22x22xf32> to vector<16x16xf32>
    %217 = vector.broadcast %211 : f32 to vector<16x16xf32>
    %218 = arith.mulf %217, %216 : vector<16x16xf32>
    %219 = arith.addf %215, %218 : vector<16x16xf32>
    %c19 = arith.constant 19 : index
    %220 = memref.load %arg1[%c19] : memref<98xf32, #tpu.memory_space<smem>>
    %c68 = arith.constant 68 : index
    %221 = memref.load %arg1[%c68] : memref<98xf32, #tpu.memory_space<smem>>
    %222 = vector.extract_strided_slice %20 {offsets = [2, 5], sizes = [16, 16], strides = [1, 1]} : vector<22x22xf32> to vector<16x16xf32>
    %223 = vector.broadcast %220 : f32 to vector<16x16xf32>
    %224 = arith.mulf %223, %222 : vector<16x16xf32>
    %225 = arith.addf %219, %224 : vector<16x16xf32>
    %226 = vector.extract_strided_slice %25 {offsets = [2, 5], sizes = [16, 16], strides = [1, 1]} : vector<22x22xf32> to vector<16x16xf32>
    %227 = vector.broadcast %221 : f32 to vector<16x16xf32>
    %228 = arith.mulf %227, %226 : vector<16x16xf32>
    %229 = arith.addf %225, %228 : vector<16x16xf32>
    %c20 = arith.constant 20 : index
    %230 = memref.load %arg1[%c20] : memref<98xf32, #tpu.memory_space<smem>>
    %c69 = arith.constant 69 : index
    %231 = memref.load %arg1[%c69] : memref<98xf32, #tpu.memory_space<smem>>
    %232 = vector.extract_strided_slice %20 {offsets = [2, 6], sizes = [16, 16], strides = [1, 1]} : vector<22x22xf32> to vector<16x16xf32>
    %233 = vector.broadcast %230 : f32 to vector<16x16xf32>
    %234 = arith.mulf %233, %232 : vector<16x16xf32>
    %235 = arith.addf %229, %234 : vector<16x16xf32>
    %236 = vector.extract_strided_slice %25 {offsets = [2, 6], sizes = [16, 16], strides = [1, 1]} : vector<22x22xf32> to vector<16x16xf32>
    %237 = vector.broadcast %231 : f32 to vector<16x16xf32>
    %238 = arith.mulf %237, %236 : vector<16x16xf32>
    %239 = arith.addf %235, %238 : vector<16x16xf32>
    %c21 = arith.constant 21 : index
    %240 = memref.load %arg1[%c21] : memref<98xf32, #tpu.memory_space<smem>>
    %c70 = arith.constant 70 : index
    %241 = memref.load %arg1[%c70] : memref<98xf32, #tpu.memory_space<smem>>
    %242 = vector.extract_strided_slice %20 {offsets = [3, 0], sizes = [16, 16], strides = [1, 1]} : vector<22x22xf32> to vector<16x16xf32>
    %243 = vector.broadcast %240 : f32 to vector<16x16xf32>
    %244 = arith.mulf %243, %242 : vector<16x16xf32>
    %245 = arith.addf %239, %244 : vector<16x16xf32>
    %246 = vector.extract_strided_slice %25 {offsets = [3, 0], sizes = [16, 16], strides = [1, 1]} : vector<22x22xf32> to vector<16x16xf32>
    %247 = vector.broadcast %241 : f32 to vector<16x16xf32>
    %248 = arith.mulf %247, %246 : vector<16x16xf32>
    %249 = arith.addf %245, %248 : vector<16x16xf32>
    %c22 = arith.constant 22 : index
    %250 = memref.load %arg1[%c22] : memref<98xf32, #tpu.memory_space<smem>>
    %c71 = arith.constant 71 : index
    %251 = memref.load %arg1[%c71] : memref<98xf32, #tpu.memory_space<smem>>
    %252 = vector.extract_strided_slice %20 {offsets = [3, 1], sizes = [16, 16], strides = [1, 1]} : vector<22x22xf32> to vector<16x16xf32>
    %253 = vector.broadcast %250 : f32 to vector<16x16xf32>
    %254 = arith.mulf %253, %252 : vector<16x16xf32>
    %255 = arith.addf %249, %254 : vector<16x16xf32>
    %256 = vector.extract_strided_slice %25 {offsets = [3, 1], sizes = [16, 16], strides = [1, 1]} : vector<22x22xf32> to vector<16x16xf32>
    %257 = vector.broadcast %251 : f32 to vector<16x16xf32>
    %258 = arith.mulf %257, %256 : vector<16x16xf32>
    %259 = arith.addf %255, %258 : vector<16x16xf32>
    %c23 = arith.constant 23 : index
    %260 = memref.load %arg1[%c23] : memref<98xf32, #tpu.memory_space<smem>>
    %c72 = arith.constant 72 : index
    %261 = memref.load %arg1[%c72] : memref<98xf32, #tpu.memory_space<smem>>
    %262 = vector.extract_strided_slice %20 {offsets = [3, 2], sizes = [16, 16], strides = [1, 1]} : vector<22x22xf32> to vector<16x16xf32>
    %263 = vector.broadcast %260 : f32 to vector<16x16xf32>
    %264 = arith.mulf %263, %262 : vector<16x16xf32>
    %265 = arith.addf %259, %264 : vector<16x16xf32>
    %266 = vector.extract_strided_slice %25 {offsets = [3, 2], sizes = [16, 16], strides = [1, 1]} : vector<22x22xf32> to vector<16x16xf32>
    %267 = vector.broadcast %261 : f32 to vector<16x16xf32>
    %268 = arith.mulf %267, %266 : vector<16x16xf32>
    %269 = arith.addf %265, %268 : vector<16x16xf32>
    %c24 = arith.constant 24 : index
    %270 = memref.load %arg1[%c24] : memref<98xf32, #tpu.memory_space<smem>>
    %c73 = arith.constant 73 : index
    %271 = memref.load %arg1[%c73] : memref<98xf32, #tpu.memory_space<smem>>
    %272 = vector.extract_strided_slice %20 {offsets = [3, 3], sizes = [16, 16], strides = [1, 1]} : vector<22x22xf32> to vector<16x16xf32>
    %273 = vector.broadcast %270 : f32 to vector<16x16xf32>
    %274 = arith.mulf %273, %272 : vector<16x16xf32>
    %275 = arith.addf %269, %274 : vector<16x16xf32>
    %276 = vector.extract_strided_slice %25 {offsets = [3, 3], sizes = [16, 16], strides = [1, 1]} : vector<22x22xf32> to vector<16x16xf32>
    %277 = vector.broadcast %271 : f32 to vector<16x16xf32>
    %278 = arith.mulf %277, %276 : vector<16x16xf32>
    %279 = arith.addf %275, %278 : vector<16x16xf32>
    %c25 = arith.constant 25 : index
    %280 = memref.load %arg1[%c25] : memref<98xf32, #tpu.memory_space<smem>>
    %c74 = arith.constant 74 : index
    %281 = memref.load %arg1[%c74] : memref<98xf32, #tpu.memory_space<smem>>
    %282 = vector.extract_strided_slice %20 {offsets = [3, 4], sizes = [16, 16], strides = [1, 1]} : vector<22x22xf32> to vector<16x16xf32>
    %283 = vector.broadcast %280 : f32 to vector<16x16xf32>
    %284 = arith.mulf %283, %282 : vector<16x16xf32>
    %285 = arith.addf %279, %284 : vector<16x16xf32>
    %286 = vector.extract_strided_slice %25 {offsets = [3, 4], sizes = [16, 16], strides = [1, 1]} : vector<22x22xf32> to vector<16x16xf32>
    %287 = vector.broadcast %281 : f32 to vector<16x16xf32>
    %288 = arith.mulf %287, %286 : vector<16x16xf32>
    %289 = arith.addf %285, %288 : vector<16x16xf32>
    %c26 = arith.constant 26 : index
    %290 = memref.load %arg1[%c26] : memref<98xf32, #tpu.memory_space<smem>>
    %c75 = arith.constant 75 : index
    %291 = memref.load %arg1[%c75] : memref<98xf32, #tpu.memory_space<smem>>
    %292 = vector.extract_strided_slice %20 {offsets = [3, 5], sizes = [16, 16], strides = [1, 1]} : vector<22x22xf32> to vector<16x16xf32>
    %293 = vector.broadcast %290 : f32 to vector<16x16xf32>
    %294 = arith.mulf %293, %292 : vector<16x16xf32>
    %295 = arith.addf %289, %294 : vector<16x16xf32>
    %296 = vector.extract_strided_slice %25 {offsets = [3, 5], sizes = [16, 16], strides = [1, 1]} : vector<22x22xf32> to vector<16x16xf32>
    %297 = vector.broadcast %291 : f32 to vector<16x16xf32>
    %298 = arith.mulf %297, %296 : vector<16x16xf32>
    %299 = arith.addf %295, %298 : vector<16x16xf32>
    %c27 = arith.constant 27 : index
    %300 = memref.load %arg1[%c27] : memref<98xf32, #tpu.memory_space<smem>>
    %c76 = arith.constant 76 : index
    %301 = memref.load %arg1[%c76] : memref<98xf32, #tpu.memory_space<smem>>
    %302 = vector.extract_strided_slice %20 {offsets = [3, 6], sizes = [16, 16], strides = [1, 1]} : vector<22x22xf32> to vector<16x16xf32>
    %303 = vector.broadcast %300 : f32 to vector<16x16xf32>
    %304 = arith.mulf %303, %302 : vector<16x16xf32>
    %305 = arith.addf %299, %304 : vector<16x16xf32>
    %306 = vector.extract_strided_slice %25 {offsets = [3, 6], sizes = [16, 16], strides = [1, 1]} : vector<22x22xf32> to vector<16x16xf32>
    %307 = vector.broadcast %301 : f32 to vector<16x16xf32>
    %308 = arith.mulf %307, %306 : vector<16x16xf32>
    %309 = arith.addf %305, %308 : vector<16x16xf32>
    %c28 = arith.constant 28 : index
    %310 = memref.load %arg1[%c28] : memref<98xf32, #tpu.memory_space<smem>>
    %c77 = arith.constant 77 : index
    %311 = memref.load %arg1[%c77] : memref<98xf32, #tpu.memory_space<smem>>
    %312 = vector.extract_strided_slice %20 {offsets = [4, 0], sizes = [16, 16], strides = [1, 1]} : vector<22x22xf32> to vector<16x16xf32>
    %313 = vector.broadcast %310 : f32 to vector<16x16xf32>
    %314 = arith.mulf %313, %312 : vector<16x16xf32>
    %315 = arith.addf %309, %314 : vector<16x16xf32>
    %316 = vector.extract_strided_slice %25 {offsets = [4, 0], sizes = [16, 16], strides = [1, 1]} : vector<22x22xf32> to vector<16x16xf32>
    %317 = vector.broadcast %311 : f32 to vector<16x16xf32>
    %318 = arith.mulf %317, %316 : vector<16x16xf32>
    %319 = arith.addf %315, %318 : vector<16x16xf32>
    %c29 = arith.constant 29 : index
    %320 = memref.load %arg1[%c29] : memref<98xf32, #tpu.memory_space<smem>>
    %c78 = arith.constant 78 : index
    %321 = memref.load %arg1[%c78] : memref<98xf32, #tpu.memory_space<smem>>
    %322 = vector.extract_strided_slice %20 {offsets = [4, 1], sizes = [16, 16], strides = [1, 1]} : vector<22x22xf32> to vector<16x16xf32>
    %323 = vector.broadcast %320 : f32 to vector<16x16xf32>
    %324 = arith.mulf %323, %322 : vector<16x16xf32>
    %325 = arith.addf %319, %324 : vector<16x16xf32>
    %326 = vector.extract_strided_slice %25 {offsets = [4, 1], sizes = [16, 16], strides = [1, 1]} : vector<22x22xf32> to vector<16x16xf32>
    %327 = vector.broadcast %321 : f32 to vector<16x16xf32>
    %328 = arith.mulf %327, %326 : vector<16x16xf32>
    %329 = arith.addf %325, %328 : vector<16x16xf32>
    %c30 = arith.constant 30 : index
    %330 = memref.load %arg1[%c30] : memref<98xf32, #tpu.memory_space<smem>>
    %c79 = arith.constant 79 : index
    %331 = memref.load %arg1[%c79] : memref<98xf32, #tpu.memory_space<smem>>
    %332 = vector.extract_strided_slice %20 {offsets = [4, 2], sizes = [16, 16], strides = [1, 1]} : vector<22x22xf32> to vector<16x16xf32>
    %333 = vector.broadcast %330 : f32 to vector<16x16xf32>
    %334 = arith.mulf %333, %332 : vector<16x16xf32>
    %335 = arith.addf %329, %334 : vector<16x16xf32>
    %336 = vector.extract_strided_slice %25 {offsets = [4, 2], sizes = [16, 16], strides = [1, 1]} : vector<22x22xf32> to vector<16x16xf32>
    %337 = vector.broadcast %331 : f32 to vector<16x16xf32>
    %338 = arith.mulf %337, %336 : vector<16x16xf32>
    %339 = arith.addf %335, %338 : vector<16x16xf32>
    %c31 = arith.constant 31 : index
    %340 = memref.load %arg1[%c31] : memref<98xf32, #tpu.memory_space<smem>>
    %c80 = arith.constant 80 : index
    %341 = memref.load %arg1[%c80] : memref<98xf32, #tpu.memory_space<smem>>
    %342 = vector.extract_strided_slice %20 {offsets = [4, 3], sizes = [16, 16], strides = [1, 1]} : vector<22x22xf32> to vector<16x16xf32>
    %343 = vector.broadcast %340 : f32 to vector<16x16xf32>
    %344 = arith.mulf %343, %342 : vector<16x16xf32>
    %345 = arith.addf %339, %344 : vector<16x16xf32>
    %346 = vector.extract_strided_slice %25 {offsets = [4, 3], sizes = [16, 16], strides = [1, 1]} : vector<22x22xf32> to vector<16x16xf32>
    %347 = vector.broadcast %341 : f32 to vector<16x16xf32>
    %348 = arith.mulf %347, %346 : vector<16x16xf32>
    %349 = arith.addf %345, %348 : vector<16x16xf32>
    %c32 = arith.constant 32 : index
    %350 = memref.load %arg1[%c32] : memref<98xf32, #tpu.memory_space<smem>>
    %c81 = arith.constant 81 : index
    %351 = memref.load %arg1[%c81] : memref<98xf32, #tpu.memory_space<smem>>
    %352 = vector.extract_strided_slice %20 {offsets = [4, 4], sizes = [16, 16], strides = [1, 1]} : vector<22x22xf32> to vector<16x16xf32>
    %353 = vector.broadcast %350 : f32 to vector<16x16xf32>
    %354 = arith.mulf %353, %352 : vector<16x16xf32>
    %355 = arith.addf %349, %354 : vector<16x16xf32>
    %356 = vector.extract_strided_slice %25 {offsets = [4, 4], sizes = [16, 16], strides = [1, 1]} : vector<22x22xf32> to vector<16x16xf32>
    %357 = vector.broadcast %351 : f32 to vector<16x16xf32>
    %358 = arith.mulf %357, %356 : vector<16x16xf32>
    %359 = arith.addf %355, %358 : vector<16x16xf32>
    %c33 = arith.constant 33 : index
    %360 = memref.load %arg1[%c33] : memref<98xf32, #tpu.memory_space<smem>>
    %c82 = arith.constant 82 : index
    %361 = memref.load %arg1[%c82] : memref<98xf32, #tpu.memory_space<smem>>
    %362 = vector.extract_strided_slice %20 {offsets = [4, 5], sizes = [16, 16], strides = [1, 1]} : vector<22x22xf32> to vector<16x16xf32>
    %363 = vector.broadcast %360 : f32 to vector<16x16xf32>
    %364 = arith.mulf %363, %362 : vector<16x16xf32>
    %365 = arith.addf %359, %364 : vector<16x16xf32>
    %366 = vector.extract_strided_slice %25 {offsets = [4, 5], sizes = [16, 16], strides = [1, 1]} : vector<22x22xf32> to vector<16x16xf32>
    %367 = vector.broadcast %361 : f32 to vector<16x16xf32>
    %368 = arith.mulf %367, %366 : vector<16x16xf32>
    %369 = arith.addf %365, %368 : vector<16x16xf32>
    %c34 = arith.constant 34 : index
    %370 = memref.load %arg1[%c34] : memref<98xf32, #tpu.memory_space<smem>>
    %c83 = arith.constant 83 : index
    %371 = memref.load %arg1[%c83] : memref<98xf32, #tpu.memory_space<smem>>
    %372 = vector.extract_strided_slice %20 {offsets = [4, 6], sizes = [16, 16], strides = [1, 1]} : vector<22x22xf32> to vector<16x16xf32>
    %373 = vector.broadcast %370 : f32 to vector<16x16xf32>
    %374 = arith.mulf %373, %372 : vector<16x16xf32>
    %375 = arith.addf %369, %374 : vector<16x16xf32>
    %376 = vector.extract_strided_slice %25 {offsets = [4, 6], sizes = [16, 16], strides = [1, 1]} : vector<22x22xf32> to vector<16x16xf32>
    %377 = vector.broadcast %371 : f32 to vector<16x16xf32>
    %378 = arith.mulf %377, %376 : vector<16x16xf32>
    %379 = arith.addf %375, %378 : vector<16x16xf32>
    %c35 = arith.constant 35 : index
    %380 = memref.load %arg1[%c35] : memref<98xf32, #tpu.memory_space<smem>>
    %c84 = arith.constant 84 : index
    %381 = memref.load %arg1[%c84] : memref<98xf32, #tpu.memory_space<smem>>
    %382 = vector.extract_strided_slice %20 {offsets = [5, 0], sizes = [16, 16], strides = [1, 1]} : vector<22x22xf32> to vector<16x16xf32>
    %383 = vector.broadcast %380 : f32 to vector<16x16xf32>
    %384 = arith.mulf %383, %382 : vector<16x16xf32>
    %385 = arith.addf %379, %384 : vector<16x16xf32>
    %386 = vector.extract_strided_slice %25 {offsets = [5, 0], sizes = [16, 16], strides = [1, 1]} : vector<22x22xf32> to vector<16x16xf32>
    %387 = vector.broadcast %381 : f32 to vector<16x16xf32>
    %388 = arith.mulf %387, %386 : vector<16x16xf32>
    %389 = arith.addf %385, %388 : vector<16x16xf32>
    %c36 = arith.constant 36 : index
    %390 = memref.load %arg1[%c36] : memref<98xf32, #tpu.memory_space<smem>>
    %c85 = arith.constant 85 : index
    %391 = memref.load %arg1[%c85] : memref<98xf32, #tpu.memory_space<smem>>
    %392 = vector.extract_strided_slice %20 {offsets = [5, 1], sizes = [16, 16], strides = [1, 1]} : vector<22x22xf32> to vector<16x16xf32>
    %393 = vector.broadcast %390 : f32 to vector<16x16xf32>
    %394 = arith.mulf %393, %392 : vector<16x16xf32>
    %395 = arith.addf %389, %394 : vector<16x16xf32>
    %396 = vector.extract_strided_slice %25 {offsets = [5, 1], sizes = [16, 16], strides = [1, 1]} : vector<22x22xf32> to vector<16x16xf32>
    %397 = vector.broadcast %391 : f32 to vector<16x16xf32>
    %398 = arith.mulf %397, %396 : vector<16x16xf32>
    %399 = arith.addf %395, %398 : vector<16x16xf32>
    %c37 = arith.constant 37 : index
    %400 = memref.load %arg1[%c37] : memref<98xf32, #tpu.memory_space<smem>>
    %c86 = arith.constant 86 : index
    %401 = memref.load %arg1[%c86] : memref<98xf32, #tpu.memory_space<smem>>
    %402 = vector.extract_strided_slice %20 {offsets = [5, 2], sizes = [16, 16], strides = [1, 1]} : vector<22x22xf32> to vector<16x16xf32>
    %403 = vector.broadcast %400 : f32 to vector<16x16xf32>
    %404 = arith.mulf %403, %402 : vector<16x16xf32>
    %405 = arith.addf %399, %404 : vector<16x16xf32>
    %406 = vector.extract_strided_slice %25 {offsets = [5, 2], sizes = [16, 16], strides = [1, 1]} : vector<22x22xf32> to vector<16x16xf32>
    %407 = vector.broadcast %401 : f32 to vector<16x16xf32>
    %408 = arith.mulf %407, %406 : vector<16x16xf32>
    %409 = arith.addf %405, %408 : vector<16x16xf32>
    %c38 = arith.constant 38 : index
    %410 = memref.load %arg1[%c38] : memref<98xf32, #tpu.memory_space<smem>>
    %c87 = arith.constant 87 : index
    %411 = memref.load %arg1[%c87] : memref<98xf32, #tpu.memory_space<smem>>
    %412 = vector.extract_strided_slice %20 {offsets = [5, 3], sizes = [16, 16], strides = [1, 1]} : vector<22x22xf32> to vector<16x16xf32>
    %413 = vector.broadcast %410 : f32 to vector<16x16xf32>
    %414 = arith.mulf %413, %412 : vector<16x16xf32>
    %415 = arith.addf %409, %414 : vector<16x16xf32>
    %416 = vector.extract_strided_slice %25 {offsets = [5, 3], sizes = [16, 16], strides = [1, 1]} : vector<22x22xf32> to vector<16x16xf32>
    %417 = vector.broadcast %411 : f32 to vector<16x16xf32>
    %418 = arith.mulf %417, %416 : vector<16x16xf32>
    %419 = arith.addf %415, %418 : vector<16x16xf32>
    %c39 = arith.constant 39 : index
    %420 = memref.load %arg1[%c39] : memref<98xf32, #tpu.memory_space<smem>>
    %c88 = arith.constant 88 : index
    %421 = memref.load %arg1[%c88] : memref<98xf32, #tpu.memory_space<smem>>
    %422 = vector.extract_strided_slice %20 {offsets = [5, 4], sizes = [16, 16], strides = [1, 1]} : vector<22x22xf32> to vector<16x16xf32>
    %423 = vector.broadcast %420 : f32 to vector<16x16xf32>
    %424 = arith.mulf %423, %422 : vector<16x16xf32>
    %425 = arith.addf %419, %424 : vector<16x16xf32>
    %426 = vector.extract_strided_slice %25 {offsets = [5, 4], sizes = [16, 16], strides = [1, 1]} : vector<22x22xf32> to vector<16x16xf32>
    %427 = vector.broadcast %421 : f32 to vector<16x16xf32>
    %428 = arith.mulf %427, %426 : vector<16x16xf32>
    %429 = arith.addf %425, %428 : vector<16x16xf32>
    %c40 = arith.constant 40 : index
    %430 = memref.load %arg1[%c40] : memref<98xf32, #tpu.memory_space<smem>>
    %c89 = arith.constant 89 : index
    %431 = memref.load %arg1[%c89] : memref<98xf32, #tpu.memory_space<smem>>
    %432 = vector.extract_strided_slice %20 {offsets = [5, 5], sizes = [16, 16], strides = [1, 1]} : vector<22x22xf32> to vector<16x16xf32>
    %433 = vector.broadcast %430 : f32 to vector<16x16xf32>
    %434 = arith.mulf %433, %432 : vector<16x16xf32>
    %435 = arith.addf %429, %434 : vector<16x16xf32>
    %436 = vector.extract_strided_slice %25 {offsets = [5, 5], sizes = [16, 16], strides = [1, 1]} : vector<22x22xf32> to vector<16x16xf32>
    %437 = vector.broadcast %431 : f32 to vector<16x16xf32>
    %438 = arith.mulf %437, %436 : vector<16x16xf32>
    %439 = arith.addf %435, %438 : vector<16x16xf32>
    %c41 = arith.constant 41 : index
    %440 = memref.load %arg1[%c41] : memref<98xf32, #tpu.memory_space<smem>>
    %c90 = arith.constant 90 : index
    %441 = memref.load %arg1[%c90] : memref<98xf32, #tpu.memory_space<smem>>
    %442 = vector.extract_strided_slice %20 {offsets = [5, 6], sizes = [16, 16], strides = [1, 1]} : vector<22x22xf32> to vector<16x16xf32>
    %443 = vector.broadcast %440 : f32 to vector<16x16xf32>
    %444 = arith.mulf %443, %442 : vector<16x16xf32>
    %445 = arith.addf %439, %444 : vector<16x16xf32>
    %446 = vector.extract_strided_slice %25 {offsets = [5, 6], sizes = [16, 16], strides = [1, 1]} : vector<22x22xf32> to vector<16x16xf32>
    %447 = vector.broadcast %441 : f32 to vector<16x16xf32>
    %448 = arith.mulf %447, %446 : vector<16x16xf32>
    %449 = arith.addf %445, %448 : vector<16x16xf32>
    %c42 = arith.constant 42 : index
    %450 = memref.load %arg1[%c42] : memref<98xf32, #tpu.memory_space<smem>>
    %c91 = arith.constant 91 : index
    %451 = memref.load %arg1[%c91] : memref<98xf32, #tpu.memory_space<smem>>
    %452 = vector.extract_strided_slice %20 {offsets = [6, 0], sizes = [16, 16], strides = [1, 1]} : vector<22x22xf32> to vector<16x16xf32>
    %453 = vector.broadcast %450 : f32 to vector<16x16xf32>
    %454 = arith.mulf %453, %452 : vector<16x16xf32>
    %455 = arith.addf %449, %454 : vector<16x16xf32>
    %456 = vector.extract_strided_slice %25 {offsets = [6, 0], sizes = [16, 16], strides = [1, 1]} : vector<22x22xf32> to vector<16x16xf32>
    %457 = vector.broadcast %451 : f32 to vector<16x16xf32>
    %458 = arith.mulf %457, %456 : vector<16x16xf32>
    %459 = arith.addf %455, %458 : vector<16x16xf32>
    %c43 = arith.constant 43 : index
    %460 = memref.load %arg1[%c43] : memref<98xf32, #tpu.memory_space<smem>>
    %c92 = arith.constant 92 : index
    %461 = memref.load %arg1[%c92] : memref<98xf32, #tpu.memory_space<smem>>
    %462 = vector.extract_strided_slice %20 {offsets = [6, 1], sizes = [16, 16], strides = [1, 1]} : vector<22x22xf32> to vector<16x16xf32>
    %463 = vector.broadcast %460 : f32 to vector<16x16xf32>
    %464 = arith.mulf %463, %462 : vector<16x16xf32>
    %465 = arith.addf %459, %464 : vector<16x16xf32>
    %466 = vector.extract_strided_slice %25 {offsets = [6, 1], sizes = [16, 16], strides = [1, 1]} : vector<22x22xf32> to vector<16x16xf32>
    %467 = vector.broadcast %461 : f32 to vector<16x16xf32>
    %468 = arith.mulf %467, %466 : vector<16x16xf32>
    %469 = arith.addf %465, %468 : vector<16x16xf32>
    %c44 = arith.constant 44 : index
    %470 = memref.load %arg1[%c44] : memref<98xf32, #tpu.memory_space<smem>>
    %c93 = arith.constant 93 : index
    %471 = memref.load %arg1[%c93] : memref<98xf32, #tpu.memory_space<smem>>
    %472 = vector.extract_strided_slice %20 {offsets = [6, 2], sizes = [16, 16], strides = [1, 1]} : vector<22x22xf32> to vector<16x16xf32>
    %473 = vector.broadcast %470 : f32 to vector<16x16xf32>
    %474 = arith.mulf %473, %472 : vector<16x16xf32>
    %475 = arith.addf %469, %474 : vector<16x16xf32>
    %476 = vector.extract_strided_slice %25 {offsets = [6, 2], sizes = [16, 16], strides = [1, 1]} : vector<22x22xf32> to vector<16x16xf32>
    %477 = vector.broadcast %471 : f32 to vector<16x16xf32>
    %478 = arith.mulf %477, %476 : vector<16x16xf32>
    %479 = arith.addf %475, %478 : vector<16x16xf32>
    %c45 = arith.constant 45 : index
    %480 = memref.load %arg1[%c45] : memref<98xf32, #tpu.memory_space<smem>>
    %c94 = arith.constant 94 : index
    %481 = memref.load %arg1[%c94] : memref<98xf32, #tpu.memory_space<smem>>
    %482 = vector.extract_strided_slice %20 {offsets = [6, 3], sizes = [16, 16], strides = [1, 1]} : vector<22x22xf32> to vector<16x16xf32>
    %483 = vector.broadcast %480 : f32 to vector<16x16xf32>
    %484 = arith.mulf %483, %482 : vector<16x16xf32>
    %485 = arith.addf %479, %484 : vector<16x16xf32>
    %486 = vector.extract_strided_slice %25 {offsets = [6, 3], sizes = [16, 16], strides = [1, 1]} : vector<22x22xf32> to vector<16x16xf32>
    %487 = vector.broadcast %481 : f32 to vector<16x16xf32>
    %488 = arith.mulf %487, %486 : vector<16x16xf32>
    %489 = arith.addf %485, %488 : vector<16x16xf32>
    %c46 = arith.constant 46 : index
    %490 = memref.load %arg1[%c46] : memref<98xf32, #tpu.memory_space<smem>>
    %c95 = arith.constant 95 : index
    %491 = memref.load %arg1[%c95] : memref<98xf32, #tpu.memory_space<smem>>
    %492 = vector.extract_strided_slice %20 {offsets = [6, 4], sizes = [16, 16], strides = [1, 1]} : vector<22x22xf32> to vector<16x16xf32>
    %493 = vector.broadcast %490 : f32 to vector<16x16xf32>
    %494 = arith.mulf %493, %492 : vector<16x16xf32>
    %495 = arith.addf %489, %494 : vector<16x16xf32>
    %496 = vector.extract_strided_slice %25 {offsets = [6, 4], sizes = [16, 16], strides = [1, 1]} : vector<22x22xf32> to vector<16x16xf32>
    %497 = vector.broadcast %491 : f32 to vector<16x16xf32>
    %498 = arith.mulf %497, %496 : vector<16x16xf32>
    %499 = arith.addf %495, %498 : vector<16x16xf32>
    %c47 = arith.constant 47 : index
    %500 = memref.load %arg1[%c47] : memref<98xf32, #tpu.memory_space<smem>>
    %c96 = arith.constant 96 : index
    %501 = memref.load %arg1[%c96] : memref<98xf32, #tpu.memory_space<smem>>
    %502 = vector.extract_strided_slice %20 {offsets = [6, 5], sizes = [16, 16], strides = [1, 1]} : vector<22x22xf32> to vector<16x16xf32>
    %503 = vector.broadcast %500 : f32 to vector<16x16xf32>
    %504 = arith.mulf %503, %502 : vector<16x16xf32>
    %505 = arith.addf %499, %504 : vector<16x16xf32>
    %506 = vector.extract_strided_slice %25 {offsets = [6, 5], sizes = [16, 16], strides = [1, 1]} : vector<22x22xf32> to vector<16x16xf32>
    %507 = vector.broadcast %501 : f32 to vector<16x16xf32>
    %508 = arith.mulf %507, %506 : vector<16x16xf32>
    %509 = arith.addf %505, %508 : vector<16x16xf32>
    %c48 = arith.constant 48 : index
    %510 = memref.load %arg1[%c48] : memref<98xf32, #tpu.memory_space<smem>>
    %c97 = arith.constant 97 : index
    %511 = memref.load %arg1[%c97] : memref<98xf32, #tpu.memory_space<smem>>
    %512 = vector.extract_strided_slice %20 {offsets = [6, 6], sizes = [16, 16], strides = [1, 1]} : vector<22x22xf32> to vector<16x16xf32>
    %513 = vector.broadcast %510 : f32 to vector<16x16xf32>
    %514 = arith.mulf %513, %512 : vector<16x16xf32>
    %515 = arith.addf %509, %514 : vector<16x16xf32>
    %516 = vector.extract_strided_slice %25 {offsets = [6, 6], sizes = [16, 16], strides = [1, 1]} : vector<22x22xf32> to vector<16x16xf32>
    %517 = vector.broadcast %511 : f32 to vector<16x16xf32>
    %518 = arith.mulf %517, %516 : vector<16x16xf32>
    %519 = arith.addf %515, %518 : vector<16x16xf32>
    %520 = arith.negf %519 : vector<16x16xf32>
    %521 = math.exp %520 : vector<16x16xf32>
    %cst_6 = arith.constant 1.000000e+00 : f32
    %522 = vector.broadcast %cst_6 : f32 to vector<16x16xf32>
    %523 = arith.addf %522, %521 : vector<16x16xf32>
    %524 = arith.divf %522, %523 : vector<16x16xf32>
    %525 = vector.extract_strided_slice %1 {offsets = [0, 3, 3], sizes = [4, 16, 16], strides = [1, 1, 1]} : vector<4x22x22xf32> to vector<4x16x16xf32>
    %526 = vector.shape_cast %524 : vector<16x16xf32> to vector<1x16x16xf32>
    %527 = vector.broadcast %526 : vector<1x16x16xf32> to vector<4x16x16xf32>
    %528 = arith.mulf %525, %527 : vector<4x16x16xf32>
    %529 = arith.addf %528, %525 : vector<4x16x16xf32>
    %c0_7 = arith.constant 0 : index
    %c0_8 = arith.constant 0 : index
    %c0_9 = arith.constant 0 : index
    %c0_10 = arith.constant 0 : index
    %530 = vector.load %arg4[%c0_7, %c0_8, %c0_9, %c0_10] : memref<1x4x16x16xf32, #tpu.memory_space<vmem>>, vector<1x4x16x16xf32>
    %531 = vector.shape_cast %530 : vector<1x4x16x16xf32> to vector<4x16x16xf32>
    %532 = vector.shape_cast %529 : vector<4x16x16xf32> to vector<1x4x16x16xf32>
    tpu.vector_store %arg4[%c0_7, %c0_8, %c0_9, %c0_10], %532 {strides = array<i32>} : memref<1x4x16x16xf32, #tpu.memory_space<vmem>>, vector<1x4x16x16xf32>,
    return
  }
  func.func @transform_0(%arg0: i32) -> i32 {
    %c0_i32 = arith.constant 0 : i32
    %c0_i32_0 = arith.constant 0 : i32
    return %c0_i32 : i32
  }
  func.func @transform_1(%arg0: i32) -> i32 {
    %c0_i32 = arith.constant 0 : i32
    %c0_i32_0 = arith.constant 0 : i32
    return %c0_i32 : i32
  }
  func.func @transform_2(%arg0: i32) -> (i32, i32, i32, i32) {
    %c0_i32 = arith.constant 0 : i32
    %c0_i32_0 = arith.constant 0 : i32
    %c0_i32_1 = arith.constant 0 : i32
    %c0_i32_2 = arith.constant 0 : i32
    return %arg0, %c0_i32, %c0_i32_0, %c0_i32_1 : i32, i32, i32, i32
  }
  func.func @transform_3(%arg0: i32) -> (i32, i32, i32, i32) {
    %c0_i32 = arith.constant 0 : i32
    %c0_i32_0 = arith.constant 0 : i32
    %c0_i32_1 = arith.constant 0 : i32
    %c0_i32_2 = arith.constant 0 : i32
    return %arg0, %c0_i32, %c0_i32_0, %c0_i32_1 : i32, i32, i32, i32
  }
}

</mosaic_0001>

<bundles_post_ra>
// kernel: spatial_attention.1
= control target key start
LH: loop header
LB: loop body
LE: loop exit
PB: predicated region body
PF: predicated region fallthrough
CT: control target
= control target key end

     0   :  { %s3917_s0 = inlined_call_operand.vmem [shape: f32[98], index: 0, kind: input, shape index: {}]   ;;  %s3918_s1 = inlined_call_operand.<no memory space> [shape: f32[1], index: 1, kind: input, shape index: {}]   ;;  %s3919_s2 = inlined_call_operand.vmem [shape: f32[2,4,22,22], index: 2, kind: input, shape index: {}]   ;;  %s3920_s3 = inlined_call_operand.hbm [shape: f32[2,4,16,16], index: 3, kind: output, shape index: {}]  }
   0x1   :  { %8 = sst [smem:[#allocation2]] %s3918_s1 }
   0x2   :  { %9 = vsyncpa [#allocation5], 0 }
   0x3   :  { %10 = vsyncpa [#allocation4], 0 }
   0x4   :  { %12 = vsyncpa [#allocation4 + $0x1], 0  ;;  %s2633_s14 = smov 0   ;;  %s2635_s15 = smov 0  }
   0x5   :  { %s2637_s16 = smov 0   ;;  %s2639_s17 = smov 0  }
   0x6 LB: > { %s2654_s1 = sadd.s32 4294967295, %s2597_s17   ;;  %s2323_s18 = sadd.s32 4294967294, %s2597_s17   ;;  %s2597_s17 = sphi %s2639_s17, %s3927_s17   ;;  %s2593_s16 = sphi %s2637_s16, %s3926_s16   ;;  %s2589_s15 = sphi %s2635_s15, %s3925_s15   ;;  %s2585_s14 = sphi %s2633_s14, %s3924_s14  }
   0x7   : > { %s2658_s19 = sadd.s32 1, %s2597_s17   ;;  %s93_s20 = sadd.s32 1, %s2593_s16 }
   0x8   : > { %s90_s21 = ssub.s32 %s2597_s17, %s2658_s19  ;;  %p103_p0 = scmp.ne.s32.totalorder %s2593_s16, %s2589_s15 }
   0x9   : > { %p91_p1 = scmp.eq.s32.totalorder %s90_s21, 0  ;;  %p104_p2 = scmp.eq.s32.totalorder %s2654_s1, 1 }
   0xa   : > { %p109_p3 = scmp.ne.s32.totalorder %s2589_s15, %s2585_s14  ;;  %p110_p4 = scmp.eq.s32.totalorder %s2323_s18, 1 }
   0xb   : > { %s2669_s22 = scalar_select %p91_p1, %s2593_s16, %s93_s20  }
   0xc   : > { %p2671_p5 = por %p104_p2, %p103_p0  ;;  %p2675_p6 = por %p110_p4, %p109_p3 }
   0xd   : > { %p2324_p7 = scmp.ge.s32.totalorder %s2597_s17, 1  ;;  %p117_p8 = scmp.lt.s32.totalorder %s2597_s17, 3 }
   0xe   : > { %p2451_p9 = scmp.eq.s32.totalorder %s2654_s1, 0  ;;  %s130_s28 = sshll.u32 %s3917_s0, 4  ;;  %s131_s28 = int_to_ptr.vmem [resolvable:$true] %s130_s28 }
   0xf   : > { %p2682_p10 = pnand %p2324_p7, %p117_p8  ;;  %s2516_s29 = scalar_lea.vmem %s131_s28, 16 }
  0x10   : > { %p2517_p13 = scmp.ne.s32.totalorder %s131_s28, %s2516_s29  ;;  %p2524_p3 = scmp.lt.s32.totalorder %s131_s28, %s131_s28 }
  0x11   : > { %p2443_p11 = pneg %p2682_p10  ;;  %p2525_p4 = scmp.lt.s32.totalorder %s2516_s29, %s2516_s29 }
  0x13   : > { %p2444_p12 = pnand %p2451_p9, %p2443_p11  ;;  %p2526_p7 = por %p2525_p4, %p2524_p3 }
  0x15   : > { %p2518_p0 = pneg %p2444_p12 }
  0x17   : > { %p2519_p1 = pnand %p2518_p0, %p2517_p13 }
  0x19   : > { %p2520_p2 = pneg %p2519_p1 }
  0x1b   : > { %p2527_p8 = pnand %p2526_p7, %p2520_p2 }
  0x1d   : > { %2530 = shalt.err (!%p2527_p8)
}
  0x1e   : > { %s2599_s30 = smov [#allocation3]   ;;  %154 = sbr.rel (%p2682_p10) target bundleno = 804 (0x324), region = 32 }
  0x1f   : > { %2446 = dma.vmem_to_smem (!%p2444_p12), %s131_s28, 16, %s2599_s30, [#allocation5]  }
  0x25   : > { %2576 = dma.done.wait (%p2451_p9), [#allocation5], 16  }
  0x26   : > { %2578 = vsyncadd (%p2451_p9), [#allocation5], 4294967280 }
  0x27   : > { %160 = sfence }
  0x28   : > { %p179_p11 = scmp.lt.s32.totalorder %s2654_s1, 1  ;;  %s2701_s5 = sld [smem:[#allocation3 + $0x2]]  ;;  %vm409_vm0 = vcmask 1046528   ;;  %vm696_vm1 = vcmask 1045504   ;;  %vm983_vm2 = vcmask 1044480   ;;  %vm1270_vm3 = vcmask 1043456  }
  0x29   : > { %s2703_s7 = sld [smem:[#allocation3 + $0x1]]  ;;  %s2705_s8 = sld [smem:[#allocation3 + $0x3]]  ;;  %vm1557_vm4 = vcmask 1042432   ;;  %vm1844_vm5 = vcmask 1041408   ;;  %vm2220_vm6 = vcmask 130051   ;;  %vm2224_vm7 = vcmask 124928  }
  0x2a   : > { %s180_s4 = scalar_select %p179_p11, %s2654_s1, 1  ;;  %vm2222_vm8 = vcmask 130048  }
  0x2b   : > { %s2719_s12 = sld [smem:[#allocation3 + $0x32]]  ;;  %s2600_s13 = smov 126  }
  0x2c   : > { %s2436_s6 = smul.u32 96, %s180_s4  ;;  %s2335_s18 = sld [smem:[#allocation3 + $0x33]] }
  0x2d   : > { %s2601_s20 = smov 127   ;;  %s2602_s21 = smov 125  }
  0x2e   : > { %s2710_s11 = scalar_lea.vmem %s3919_s2, %s2436_s6  ;;  %v262_v13 = vstv %s2701_s5  ;;  %s2337_s25 = sld [smem:[#allocation3 + $0x34]] }
  0x2f   : > { %v185_v0 = vld [vmem:[%s2710_s11 + $0x8] sm:$0xff]  ;;  %v187_v1 = vld [vmem:[%s2710_s11 + $0x18] sm:$0xff]  ;;  %v188_v2 = vld [vmem:[%s2710_s11 + $0x20] sm:$0xff]  ;;  %v234_v18 = vstv %s2703_s7  ;;  %s2338_s26 = sld [smem:[#allocation3 + $0x4]]  ;;  %s2339_s27 = sld [smem:[#allocation3 + $0x35]] }
  0x30   : > { %v191_v3 = vld [vmem:[%s2710_s11 + $0x38] sm:$0xff]  ;;  %v197_v4 = vmax.f32 %v185_v0, %v188_v2  ;;  %v200_v5 = vadd.f32 %v188_v2, %v185_v0  ;;  %v190_v6 = vld [vmem:[%s2710_s11 + $0x30] sm:$0xff]  ;;  %v184_v8 = vld [vmem:[%s2710_s11] sm:$0xff]  ;;  %v290_v19 = vstv %s2705_s8  ;;  %s2754_s28 = sld [smem:[#allocation3 + $0x5]]  ;;  %s2760_s29 = sld [smem:[#allocation3 + $0x36]] }
  0x31   : > { %v194_v7 = vld [vmem:[%s2710_s11 + $0x50] sm:$0xff]  ;;  %v196_v10 = vmax.f32 %v184_v8, %v187_v1  ;;  %v199_v11 = vadd.f32 %v187_v1, %v184_v8  ;;  %v193_v12 = vld [vmem:[%s2710_s11 + $0x48] sm:$0xff]  ;;  %v247_v27 = vstv %s2719_s12  ;;  %s2603_s30 = smov 124   ;;  %s2769_s4 = sld [smem:[#allocation3 + $0x6]]  ;;  %v192_v51 = vld [vmem:[%s2710_s11 + $0x40] sm:$0x3f] }
  0x32   : > { %v203_v9 = vmax.f32 %v197_v4, %v191_v3  ;;  %v206_v17 = vadd.f32 %v200_v5, %v191_v3  ;;  %v275_v33 = vstv %s2335_s18  ;;  %v186_v44 = vld [vmem:[%s2710_s11 + $0x10] sm:$0x3f]  ;;  %v189_v45 = vld [vmem:[%s2710_s11 + $0x28] sm:$0x3f]  ;;  %s2346_s5 = sld [smem:[#allocation3 + $0x8]]  ;;  %s2776_s6 = sld [smem:[#allocation3 + $0x37]] }
  0x33   : > { %v202_v15 = vmax.f32 %v196_v10, %v190_v6  ;;  %v205_v16 = vadd.f32 %v199_v11, %v190_v6  ;;  %v198_v48 = vmax.f32 %v186_v44, %v189_v45  ;;  %v201_v49 = vadd.f32 %v189_v45, %v186_v44  ;;  %s2347_s7 = sld [smem:[#allocation3 + $0x39]]  ;;  %v195_v57 = vld [vmem:[%s2710_s11 + $0x58] sm:$0x3f]  ;;  %s2604_s8 = smov 123  }
  0x34   : > { %v2723_v14 = vmax.f32 %v203_v9, %v194_v7  ;;  %v212_v25 = vadd.f32 %v206_v17, %v194_v7  ;;  %v303_v36 = vstv %s2337_s25  ;;  %s2348_s9 = sld [smem:[#allocation3 + $0x9]]  ;;  %s2349_s10 = sld [smem:[#allocation3 + $0x3a]] }
  0x35   : > { %v2728_v21 = vmax.f32 %v202_v15, %v193_v12  ;;  %v211_v22 = vadd.f32 %v205_v16, %v193_v12  ;;  %v318_v39 = vstv %s2338_s26  ;;  %v331_v42 = vstv %s2339_s27  ;;  %s2605_s12 = smov 122   ;;  %s2350_s18 = sld [smem:[#allocation3 + $0xa]] }
  0x36   : > { %v264_v20 = vmul.f32 %v262_v13, %v2723_v14  ;;  %v292_v24 = vmul.f32 %v290_v19, %v2723_v14  ;;  %v236_v28 = vmul.f32 %v234_v18, %v2723_v14  ;;  %v2740_v30 = vmul.f32 0.25, %v212_v25  ;;  %s2351_s25 = sld [smem:[#allocation3 + $0x3b]]  ;;  %s2353_s27 = sld [smem:[#allocation3 + $0x3c]] }
  0x37   : > { %v235_v23 = vmul.f32 %v234_v18, %v2728_v21  ;;  %v2733_v26 = vmul.f32 0.25, %v211_v22  ;;  %v263_v31 = vmul.f32 %v262_v13, %v2728_v21  ;;  %v291_v34 = vmul.f32 %v290_v19, %v2728_v21  ;;  %s2352_s26 = sld [smem:[#allocation3 + $0xb]] }
  0x38   : > { %269 = vrot.lane.b32.xlu1 %v264_v20, %s2600_s13  ;;  %v249_v32 = vmul.f32 %v247_v27, %v2740_v30  ;;  %v277_v35 = vmul.f32 %v275_v33, %v2740_v30  ;;  %v305_v38 = vmul.f32 %v303_v36, %v2740_v30  ;;  %v320_v41 = vmul.f32 %v318_v39, %v2723_v14 }
  0x39   : > { %239 = vrot.lane.b32.xlu0 %v235_v23, %s2601_s20  ;;  %v248_v29 = vmul.f32 %v247_v27, %v2733_v26  ;;  %v276_v37 = vmul.f32 %v275_v33, %v2733_v26  ;;  %v304_v40 = vmul.f32 %v303_v36, %v2733_v26  ;;  %v319_v43 = vmul.f32 %v318_v39, %v2728_v21 }
  0x3a   : > { %v333_v46 = vmul.f32 %v331_v42, %v2740_v30  ;;  %v346_v47 = vstv %s2754_s28  ;;  %v332_v50 = vmul.f32 %v331_v42, %v2733_v26  ;;  %v359_v53 = vstv %s2760_s29  ;;  %s2354_s28 = sld [smem:[#allocation3 + $0xc]]  ;;  %s2355_s29 = sld [smem:[#allocation3 + $0x3d]] }
  0x3b   : > { %v348_v52 = vmul.f32 %v346_v47, %v2723_v14  ;;  %v204_v54 = vmax.f32 %v198_v48, %v192_v51  ;;  %v207_v55 = vadd.f32 %v201_v49, %v192_v51  ;;  %v347_v56 = vmul.f32 %v346_v47, %v2728_v21 }
  0x3c   : > { %297 = vrot.lane.b32.xlu1 %v292_v24, %s2602_s21  ;;  %v361_v58 = vmul.f32 %v359_v53, %v2740_v30  ;;  %v374_v59 = vstv %s2769_s4  ;;  %v360_v62 = vmul.f32 %v359_v53, %v2733_v26  ;;  %v437_v63 = vstv %s2346_s5  ;;  %s2356_s4 = sld [smem:[#allocation3 + $0xd]]  ;;  %s2357_s5 = sld [smem:[#allocation3 + $0x3e]] }
  0x3d   : > { %241 = vrot.lane.b32.xlu0 %v236_v28, %s2601_s20  ;;  %v2785_v60 = vmax.f32 %v204_v54, %v195_v57  ;;  %v213_v61 = vadd.f32 %v207_v55, %v195_v57  ;;  %v376_v0 = vmul.f32 %v374_v59, %v2723_v14  ;;  %v387_v1 = vstv %s2776_s6  ;;  %s2360_s6 = sld [smem:[#allocation3 + $0xf]] }
  0x3e   : > { %v439_v2 = vmul.f32 %v437_v63, %v2723_v14  ;;  %v457_v5 = vstv %s2347_s7  ;;  %v375_v6 = vmul.f32 %v374_v59, %v2728_v21  ;;  %v438_v7 = vmul.f32 %v437_v63, %v2728_v21  ;;  %s2361_s7 = sld [smem:[#allocation3 + $0x40]] }
  0x3f   : > { %v440_v3 = vmul.f32 %v437_v63, %v2785_v60  ;;  %v2794_v4 = vmul.f32 0.25, %v213_v61  ;;  %v389_v8 = vmul.f32 %v387_v1, %v2740_v30  ;;  %v459_v9 = vmul.f32 %v457_v5, %v2740_v30 }
  0x40   : > { %252 = vrot.lane.b32.xlu1 %v248_v29, %s2601_s20  ;;  %v445_v10 = vrot.slane %v439_v2, 1  ;;  %v479_v13 = vstv %s2348_s9  ;;  %v388_v15 = vmul.f32 %v387_v1, %v2733_v26  ;;  %v444_v16 = vrot.slane %v438_v7, 1  ;;  %s2362_s9 = sld [smem:[#allocation3 + $0x10]] }
  0x41   : > { %267 = vrot.lane.b32.xlu0 %v263_v31, %s2600_s13  ;;  %v447_v11 = vrot.slane %v440_v3, 1  ;;  %v460_v12 = vmul.f32 %v457_v5, %v2794_v4  ;;  %v458_v17 = vmul.f32 %v457_v5, %v2733_v26  ;;  %v465_v18 = vrot.slane %v459_v9, 1 }
  0x42   : > { %v481_v19 = vmul.f32 %v479_v13, %v2723_v14  ;;  %v482_v23 = vmul.f32 %v479_v13, %v2785_v60  ;;  %v499_v24 = vstv %s2349_s10  ;;  %v446_v25 = vsel %vm409_vm0, %v444_v16, %v445_v10  ;;  %s2363_s10 = sld [smem:[#allocation3 + $0x41]] }
  0x43   : > { %v448_v20 = vsel %vm409_vm0, %v445_v10, %v447_v11  ;;  %v467_v22 = vrot.slane %v460_v12, 1  ;;  %v464_v27 = vrot.slane %v458_v17, 1  ;;  %v480_v28 = vmul.f32 %v479_v13, %v2728_v21 }
  0x44   : > { %254 = vrot.lane.b32.xlu1 %v249_v32, %s2601_s20  ;;  %v501_v29 = vmul.f32 %v499_v24, %v2740_v30  ;;  %v502_v31 = vmul.f32 %v499_v24, %v2794_v4  ;;  %v487_v33 = vrot.slane %v481_v19, 1  ;;  %v541_v44 = vstv %s2351_s25  ;;  %s2365_s25 = sld [smem:[#allocation3 + $0x42]] }
  0x45   : > { %295 = vrot.lane.b32.xlu0 %v291_v34, %s2602_s21  ;;  %v468_v32 = vsel %vm409_vm0, %v465_v18, %v467_v22  ;;  %v489_v34 = vrot.slane %v482_v23, 1  ;;  %v466_v36 = vsel %vm409_vm0, %v464_v27, %v465_v18  ;;  %v543_v51 = vmul.f32 %v541_v44, %v2740_v30 }
  0x46   : > { %v507_v39 = vrot.slane %v501_v29, 1  ;;  %v563_v53 = vstv %s2352_s26  ;;  %v583_v63 = vstv %s2353_s27  ;;  %v605_v9 = vstv %s2354_s28  ;;  %s2366_s26 = sld [smem:[#allocation3 + $0x12]]  ;;  %s2367_s27 = sld [smem:[#allocation3 + $0x43]] }
  0x47   : > { %v490_v42 = vsel %vm409_vm0, %v487_v33, %v489_v34  ;;  %v565_v57 = vmul.f32 %v563_v53, %v2723_v14  ;;  %v549_v61 = vrot.slane %v543_v51, 1  ;;  %v564_v2 = vmul.f32 %v563_v53, %v2728_v21  ;;  %s2368_s28 = sld [smem:[#allocation3 + $0x13]] }
  0x48   : > { %282 = vrot.lane.b32.xlu1 %v277_v35, %s2600_s13  ;;  %v521_v35 = vstv %s2350_s18  ;;  %v585_v7 = vmul.f32 %v583_v63, %v2740_v30  ;;  %v584_v12 = vmul.f32 %v583_v63, %v2733_v26  ;;  %v607_v18 = vmul.f32 %v605_v9, %v2723_v14  ;;  %s2364_s18 = sld [smem:[#allocation3 + $0x11]] }
  0x49   : > { %280 = vrot.lane.b32.xlu0 %v276_v37, %s2600_s13  ;;  %v486_v37 = vrot.slane %v480_v28, 1  ;;  %v522_v47 = vmul.f32 %v521_v35, %v2728_v21  ;;  %v571_v3 = vrot.slane %v565_v57, 1  ;;  %v570_v11 = vrot.slane %v564_v2, 1 }
  0x4a   : > { %v591_v16 = vrot.slane %v585_v7, 1  ;;  %v608_v19 = vmul.f32 %v605_v9, %v2785_v60  ;;  %v590_v22 = vrot.slane %v584_v12, 1  ;;  %v606_v23 = vmul.f32 %v605_v9, %v2728_v21 }
  0x4b   : > { %v488_v45 = vsel %vm409_vm0, %v486_v37, %v487_v33  ;;  %v528_v55 = vrot.slane %v522_v47, 1  ;;  %v613_v28 = vrot.slane %v607_v18, 1 }
  0x4c   : > { %310 = vrot.lane.b32.xlu1 %v305_v38, %s2602_s21  ;;  %v500_v38 = vmul.f32 %v499_v24, %v2733_v26  ;;  %v615_v29 = vrot.slane %v608_v19, 1  ;;  %v612_v33 = vrot.slane %v606_v23, 1 }
  0x4d   : > { %308 = vrot.lane.b32.xlu0 %v304_v40, %s2602_s21  ;;  %v509_v40 = vrot.slane %v502_v31, 1  ;;  %v647_v31 = vstv %s2356_s4  ;;  %s2370_s4 = sld [smem:[#allocation3 + $0x14]] }
  0x4e   : > { %v649_v37 = vmul.f32 %v647_v31, %v2723_v14 }
  0x4f   : > { %v510_v48 = vsel %vm409_vm0, %v507_v39, %v509_v40  ;;  %v667_v40 = vstv %s2357_s5  ;;  %s2371_s5 = sld [smem:[#allocation3 + $0x45]] }
  0x50   : > { %325 = vrot.lane.b32.xlu1 %v320_v41, %s2603_s30  ;;  %v523_v41 = vmul.f32 %v521_v35, %v2723_v14  ;;  %v669_v47 = vmul.f32 %v667_v40, %v2740_v30 }
  0x51   : > { %323 = vrot.lane.b32.xlu0 %v319_v43, %s2603_s30  ;;  %v524_v43 = vmul.f32 %v521_v35, %v2785_v60 }
  0x52   : > { %v529_v49 = vrot.slane %v523_v41, 1  ;;  %v614_v41 = vsel %vm409_vm0, %v612_v33, %v613_v28 }
  0x54   : > { %338 = vrot.lane.b32.xlu1 %v333_v46, %s2603_s30  ;;  %v506_v46 = vrot.slane %v500_v38, 1  ;;  %v616_v38 = vsel %vm409_vm0, %v613_v28, %v615_v29 }
  0x55   : > { %336 = vrot.lane.b32.xlu0 %v332_v50, %s2603_s30  ;;  %v531_v50 = vrot.slane %v524_v43, 1  ;;  %v648_v43 = vmul.f32 %v647_v31, %v2728_v21 }
  0x56   : > { %v508_v54 = vsel %vm409_vm0, %v506_v46, %v507_v39  ;;  %v650_v39 = vmul.f32 %v647_v31, %v2785_v60 }
  0x57   : > { %v532_v59 = vsel %vm409_vm0, %v529_v49, %v531_v50  ;;  %v654_v51 = vrot.slane %v648_v43, 1 }
  0x58   : > { %353 = vrot.lane.b32.xlu1 %v348_v52, %s2604_s8  ;;  %v544_v52 = vmul.f32 %v541_v44, %v2794_v4  ;;  %v657_v46 = vrot.slane %v650_v39, 1 }
  0x59   : > { %351 = vrot.lane.b32.xlu0 %v347_v56, %s2604_s8  ;;  %v542_v56 = vmul.f32 %v541_v44, %v2733_v26 }
  0x5b   : > { %v548_v1 = vrot.slane %v542_v56, 1  ;;  %v675_v56 = vrot.slane %v669_v47, 1 }
  0x5c   : > { %366 = vrot.lane.b32.xlu1 %v361_v58, %s2604_s8  ;;  %v566_v58 = vmul.f32 %v563_v53, %v2785_v60 }
  0x5d   : > { %364 = vrot.lane.b32.xlu0 %v360_v62, %s2604_s8  ;;  %v551_v62 = vrot.slane %v544_v52, 1  ;;  %v550_v10 = vsel %vm409_vm0, %v548_v1, %v549_v61  ;;  %v668_v52 = vmul.f32 %v667_v40, %v2733_v26 }
  0x5e   : > { %v573_v5 = vrot.slane %v566_v58, 1  ;;  %v744_v58 = vstv %s2361_s7  ;;  %s2375_s7 = sld [smem:[#allocation3 + $0x47]] }
  0x5f   : > { %v746_v2 = vmul.f32 %v744_v58, %v2740_v30 }
  0x60   : > { %381 = vrot.lane.b32.xlu1 %v376_v0, %s2605_s12  ;;  %v530_v0 = vsel %vm409_vm0, %v528_v55, %v529_v49  ;;  %v574_v13 = vsel %vm409_vm0, %v571_v3, %v573_v5  ;;  %v724_v49 = vstv %s2360_s6  ;;  %v766_v5 = vstv %s2362_s9  ;;  %s2374_s6 = sld [smem:[#allocation3 + $0x16]]  ;;  %s2376_s9 = sld [smem:[#allocation3 + $0x17]] }
  0x61   : > { %379 = vrot.lane.b32.xlu0 %v375_v6, %s2605_s12  ;;  %v552_v6 = vsel %vm409_vm0, %v549_v61, %v551_v62  ;;  %v726_v53 = vmul.f32 %v724_v49, %v2723_v14  ;;  %v674_v61 = vrot.slane %v668_v52, 1  ;;  %v725_v62 = vmul.f32 %v724_v49, %v2728_v21 }
  0x62   : > { %v767_v18 = vmul.f32 %v766_v5, %v2728_v21 }
  0x63   : > { %v731_v7 = vrot.slane %v725_v62, 2 }
  0x64   : > { %394 = vrot.lane.b32.xlu1 %v389_v8, %s2605_s12  ;;  %v586_v8 = vmul.f32 %v583_v63, %v2794_v4  ;;  %v732_v63 = vrot.slane %v726_v53, 2  ;;  %v773_v28 = vrot.slane %v767_v18, 2 }
  0x65   : > { %392 = vrot.lane.b32.xlu0 %v388_v15, %s2605_s12  ;;  %v625_v15 = vstv %s2355_s29  ;;  %s2369_s29 = sld [smem:[#allocation3 + $0x44]] }
  0x66   : > { %v593_v17 = vrot.slane %v586_v8, 1  ;;  %v627_v24 = vmul.f32 %v625_v15, %v2740_v30  ;;  %v626_v34 = vmul.f32 %v625_v15, %v2733_v26  ;;  %v745_v8 = vmul.f32 %v744_v58, %v2733_v26 }
  0x68   : > { %451 = vrot.lane.b32.xlu1 %v448_v20, %s2601_s20  ;;  %v572_v20 = vsel %vm409_vm0, %v570_v11, %v571_v3  ;;  %v594_v27 = vsel %vm409_vm0, %v591_v16, %v593_v17  ;;  %v633_v35 = vrot.slane %v627_v24, 1  ;;  %v747_v3 = vmul.f32 %v744_v58, %v2794_v4 }
  0x69   : > { %449 = vrot.lane.b32.xlu0 %v446_v25, %s2601_s20  ;;  %v628_v25 = vmul.f32 %v625_v15, %v2794_v4  ;;  %v752_v11 = vrot.slane %v746_v2, 2  ;;  %v769_v15 = vmul.f32 %v766_v5, %v2785_v60  ;;  %v751_v17 = vrot.slane %v745_v8, 2 }
  0x6a   : > { %v754_v12 = vrot.slane %v747_v3, 2 }
  0x6b   : > { %v776_v24 = vrot.slane %v769_v15, 2 }
  0x6c   : > { %471 = vrot.lane.b32.xlu1 %v468_v32, %s2601_s20  ;;  %v592_v32 = vsel %vm409_vm0, %v590_v22, %v591_v16  ;;  %v733_v16 = vsel %vm696_vm1, %v731_v7, %v732_v63  ;;  %v755_v22 = vsel %vm696_vm1, %v752_v11, %v754_v12  ;;  %v912_v12 = vstv %s2369_s29  ;;  %s3033_s29 = sld [smem:[#allocation3 + $0x19]] }
  0x6d   : > { %469 = vrot.lane.b32.xlu0 %v466_v36, %s2601_s20  ;;  %v635_v36 = vrot.slane %v628_v25, 1  ;;  %v808_v25 = vstv %s2364_s18  ;;  %s2986_s18 = sld [smem:[#allocation3]] }
  0x6e   : > { %v810_v33 = vmul.f32 %v808_v25, %v2723_v14  ;;  %v809_v39 = vmul.f32 %v808_v25, %v2728_v21 }
  0x6f   : > { %v636_v44 = vsel %vm409_vm0, %v633_v35, %v635_v36  ;;  %v828_v36 = vstv %s2365_s25  ;;  %s2999_s25 = sld [smem:[#allocation3 + $0x18]] }
  0x70   : > { %493 = vrot.lane.b32.xlu1 %v490_v42, %s2600_s13  ;;  %v632_v42 = vrot.slane %v626_v34, 1  ;;  %v830_v43 = vmul.f32 %v828_v36, %v2740_v30  ;;  %v815_v47 = vrot.slane %v809_v39, 2  ;;  %v954_v39 = vstv %s2371_s5  ;;  %s3065_s5 = sld [smem:[#allocation3 + $0x1a]] }
  0x71   : > { %491 = vrot.lane.b32.xlu0 %v488_v45, %s2600_s13  ;;  %v655_v45 = vrot.slane %v649_v37, 1 }
  0x72   : > { %v634_v50 = vsel %vm409_vm0, %v632_v42, %v633_v35  ;;  %v811_v35 = vmul.f32 %v808_v25, %v2785_v60  ;;  %v836_v52 = vrot.slane %v830_v43, 2  ;;  %v934_v25 = vstv %s2370_s4  ;;  %s3053_s4 = sld [smem:[#allocation3 + $0x4a]] }
  0x73   : > { %v658_v55 = vsel %vm409_vm0, %v655_v45, %v657_v46 }
  0x74   : > { %513 = vrot.lane.b32.xlu1 %v510_v48, %s2600_s13  ;;  %v670_v48 = vmul.f32 %v667_v40, %v2794_v4  ;;  %v818_v42 = vrot.slane %v811_v35, 2  ;;  %v936_v35 = vmul.f32 %v934_v25, %v2723_v14 }
  0x75   : > { %511 = vrot.lane.b32.xlu0 %v508_v54, %s2600_s13  ;;  %v727_v54 = vmul.f32 %v724_v49, %v2785_v60 }
  0x76   : > { %v677_v57 = vrot.slane %v670_v48, 1  ;;  %v829_v48 = vmul.f32 %v828_v36, %v2733_v26 }
  0x78   : > { %535 = vrot.lane.b32.xlu1 %v532_v59, %s2602_s21  ;;  %v656_v59 = vsel %vm409_vm0, %v654_v51, %v655_v45  ;;  %v678_v1 = vsel %vm409_vm0, %v675_v56, %v677_v57  ;;  %v850_v45 = vstv %s2366_s26  ;;  %s3001_s26 = sld [smem:[#allocation2]] }
  0x79   : > { %533 = vrot.lane.b32.xlu0 %v530_v0, %s2602_s21  ;;  %v734_v0 = vrot.slane %v727_v54, 2  ;;  %v852_v49 = vmul.f32 %v850_v45, %v2723_v14  ;;  %v870_v54 = vstv %s2367_s27  ;;  %v851_v57 = vmul.f32 %v850_v45, %v2728_v21  ;;  %s3003_s27 = sld [smem:[#allocation3 + $0x31]] }
  0x7a   : > { %v872_v62 = vmul.f32 %v870_v54, %v2740_v30 }
  0x7b   : > { %v735_v9 = vsel %vm696_vm1, %v732_v63, %v734_v0  ;;  %v858_v58 = vrot.slane %v852_v49, 2  ;;  %v873_v63 = vmul.f32 %v870_v54, %v2794_v4  ;;  %v892_v0 = vstv %s2368_s28  ;;  %s3021_s28 = sld [smem:[#allocation3 + $0x49]] }
  0x7c   : > { %555 = vrot.lane.b32.xlu1 %v552_v6, %s2602_s21  ;;  %v676_v6 = vsel %vm409_vm0, %v674_v61, %v675_v56  ;;  %v835_v56 = vrot.slane %v829_v48, 2  ;;  %v857_v3 = vrot.slane %v851_v57, 2  ;;  %v894_v8 = vmul.f32 %v892_v0, %v2723_v14 }
  0x7d   : > { %553 = vrot.lane.b32.xlu0 %v550_v10, %s2602_s21  ;;  %v786_v10 = vstv %s2363_s10  ;;  %v957_v48 = vmul.f32 %v954_v39, %v2794_v4  ;;  %v1011_v49 = vstv %s2374_s6  ;;  %s2982_s10 = sld [smem:[#allocation3 + $0x48]]  ;;  %s3080_s6 = sld [smem:[#allocation3 + $0x4b]] }
  0x7e   : > { %v788_v19 = vmul.f32 %v786_v10, %v2740_v30  ;;  %v787_v29 = vmul.f32 %v786_v10, %v2733_v26  ;;  %v837_v2 = vsel %vm696_vm1, %v835_v56, %v836_v52  ;;  %v859_v15 = vsel %vm696_vm1, %v857_v3, %v858_v58 }
  0x80   : > { %577 = vrot.lane.b32.xlu1 %v574_v13, %s2603_s30  ;;  %v768_v13 = vmul.f32 %v766_v5, %v2723_v14  ;;  %v794_v31 = vrot.slane %v788_v19, 2  ;;  %v871_v5 = vmul.f32 %v870_v54, %v2733_v26  ;;  %v914_v19 = vmul.f32 %v912_v12, %v2740_v30 }
  0x81   : > { %575 = vrot.lane.b32.xlu0 %v572_v20, %s2603_s30  ;;  %v789_v20 = vmul.f32 %v786_v10, %v2794_v4  ;;  %v880_v10 = vrot.slane %v873_v63, 2 }
  0x82   : > { %v774_v23 = vrot.slane %v768_v13, 2 }
  0x84   : > { %597 = vrot.lane.b32.xlu1 %v594_v27, %s2603_s30  ;;  %v753_v27 = vsel %vm696_vm1, %v751_v17, %v752_v11  ;;  %v777_v34 = vsel %vm696_vm1, %v774_v23, %v776_v24  ;;  %v775_v37 = vsel %vm696_vm1, %v773_v28, %v774_v23  ;;  %v895_v11 = vmul.f32 %v892_v0, %v2785_v60 }
  0x85   : > { %595 = vrot.lane.b32.xlu0 %v592_v32, %s2603_s30  ;;  %v796_v32 = vrot.slane %v789_v20, 2  ;;  %v893_v17 = vmul.f32 %v892_v0, %v2728_v21  ;;  %v915_v20 = vmul.f32 %v912_v12, %v2794_v4  ;;  %v900_v23 = vrot.slane %v894_v8, 2 }
  0x86   : > { %v902_v24 = vrot.slane %v895_v11, 2 }
  0x87   : > { %v797_v40 = vsel %vm696_vm1, %v794_v31, %v796_v32 }
  0x88   : > { %619 = vrot.lane.b32.xlu1 %v616_v38, %s2604_s8  ;;  %v793_v38 = vrot.slane %v787_v29, 2  ;;  %v899_v29 = vrot.slane %v893_v17, 2 }
  0x89   : > { %617 = vrot.lane.b32.xlu0 %v614_v41, %s2604_s8  ;;  %v816_v41 = vrot.slane %v810_v33, 2  ;;  %v920_v33 = vrot.slane %v914_v19, 2 }
  0x8a   : > { %v795_v46 = vsel %vm696_vm1, %v793_v38, %v794_v31  ;;  %v913_v31 = vmul.f32 %v912_v12, %v2733_v26 }
  0x8b   : > { %v819_v51 = vsel %vm696_vm1, %v816_v41, %v818_v42  ;;  %v935_v42 = vmul.f32 %v934_v25, %v2728_v21 }
  0x8c   : > { %639 = vrot.lane.b32.xlu1 %v636_v44, %s2604_s8  ;;  %v831_v44 = vmul.f32 %v828_v36, %v2794_v4  ;;  %v903_v36 = vsel %vm696_vm1, %v900_v23, %v902_v24 }
  0x8d   : > { %637 = vrot.lane.b32.xlu0 %v634_v50, %s2604_s8  ;;  %v853_v50 = vmul.f32 %v850_v45, %v2785_v60  ;;  %v942_v45 = vrot.slane %v936_v35, 2 }
  0x8e   : > { %v838_v53 = vrot.slane %v831_v44, 2 }
  0x90   : > { %661 = vrot.lane.b32.xlu1 %v658_v55, %s2605_s12  ;;  %v817_v55 = vsel %vm696_vm1, %v815_v47, %v816_v41  ;;  %v839_v61 = vsel %vm696_vm1, %v836_v52, %v838_v53  ;;  %v919_v41 = vrot.slane %v913_v31, 2  ;;  %v956_v47 = vmul.f32 %v954_v39, %v2740_v30 }
  0x91   : > { %659 = vrot.lane.b32.xlu0 %v656_v59, %s2605_s12  ;;  %v860_v59 = vrot.slane %v853_v50, 2  ;;  %v941_v52 = vrot.slane %v935_v42, 2  ;;  %v955_v53 = vmul.f32 %v954_v39, %v2733_v26 }
  0x92   : > { %v962_v57 = vrot.slane %v956_v47, 2  ;;  %v227_v47 = vstv %s3003_s27  ;;  %s3177_s27 = sld [smem:[#allocation3 + $0x1e]] }
  0x93   : > { %v861_v7 = vsel %vm696_vm1, %v858_v58, %v860_v59  ;;  %v964_v58 = vrot.slane %v957_v48, 2  ;;  %v1014_v59 = vmul.f32 %v1011_v49, %v2785_v60  ;;  %v943_v63 = vsel %vm696_vm1, %v941_v52, %v942_v45 }
  0x94   : > { %681 = vrot.lane.b32.xlu1 %v678_v1, %s2605_s12  ;;  %v961_v0 = vrot.slane %v955_v53, 2 }
  0x95   : > { %679 = vrot.lane.b32.xlu0 %v676_v6, %s2605_s12  ;;  %v965_v8 = vsel %vm696_vm1, %v962_v57, %v964_v58 }
  0x98   : > { %738 = vrot.lane.b32.xlu1 %v735_v9, %s2601_s20  ;;  %v878_v9 = vrot.slane %v872_v62, 2  ;;  %v1031_v62 = vstv %s2375_s7  ;;  %s3096_s7 = sld [smem:[#allocation3 + $0x1b]] }
  0x99   : > { %736 = vrot.lane.b32.xlu0 %v733_v16, %s2601_s20  ;;  %v877_v16 = vrot.slane %v871_v5, 2  ;;  %v1034_v11 = vmul.f32 %v1031_v62, %v2794_v4  ;;  %v1032_v17 = vmul.f32 %v1031_v62, %v2733_v26 }
  0x9b   : > { %v879_v28 = vsel %vm696_vm1, %v877_v16, %v878_v9  ;;  %v1038_v35 = vrot.slane %v1032_v17, 3 }
  0x9c   : > { %758 = vrot.lane.b32.xlu1 %v755_v22, %s2601_s20  ;;  %v881_v22 = vsel %vm696_vm1, %v878_v9, %v880_v10  ;;  %v1021_v9 = vrot.slane %v1014_v59, 3  ;;  %v1033_v10 = vmul.f32 %v1031_v62, %v2740_v30 }
  0x9d   : > { %756 = vrot.lane.b32.xlu0 %v753_v27, %s2601_s20 }
  0x9e   : > { %v1039_v24 = vrot.slane %v1033_v10, 3 }
  0xa0   : > { %780 = vrot.lane.b32.xlu1 %v777_v34, %s2600_s13  ;;  %v922_v34 = vrot.slane %v915_v20, 2 }
  0xa1   : > { %778 = vrot.lane.b32.xlu0 %v775_v37, %s2600_s13  ;;  %v937_v37 = vmul.f32 %v934_v25, %v2785_v60  ;;  %v1041_v25 = vrot.slane %v1034_v11, 3 }
  0xa2   : > { %v923_v44 = vsel %vm696_vm1, %v920_v33, %v922_v34 }
  0xa4   : > { %800 = vrot.lane.b32.xlu1 %v797_v40, %s2600_s13  ;;  %v901_v40 = vsel %vm696_vm1, %v899_v29, %v900_v23  ;;  %v222_v29 = vstv %s2986_s18  ;;  %s3117_s18 = sld [smem:[#allocation3 + $0x4c]] }
  0xa5   : > { %798 = vrot.lane.b32.xlu0 %v795_v46, %s2600_s13  ;;  %v944_v46 = vrot.slane %v937_v37, 2 }
  0xa7   : > { %v945_v56 = vsel %vm696_vm1, %v942_v45, %v944_v46  ;;  %v1095_v45 = vstv %s2999_s25  ;;  %v218_v46 = vstv %s3001_s26  ;;  %s3133_s25 = sld [smem:[#allocation3 + $0x1d]]  ;;  %s3151_s26 = sld [smem:[#allocation3 + $0x4e]] }
  0xa8   : > { %822 = vrot.lane.b32.xlu1 %v819_v51, %s2602_s21  ;;  %v921_v51 = vsel %vm696_vm1, %v919_v41, %v920_v33  ;;  %v224_v33 = vmul.f32 %v222_v29, %v2723_v14  ;;  %v1042_v41 = vsel %vm983_vm2, %v1039_v24, %v1041_v25  ;;  %v1097_v59 = vmul.f32 %v1095_v45, %v2723_v14 }
  0xa9   : > { %820 = vrot.lane.b32.xlu0 %v817_v55, %s2602_s21  ;;  %v1013_v55 = vmul.f32 %v1011_v49, %v2723_v14 }
  0xaa   : > { %v2930_v1 = vpop.permute.xlu1 %269 }
  0xab   : > { %v2934_v6 = vpop.permute.xlu0 %239  ;;  %v1019_v5 = vrot.slane %v1013_v55, 3  ;;  %v229_v55 = vmul.f32 %v227_v47, %v2740_v30 }
  0xac   : > { %842 = vrot.lane.b32.xlu1 %v839_v61, %s2602_s21 }
  0xad   : > { %840 = vrot.lane.b32.xlu0 %v837_v2, %s2602_s21  ;;  %v1012_v2 = vmul.f32 %v1011_v49, %v2728_v21  ;;  %v1022_v23 = vsel %vm983_vm2, %v1019_v5, %v1021_v9  ;;  %v226_v49 = vadd.f32 %v224_v33, %v218_v46  ;;  %v1096_v9 = vmul.f32 %v1095_v45, %v2728_v21 }
  0xae   : > { %v2941_v13 = vpop.permute.xlu1 %297 }
  0xaf   : > { %v2945_v18 = vpop.permute.xlu0 %241  ;;  %v1018_v16 = vrot.slane %v1012_v2, 3  ;;  %v1115_v2 = vstv %s3021_s28  ;;  %v231_v10 = vadd.f32 %v229_v55, %v226_v49  ;;  %s3211_s28 = sld [smem:[#allocation3 + $0x4f]] }
  0xb0   : > { %864 = vrot.lane.b32.xlu1 %v861_v7, %s2603_s30  ;;  %v1053_v7 = vstv %s2376_s9  ;;  %v1116_v25 = vmul.f32 %v1115_v2, %v2733_v26  ;;  %s3098_s9 = sld [smem:[#allocation3 + $0x7]] }
  0xb1   : > { %862 = vrot.lane.b32.xlu0 %v859_v15, %s2603_s30  ;;  %v963_v15 = vsel %vm696_vm1, %v961_v0, %v962_v57  ;;  %v1055_v20 = vmul.f32 %v1053_v7, %v2723_v14  ;;  %v1020_v34 = vsel %vm983_vm2, %v1018_v16, %v1019_v5  ;;  %v223_v5 = vmul.f32 %v222_v29, %v2728_v21 }
  0xb2   : > { %v2952_v27 = vpop.permute.xlu1 %252  ;;  %v1103_v16 = vrot.slane %v1097_v59, 3 }
  0xb3   : > { %v2956_v32 = vpop.permute.xlu0 %267  ;;  %v1061_v42 = vrot.slane %v1055_v20, 3  ;;  %v1117_v20 = vmul.f32 %v1115_v2, %v2740_v30  ;;  %v225_v29 = vadd.f32 %v223_v5, %v218_v46  ;;  %v1122_v46 = vrot.slane %v1116_v25, 3 }
  0xb4   : > { %884 = vrot.lane.b32.xlu1 %v881_v22, %s2603_s30  ;;  %v1073_v22 = vstv %s2982_s10  ;;  %s3107_s10 = sld [smem:[#allocation3 + $0x38]] }
  0xb5   : > { %882 = vrot.lane.b32.xlu0 %v879_v28, %s2603_s30  ;;  %v1056_v28 = vmul.f32 %v1053_v7, %v2785_v60  ;;  %v1075_v39 = vmul.f32 %v1073_v22, %v2740_v30  ;;  %v1074_v53 = vmul.f32 %v1073_v22, %v2733_v26 }
  0xb6   : > { %v2963_v38 = vpop.permute.xlu1 %254 }
  0xb7   : > { %v2967_v43 = vpop.permute.xlu0 %295  ;;  %v1081_v57 = vrot.slane %v1075_v39, 3 }
  0xb8   : > { %906 = vrot.lane.b32.xlu1 %v903_v36, %s2604_s8  ;;  %v1054_v36 = vmul.f32 %v1053_v7, %v2728_v21 }
  0xb9   : > { %904 = vrot.lane.b32.xlu0 %v901_v40, %s2604_s8  ;;  %v1076_v40 = vmul.f32 %v1073_v22, %v2794_v4  ;;  %v1118_v22 = vmul.f32 %v1115_v2, %v2794_v4 }
  0xba   : > { %v2974_v50 = vpop.permute.xlu1 %282  ;;  %v1060_v52 = vrot.slane %v1054_v36, 3 }
  0xbb   : > { %v2978_v54 = vpop.permute.xlu0 %280  ;;  %v1083_v58 = vrot.slane %v1076_v40, 3  ;;  %v246_v40 = vadd.f32 %v2945_v18, %v231_v10 }
  0xbc   : > { %926 = vrot.lane.b32.xlu1 %v923_v44, %s2604_s8  ;;  %v1063_v44 = vrot.slane %v1056_v28, 3  ;;  %v1062_v7 = vsel %vm983_vm2, %v1060_v52, %v1061_v42  ;;  %v228_v28 = vmul.f32 %v227_v47, %v2733_v26  ;;  %v1157_v47 = vstv %s3053_s4  ;;  %s3252_s4 = sld [smem:[#allocation3 + $0x50]] }
  0xbd   : > { %924 = vrot.lane.b32.xlu0 %v921_v51, %s2604_s8  ;;  %v1040_v51 = vsel %vm983_vm2, %v1038_v35, %v1039_v24  ;;  %v1159_v59 = vmul.f32 %v1157_v47, %v2740_v30 }
  0xbe   : > { %v2989_v61 = vpop.permute.xlu1 %310  ;;  %v1064_v62 = vsel %vm983_vm2, %v1061_v42, %v1063_v44  ;;  %v1123_v42 = vrot.slane %v1117_v20, 3  ;;  %v1125_v44 = vrot.slane %v1118_v22, 3  ;;  %v230_v49 = vadd.f32 %v228_v28, %v225_v29 }
  0xbf   : > { %v2993_v3 = vpop.permute.xlu0 %308 }
  0xc0   : > { %948 = vrot.lane.b32.xlu1 %v945_v56, %s2605_s12  ;;  %v1124_v2 = vsel %vm983_vm2, %v1122_v46, %v1123_v42  ;;  %v245_v5 = vadd.f32 %v2934_v6, %v230_v49  ;;  %v1165_v6 = vrot.slane %v1159_v59, 3 }
  0xc1   : > { %946 = vrot.lane.b32.xlu0 %v943_v63, %s2605_s12  ;;  %v1098_v63 = vmul.f32 %v1095_v45, %v2785_v60 }
  0xc2   : > { %v3006_v12 = vpop.permute.xlu1 %325  ;;  %v258_v20 = vadd.f32 %v2952_v27, %v245_v5 }
  0xc3   : > { %v3010_v19 = vpop.permute.xlu0 %323  ;;  %v1105_v17 = vrot.slane %v1098_v63, 3  ;;  %v1179_v63 = vstv %s3065_s5  ;;  %s3269_s5 = sld [smem:[#allocation3 + $0x20]] }
  0xc4   : > { %968 = vrot.lane.b32.xlu1 %v965_v8, %s2605_s12  ;;  %v1080_v8 = vrot.slane %v1074_v53, 3 }
  0xc5   : > { %966 = vrot.lane.b32.xlu0 %v963_v15, %s2605_s12  ;;  %v1084_v15 = vsel %vm983_vm2, %v1081_v57, %v1083_v58  ;;  %v1126_v58 = vsel %vm983_vm2, %v1123_v42, %v1125_v44  ;;  %v1221_v42 = vstv %s3096_s7  ;;  %v402_v44 = vstv %s3098_s9  ;;  %s3290_s7 = sld [smem:[#allocation3 + $0xe]]  ;;  %s3299_s9 = sld [smem:[#allocation3 + $0x21]] }
  0xc6   : > { %v3019_v31 = vpop.permute.xlu1 %338  ;;  %v1082_v33 = vsel %vm983_vm2, %v1080_v8, %v1081_v57 }
  0xc7   : > { %v3026_v37 = vpop.permute.xlu0 %336 }
  0xc8   : > { %1025 = vrot.lane.b32.xlu1 %v1022_v23, %s2601_s20  ;;  %v1137_v23 = vstv %s3033_s29  ;;  %s3225_s29 = sld [smem:[#allocation3 + $0x1f]] }
  0xc9   : > { %1023 = vrot.lane.b32.xlu0 %v1020_v34, %s2601_s20  ;;  %v1102_v34 = vrot.slane %v1096_v9, 3  ;;  %v1139_v36 = vmul.f32 %v1137_v23, %v2723_v14  ;;  %v1140_v39 = vmul.f32 %v1137_v23, %v2785_v60  ;;  %v1138_v18 = vmul.f32 %v1137_v23, %v2728_v21 }
  0xca   : > { %v3038_v48 = vpop.permute.xlu1 %353  ;;  %v1158_v9 = vmul.f32 %v1157_v47, %v2733_v26 }
  0xcb   : > { %v3043_v56 = vpop.permute.xlu0 %351  ;;  %v1104_v52 = vsel %vm983_vm2, %v1102_v34, %v1103_v16  ;;  %v1145_v55 = vrot.slane %v1139_v36, 3  ;;  %v1147_v57 = vrot.slane %v1140_v39, 3  ;;  %v1144_v8 = vrot.slane %v1138_v18, 3 }
  0xcc   : > { %1045 = vrot.lane.b32.xlu1 %v1042_v41, %s2601_s20  ;;  %v1106_v41 = vsel %vm983_vm2, %v1103_v16, %v1105_v17  ;;  %v1181_v16 = vmul.f32 %v1179_v63, %v2723_v14  ;;  %v1182_v17 = vmul.f32 %v1179_v63, %v2785_v60  ;;  %v1164_v29 = vrot.slane %v1158_v9, 3 }
  0xcd   : > { %1043 = vrot.lane.b32.xlu0 %v1040_v51, %s2601_s20  ;;  %v259_v51 = vadd.f32 %v2963_v38, %v246_v40  ;;  %v1146_v28 = vsel %vm983_vm2, %v1144_v8, %v1145_v55  ;;  %v273_v40 = vadd.f32 %v2956_v32, %v258_v20  ;;  %v419_v18 = vstv %s3107_s10  ;;  %s3320_s10 = sld [smem:[#allocation3 + $0x52]] }
  0xce   : > { %v3050_v0 = vpop.permute.xlu1 %366  ;;  %v1187_v27 = vrot.slane %v1181_v16, 3  ;;  %v1189_v36 = vrot.slane %v1182_v17, 3  ;;  %v1166_v32 = vsel %vm983_vm2, %v1164_v29, %v1165_v6  ;;  %v1222_v16 = vmul.f32 %v1221_v42, %v2728_v21 }
  0xcf   : > { %v3058_v11 = vpop.permute.xlu0 %364  ;;  %v3167_v17 = vmul.f32 %v419_v18, %v2740_v30 }
  0xd0   : > { %1067 = vrot.lane.b32.xlu1 %v1064_v62, %s2600_s13  ;;  %v1160_v62 = vmul.f32 %v1157_v47, %v2794_v4  ;;  %v1190_v59 = vsel %vm983_vm2, %v1187_v27, %v1189_v36 }
  0xd1   : > { %1065 = vrot.lane.b32.xlu0 %v1062_v7, %s2600_s13  ;;  %v274_v7 = vadd.f32 %v2930_v1, %v259_v51  ;;  %v1199_v1 = vstv %s3080_s6  ;;  %v286_v51 = vadd.f32 %v2978_v54, %v273_v40  ;;  %v3157_v54 = vmul.f32 %v402_v44, %v2785_v60  ;;  %s3285_s6 = sld [smem:[#allocation3 + $0x51]] }
  0xd2   : > { %v3068_v24 = vpop.permute.xlu1 %381  ;;  %v1167_v22 = vrot.slane %v1160_v62, 3  ;;  %v1201_v39 = vmul.f32 %v1199_v1, %v2740_v30  ;;  %v1200_v47 = vmul.f32 %v1199_v1, %v2733_v26 }
  0xd3   : > { %v3073_v35 = vpop.permute.xlu0 %379  ;;  %v287_v25 = vadd.f32 %v2974_v50, %v274_v7  ;;  %v1202_v50 = vmul.f32 %v1199_v1, %v2794_v4  ;;  %v301_v8 = vadd.f32 %v2967_v43, %v286_v51 }
  0xd4   : > { %1087 = vrot.lane.b32.xlu1 %v1084_v15, %s2600_s13  ;;  %v1148_v15 = vsel %vm983_vm2, %v1145_v55, %v1147_v57  ;;  %v1223_v57 = vmul.f32 %v1221_v42, %v2723_v14  ;;  %v1207_v62 = vrot.slane %v1201_v39, 3  ;;  %v1206_v7 = vrot.slane %v1200_v47, 3 }
  0xd5   : > { %1085 = vrot.lane.b32.xlu0 %v1082_v33, %s2600_s13  ;;  %v1180_v33 = vmul.f32 %v1179_v63, %v2728_v21  ;;  %v302_v49 = vadd.f32 %v2941_v13, %v287_v25  ;;  %v1209_v63 = vrot.slane %v1202_v50, 3  ;;  %v3154_v13 = vmul.f32 %v402_v44, %v2723_v14 }
  0xd6   : > { %v3083_v45 = vpop.permute.xlu1 %394  ;;  %v314_v39 = vadd.f32 %v2993_v3, %v301_v8 }
  0xd7   : > { %v3089_v53 = vpop.permute.xlu0 %392  ;;  %v315_v9 = vadd.f32 %v2989_v61, %v302_v49  ;;  %v1210_v43 = vsel %vm983_vm2, %v1207_v62, %v1209_v63  ;;  %v411_v29 = vrot.slane %v3154_v13, 1 }
  0xd8   : > { %1109 = vrot.lane.b32.xlu1 %v1106_v41, %s2602_s21  ;;  %v1168_v41 = vsel %vm983_vm2, %v1165_v6, %v1167_v22  ;;  %v1229_v6 = vrot.slane %v1223_v57, 3  ;;  %v413_v57 = vrot.slane %v3157_v54, 1 }
  0xd9   : > { %1107 = vrot.lane.b32.xlu0 %v1104_v52, %s2602_s21  ;;  %v1186_v52 = vrot.slane %v1180_v33, 3  ;;  %v330_v25 = vadd.f32 %v3006_v12, %v315_v9  ;;  %v3181_v33 = vmul.f32 %v419_v18, %v2794_v4  ;;  %v1208_v12 = vsel %vm983_vm2, %v1206_v7, %v1207_v62 }
  0xda   : > { %v3101_v38 = vpop.permute.xlu1 %451 }
  0xdb   : > { %v3109_v10 = vpop.permute.xlu0 %449  ;;  %v343_v40 = vadd.f32 %v3019_v31, %v330_v25  ;;  %v1318_v31 = vstv %s3151_s26  ;;  %s3363_s26 = sld [smem:[#allocation3 + $0x53]] }
  0xdc   : > { %1129 = vrot.lane.b32.xlu1 %v1126_v58, %s2602_s21  ;;  %v1224_v58 = vmul.f32 %v1221_v42, %v2785_v60  ;;  %v1320_v9 = vmul.f32 %v1318_v31, %v2740_v30 }
  0xdd   : > { %1127 = vrot.lane.b32.xlu0 %v1124_v2, %s2602_s21  ;;  %v1241_v2 = vstv %s3117_s18  ;;  %v358_v3 = vadd.f32 %v3038_v48, %v343_v40  ;;  %s3323_s18 = sld [smem:[#allocation3 + $0x3f]] }
  0xde   : > { %v3120_v23 = vpop.permute.xlu1 %471  ;;  %v1231_v22 = vrot.slane %v1224_v58, 3  ;;  %v1243_v1 = vmul.f32 %v1241_v2, %v2740_v30  ;;  %v1244_v61 = vmul.f32 %v1241_v2, %v2794_v4  ;;  %v1242_v50 = vmul.f32 %v1241_v2, %v2733_v26 }
  0xdf   : > { %v3125_v34 = vpop.permute.xlu0 %469  ;;  %v427_v58 = vrot.slane %v3167_v17, 1  ;;  %v371_v48 = vadd.f32 %v3050_v0, %v358_v3  ;;  %v1340_v0 = vstv %s3177_s27  ;;  %s3391_s27 = sld [smem:[#allocation3 + $0x24]] }
  0xe0   : > { %1151 = vrot.lane.b32.xlu1 %v1148_v15, %s2603_s30  ;;  %v1188_v15 = vsel %vm983_vm2, %v1186_v52, %v1187_v27  ;;  %v3184_v27 = vmul.f32 %v402_v44, %v2728_v21  ;;  %v1232_v44 = vsel %vm983_vm2, %v1229_v6, %v1231_v22  ;;  %v1249_v47 = vrot.slane %v1243_v1, 3 }
  0xe1   : > { %1149 = vrot.lane.b32.xlu0 %v1146_v28, %s2603_s30  ;;  %v1298_v28 = vstv %s3133_s25  ;;  %v1251_v52 = vrot.slane %v1244_v61, 3  ;;  %v1248_v54 = vrot.slane %v1242_v50, 3  ;;  %v386_v22 = vadd.f32 %v3068_v24, %v371_v48  ;;  %s3341_s25 = sld [smem:[#allocation3 + $0x22]] }
  0xe2   : > { %v3137_v46 = vpop.permute.xlu1 %493  ;;  %v1300_v49 = vmul.f32 %v1298_v28, %v2723_v14  ;;  %v1301_v51 = vmul.f32 %v1298_v28, %v2785_v60  ;;  %v1299_v63 = vmul.f32 %v1298_v28, %v2728_v21  ;;  %v410_v1 = vrot.slane %v3184_v27, 1 }
  0xe3   : > { %v3144_v55 = vpop.permute.xlu0 %491  ;;  %v1250_v24 = vsel %vm983_vm2, %v1248_v54, %v1249_v47  ;;  %v1319_v28 = vmul.f32 %v1318_v31, %v2733_v26  ;;  %v1342_v40 = vmul.f32 %v1340_v0, %v2723_v14  ;;  %v1341_v3 = vmul.f32 %v1340_v0, %v2728_v21 }
  0xe4   : > { %1171 = vrot.lane.b32.xlu1 %v1168_v41, %s2603_s30  ;;  %v1228_v41 = vrot.slane %v1222_v16, 3  ;;  %v1308_v8 = vrot.slane %v1301_v51, 4 }
  0xe5   : > { %1169 = vrot.lane.b32.xlu0 %v1166_v32, %s2603_s30  ;;  %v329_v32 = vadd.f32 %v3010_v19, %v314_v39 }
  0xe6   : > { %v3160_v5 = vpop.permute.xlu1 %513  ;;  %v1230_v2 = vsel %vm983_vm2, %v1228_v41, %v1229_v6  ;;  %v429_v6 = vrot.slane %v3181_v33, 1  ;;  %v414_v33 = vsel %vm409_vm0, %v411_v29, %v413_v57  ;;  %v1343_v41 = vmul.f32 %v1340_v0, %v2785_v60 }
  0xe7   : > { %v3169_v20 = vpop.permute.xlu0 %511  ;;  %v342_v19 = vadd.f32 %v3026_v37, %v329_v32  ;;  %v1252_v37 = vsel %vm983_vm2, %v1249_v47, %v1251_v52 }
  0xe8   : > { %1193 = vrot.lane.b32.xlu1 %v1190_v59, %s2604_s8  ;;  %v3205_v59 = vmul.f32 %v419_v18, %v2733_v26  ;;  %v1306_v18 = vrot.slane %v1300_v49, 4  ;;  %v1360_v49 = vstv %s3211_s28  ;;  %v430_v52 = vsel %vm409_vm0, %v427_v58, %v429_v6  ;;  %s3415_s28 = sld [smem:[#allocation3 + $0x55]] }
  0xe9   : > { %1191 = vrot.lane.b32.xlu0 %v1188_v15, %s2604_s8  ;;  %v1321_v15 = vmul.f32 %v1318_v31, %v2794_v4  ;;  %v357_v16 = vadd.f32 %v3043_v56, %v342_v19  ;;  %v399_v56 = vadd.f32 %v3083_v45, %v386_v22  ;;  %v412_v31 = vsel %vm409_vm0, %v410_v1, %v411_v29 }
  0xea   : > { %v3187_v36 = vpop.permute.xlu1 %535  ;;  %v1309_v45 = vsel %vm1270_vm3, %v1306_v18, %v1308_v8  ;;  %v426_v50 = vrot.slane %v3205_v59, 1  ;;  %v1350_v19 = vrot.slane %v1343_v41, 4  ;;  %v1363_v48 = vmul.f32 %v1360_v49, %v2794_v4 }
  0xeb   : > { %v3193_v42 = vpop.permute.xlu0 %533  ;;  %v370_v61 = vadd.f32 %v3058_v11, %v357_v16  ;;  %v1328_v39 = vrot.slane %v1321_v15, 4  ;;  %v418_v51 = vadd.f32 %v414_v33, %v399_v56  ;;  %v1361_v29 = vmul.f32 %v1360_v49, %v2733_v26 }
  0xec   : > { %1213 = vrot.lane.b32.xlu1 %v1210_v43, %s2604_s8  ;;  %v1305_v43 = vrot.slane %v1299_v63, 4  ;;  %v1348_v63 = vrot.slane %v1342_v40, 4  ;;  %v428_v15 = vsel %vm409_vm0, %v426_v50, %v427_v58  ;;  %v1370_v1 = vrot.slane %v1363_v48, 4 }
  0xed   : > { %1211 = vrot.lane.b32.xlu0 %v1208_v12, %s2604_s8  ;;  %v1326_v12 = vrot.slane %v1320_v9, 4  ;;  %v385_v11 = vadd.f32 %v3073_v35, %v370_v61  ;;  %v1325_v35 = vrot.slane %v1319_v28, 4  ;;  %v434_v54 = vadd.f32 %v430_v52, %v418_v51 }
  0xee   : > { %v3208_v62 = vpop.permute.xlu1 %555  ;;  %v1307_v47 = vsel %vm1270_vm3, %v1305_v43, %v1306_v18  ;;  %v1347_v9 = vrot.slane %v1341_v3, 4  ;;  %v1351_v0 = vsel %vm1270_vm3, %v1348_v63, %v1350_v19  ;;  %v1367_v17 = vrot.slane %v1361_v29, 4 }
  0xef   : > { %v3216_v7 = vpop.permute.xlu0 %553  ;;  %v398_v32 = vadd.f32 %v3089_v53, %v385_v11  ;;  %v1329_v59 = vsel %vm1270_vm3, %v1326_v12, %v1328_v39  ;;  %v1362_v53 = vmul.f32 %v1360_v49, %v2740_v30  ;;  %v1327_v8 = vsel %vm1270_vm3, %v1325_v35, %v1326_v12 }
  0xf0   : > { %1235 = vrot.lane.b32.xlu1 %v1232_v44, %s2605_s12  ;;  %v1402_v58 = vstv %s3252_s4  ;;  %v456_v56 = vadd.f32 %v3101_v38, %v434_v54  ;;  %v1424_v41 = vstv %s3269_s5  ;;  %v1444_v19 = vstv %s3285_s6  ;;  %s3446_s4 = sld [smem:[#allocation3 + $0x56]]  ;;  %s3470_s6 = sld [smem:[#allocation3 + $0x15]] }
  0xf1   : > { %1233 = vrot.lane.b32.xlu0 %v1230_v2, %s2605_s12  ;;  %v1382_v2 = vstv %s3225_s29  ;;  %v417_v18 = vadd.f32 %v412_v31, %v398_v32  ;;  %v1368_v6 = vrot.slane %v1362_v53, 4  ;;  %v1404_v11 = vmul.f32 %v1402_v58, %v2740_v30  ;;  %s3425_s29 = sld [smem:[#allocation3 + $0x25]]  ;;  %s3466_s5 = sld [smem:[#allocation3 + $0x26]] }
  0xf2   : > { %v3230_v25 = vpop.permute.xlu1 %577  ;;  %v1384_v22 = vmul.f32 %v1382_v2, %v2723_v14  ;;  %v1383_v28 = vmul.f32 %v1382_v2, %v2728_v21  ;;  %v476_v49 = vadd.f32 %v3120_v23, %v456_v56  ;;  %v1403_v32 = vmul.f32 %v1402_v58, %v2733_v26 }
  0xf3   : > { %v3239_v27 = vpop.permute.xlu0 %575  ;;  %v433_v61 = vadd.f32 %v428_v15, %v417_v18  ;;  %v1371_v40 = vsel %vm1270_vm3, %v1368_v6, %v1370_v1  ;;  %v1369_v50 = vsel %vm1270_vm3, %v1367_v17, %v1368_v6  ;;  %v1426_v52 = vmul.f32 %v1424_v41, %v2723_v14 }
  0xf4   : > { %1255 = vrot.lane.b32.xlu1 %v1252_v37, %s2605_s12  ;;  %v1385_v37 = vmul.f32 %v1382_v2, %v2785_v60  ;;  %v1390_v12 = vrot.slane %v1384_v22, 4  ;;  %v1389_v51 = vrot.slane %v1383_v28, 4  ;;  %v1427_v31 = vmul.f32 %v1424_v41, %v2785_v60 }
  0xf5   : > { %1253 = vrot.lane.b32.xlu0 %v1250_v24, %s2605_s12  ;;  %v1349_v24 = vsel %vm1270_vm3, %v1347_v9, %v1348_v63  ;;  %v1410_v63 = vrot.slane %v1404_v11, 4  ;;  %v689_v23 = vstv %s3290_s7  ;;  %v1425_v48 = vmul.f32 %v1424_v41, %v2728_v21  ;;  %s3477_s7 = sld [smem:[#allocation3 + $0x57]] }
  0xf6   : > { %v3248_v44 = vpop.permute.xlu1 %597  ;;  %v1392_v39 = vrot.slane %v1385_v37, 4  ;;  %v1409_v54 = vrot.slane %v1403_v32, 4  ;;  %v1434_v9 = vrot.slane %v1427_v31, 4  ;;  %v1446_v15 = vmul.f32 %v1444_v19, %v2740_v30 }
  0xf7   : > { %v3262_v57 = vpop.permute.xlu0 %595  ;;  %v1466_v22 = vstv %s3299_s9  ;;  %v3344_v6 = vmul.f32 %v689_v23, %v2723_v14  ;;  %v692_v1 = vmul.f32 %v689_v23, %v2785_v60  ;;  %v1445_v56 = vmul.f32 %v1444_v19, %v2733_v26  ;;  %s3485_s9 = sld [smem:[#allocation3 + $0x46]] }
  0xf8   : > { %1312 = vrot.lane.b32.xlu1 %v1309_v45, %s2601_s20  ;;  %v1405_v45 = vmul.f32 %v1402_v58, %v2794_v4  ;;  %v1393_v3 = vsel %vm1270_vm3, %v1390_v12, %v1392_v39  ;;  %v1431_v58 = vrot.slane %v1425_v48, 4  ;;  %v1468_v39 = vmul.f32 %v1466_v22, %v2723_v14 }
  0xf9   : > { %1310 = vrot.lane.b32.xlu0 %v1307_v47, %s2601_s20  ;;  %v455_v47 = vadd.f32 %v3109_v10, %v433_v61  ;;  %v1411_v61 = vsel %vm1270_vm3, %v1409_v54, %v1410_v63  ;;  %v698_v41 = vrot.slane %v3344_v6, 2 }
  0xfa   : > { %v3272_v13 = vpop.permute.xlu1 %619  ;;  %v1412_v10 = vrot.slane %v1405_v45, 4  ;;  %v1486_v45 = vstv %s3320_s10  ;;  %v1474_v31 = vrot.slane %v1468_v39, 4  ;;  %s3495_s10 = sld [smem:[#allocation3 + $0x27]] }
  0xfb   : > { %v3279_v16 = vpop.permute.xlu0 %617  ;;  %v475_v2 = vadd.f32 %v3125_v34, %v455_v47  ;;  %v706_v47 = vstv %s3323_s18  ;;  %s3521_s18 = sld [smem:[#allocation3 + $0x58]] }
  0xfc   : > { %1332 = vrot.lane.b32.xlu1 %v1329_v59, %s2601_s20  ;;  %v498_v59 = vadd.f32 %v3137_v46, %v476_v49  ;;  %v1391_v46 = vsel %vm1270_vm3, %v1389_v51, %v1390_v12  ;;  %v1413_v34 = vsel %vm1270_vm3, %v1410_v63, %v1412_v10  ;;  %v1452_v12 = vrot.slane %v1446_v15, 4 }
  0xfd   : > { %1330 = vrot.lane.b32.xlu0 %v1327_v8, %s2601_s20  ;;  %v1432_v8 = vrot.slane %v1426_v52, 4  ;;  %v497_v37 = vadd.f32 %v3144_v55, %v475_v2  ;;  %v1467_v51 = vmul.f32 %v1466_v22, %v2728_v21  ;;  %v1488_v63 = vmul.f32 %v1486_v45, %v2740_v30 }
  0xfe   : > { %v3288_v43 = vpop.permute.xlu1 %639  ;;  %v518_v29 = vadd.f32 %v3160_v5, %v498_v59  ;;  %v1447_v5 = vmul.f32 %v1444_v19, %v2794_v4  ;;  %v1489_v10 = vmul.f32 %v1486_v45, %v2794_v4  ;;  %v3384_v2 = vmul.f32 %v706_v47, %v2740_v30 }
  0xff   : > { %v3296_v33 = vpop.permute.xlu0 %637  ;;  %v517_v55 = vadd.f32 %v3169_v20, %v497_v37  ;;  %v1435_v28 = vsel %vm1270_vm3, %v1432_v8, %v1434_v9  ;;  %v1487_v15 = vmul.f32 %v1486_v45, %v2733_v26  ;;  %v1494_v37 = vrot.slane %v1488_v63, 4 }
 0x100   : > { %1354 = vrot.lane.b32.xlu1 %v1351_v0, %s2600_s13  ;;  %v540_v0 = vadd.f32 %v3187_v36, %v518_v29  ;;  %v1454_v11 = vrot.slane %v1447_v5, 4  ;;  %v709_v29 = vmul.f32 %v706_v47, %v2794_v4 }
 0x101   : > { %1352 = vrot.lane.b32.xlu0 %v1349_v24, %s2600_s13  ;;  %v539_v20 = vadd.f32 %v3193_v42, %v517_v55  ;;  %v714_v55 = vrot.slane %v3384_v2, 2  ;;  %v1605_v2 = vstv %s3415_s28  ;;  %s3586_s28 = sld [smem:[#allocation3 + $0x5a]] }
 0x102   : > { %v3306_v38 = vpop.permute.xlu1 %661  ;;  %v560_v36 = vadd.f32 %v3208_v62, %v540_v0  ;;  %v1496_v0 = vrot.slane %v1489_v10, 4  ;;  %v716_v39 = vrot.slane %v709_v29, 2 }
 0x103   : > { %v3312_v35 = vpop.permute.xlu0 %659  ;;  %v559_v32 = vadd.f32 %v3216_v7, %v539_v20  ;;  %v1455_v7 = vsel %vm1270_vm3, %v1452_v12, %v1454_v11 }
 0x104   : > { %1374 = vrot.lane.b32.xlu1 %v1371_v40, %s2600_s13  ;;  %v1469_v40 = vmul.f32 %v1466_v22, %v2785_v60  ;;  %v582_v62 = vadd.f32 %v3230_v25, %v560_v36  ;;  %v1433_v25 = vsel %vm1270_vm3, %v1431_v58, %v1432_v8  ;;  %v1473_v8 = vrot.slane %v1467_v51, 4 }
 0x105   : > { %1372 = vrot.lane.b32.xlu0 %v1369_v50, %s2600_s13  ;;  %v700_v50 = vrot.slane %v692_v1, 2  ;;  %v581_v19 = vadd.f32 %v3239_v27, %v559_v32  ;;  %v1528_v1 = vstv %s3363_s26  ;;  %v707_v36 = vmul.f32 %v706_v47, %v2733_v26  ;;  %s3556_s26 = sld [smem:[#allocation3 + $0x59]] }
 0x106   : > { %v3326_v53 = vpop.permute.xlu1 %681  ;;  %v602_v42 = vadd.f32 %v3248_v44, %v582_v62  ;;  %v1476_v59 = vrot.slane %v1469_v40, 4  ;;  %v1508_v44 = vstv %s3341_s25  ;;  %v1530_v62 = vmul.f32 %v1528_v1, %v2740_v30  ;;  %s3534_s25 = sld [smem:[#allocation3 + $0x28]] }
 0x107   : > { %v3332_v18 = vpop.permute.xlu0 %679  ;;  %v601_v27 = vadd.f32 %v3262_v57, %v581_v19  ;;  %v701_v58 = vsel %vm696_vm1, %v698_v41, %v700_v50  ;;  %v1531_v11 = vmul.f32 %v1528_v1, %v2794_v4  ;;  %v713_v47 = vrot.slane %v707_v36, 2 }
 0x108   : > { %1396 = vrot.lane.b32.xlu1 %v1393_v3, %s2602_s21  ;;  %v1451_v3 = vrot.slane %v1445_v56, 4  ;;  %v624_v48 = vadd.f32 %v3272_v13, %v602_v42  ;;  %v1475_v56 = vsel %vm1270_vm3, %v1473_v8, %v1474_v31  ;;  %v1529_v32 = vmul.f32 %v1528_v1, %v2733_v26 }
 0x109   : > { %1394 = vrot.lane.b32.xlu0 %v1391_v46, %s2602_s21  ;;  %v690_v46 = vmul.f32 %v689_v23, %v2728_v21  ;;  %v1477_v23 = vsel %vm1270_vm3, %v1474_v31, %v1476_v59  ;;  %v623_v5 = vadd.f32 %v3279_v16, %v601_v27  ;;  %v1585_v42 = vstv %s3391_s27  ;;  %s3575_s27 = sld [smem:[#allocation3 + $0x29]] }
 0x10a   : > { %v3348_v17 = vpop.permute.xlu1 %738  ;;  %v644_v13 = vadd.f32 %v3288_v43, %v624_v48  ;;  %v1453_v9 = vsel %vm1270_vm3, %v1451_v3, %v1452_v12  ;;  %v1511_v43 = vmul.f32 %v1508_v44, %v2785_v60  ;;  %v1509_v12 = vmul.f32 %v1508_v44, %v2728_v21 }
 0x10b   : > { %v3354_v24 = vpop.permute.xlu0 %736  ;;  %v643_v16 = vadd.f32 %v3296_v33, %v623_v5  ;;  %v697_v40 = vrot.slane %v690_v46, 2  ;;  %v1536_v19 = vrot.slane %v1530_v62, 4  ;;  %v1538_v48 = vrot.slane %v1531_v11, 4 }
 0x10c   : > { %1416 = vrot.lane.b32.xlu1 %v1413_v34, %s2602_s21  ;;  %v1510_v34 = vmul.f32 %v1508_v44, %v2723_v14  ;;  %v666_v57 = vadd.f32 %v3306_v38, %v644_v13  ;;  %v1518_v50 = vrot.slane %v1511_v43, 4  ;;  %v1515_v59 = vrot.slane %v1509_v12, 4 }
 0x10d   : > { %1414 = vrot.lane.b32.xlu0 %v1411_v61, %s2602_s21  ;;  %v665_v33 = vadd.f32 %v3312_v35, %v643_v16  ;;  %v717_v35 = vsel %vm696_vm1, %v714_v55, %v716_v39  ;;  %v699_v63 = vsel %vm696_vm1, %v697_v40, %v698_v41  ;;  %v1588_v44 = vmul.f32 %v1585_v42, %v2785_v60 }
 0x10e   : > { %v3368_v49 = vpop.permute.xlu1 %758  ;;  %v686_v38 = vadd.f32 %v3326_v53, %v666_v57  ;;  %v1497_v53 = vsel %vm1270_vm3, %v1494_v37, %v1496_v0  ;;  %v1516_v45 = vrot.slane %v1510_v34, 4  ;;  %v1535_v41 = vrot.slane %v1529_v32, 4 }
 0x10f   : > { %v3374_v52 = vpop.permute.xlu0 %756  ;;  %v685_v3 = vadd.f32 %v3332_v18, %v665_v33  ;;  %v1587_v18 = vmul.f32 %v1585_v42, %v2723_v14  ;;  %v1586_v27 = vmul.f32 %v1585_v42, %v2728_v21  ;;  %v715_v13 = vsel %vm696_vm1, %v713_v47, %v714_v55 }
 0x110   : > { %1438 = vrot.lane.b32.xlu1 %v1435_v28, %s2603_s30  ;;  %v1493_v28 = vrot.slane %v1487_v15, 4  ;;  %v1517_v8 = vsel %vm1270_vm3, %v1515_v59, %v1516_v45  ;;  %v1539_v15 = vsel %vm1270_vm3, %v1536_v19, %v1538_v48  ;;  %v1595_v0 = vrot.slane %v1588_v44, 5 }
 0x111   : > { %1436 = vrot.lane.b32.xlu0 %v1433_v25, %s2603_s30  ;;  %v705_v25 = vadd.f32 %v701_v58, %v686_v38  ;;  %v704_v46 = vadd.f32 %v699_v63, %v685_v3  ;;  %v1607_v34 = vmul.f32 %v1605_v2, %v2740_v30  ;;  %v1608_v5 = vmul.f32 %v1605_v2, %v2794_v4 }
 0x112   : > { %v3389_v54 = vpop.permute.xlu1 %780  ;;  %v1495_v31 = vsel %vm1270_vm3, %v1493_v28, %v1494_v37  ;;  %v1593_v37 = vrot.slane %v1587_v18, 5  ;;  %v1537_v43 = vsel %vm1270_vm3, %v1535_v41, %v1536_v19  ;;  %v1592_v55 = vrot.slane %v1586_v27, 5 }
 0x113   : > { %v3397_v22 = vpop.permute.xlu0 %778  ;;  %v721_v29 = vadd.f32 %v717_v35, %v705_v25  ;;  %v720_v1 = vadd.f32 %v715_v13, %v704_v46  ;;  %v1606_v36 = vmul.f32 %v1605_v2, %v2733_v26  ;;  %v1613_v12 = vrot.slane %v1607_v34, 5 }
 0x114   : > { %1458 = vrot.lane.b32.xlu1 %v1455_v7, %s2603_s30  ;;  %v1519_v7 = vsel %vm1270_vm3, %v1516_v45, %v1518_v50  ;;  %v1596_v28 = vsel %vm1557_vm4, %v1593_v37, %v1595_v0  ;;  %v1615_v39 = vrot.slane %v1608_v5, 5  ;;  %v1669_v35 = vstv %s3466_s5  ;;  %s3625_s5 = sld [smem:[#allocation3 + $0x2c]] }
 0x115   : > { %1456 = vrot.lane.b32.xlu0 %v1453_v9, %s2603_s30  ;;  %v743_v58 = vadd.f32 %v3348_v17, %v721_v29  ;;  %v1647_v17 = vstv %s3446_s4  ;;  %v742_v11 = vadd.f32 %v3354_v24, %v720_v1  ;;  %v1612_v45 = vrot.slane %v1606_v36, 5  ;;  %s3615_s4 = sld [smem:[#allocation3 + $0x5c]] }
 0x116   : > { %v3412_v61 = vpop.permute.xlu1 %800  ;;  %v1649_v42 = vmul.f32 %v1647_v17, %v2740_v30  ;;  %v1650_v25 = vmul.f32 %v1647_v17, %v2794_v4  ;;  %v1648_v59 = vmul.f32 %v1647_v17, %v2733_v26  ;;  %v1689_v2 = vstv %s3477_s7  ;;  %s3647_s7 = sld [smem:[#allocation3 + $0x2d]] }
 0x117   : > { %v3420_v20 = vpop.permute.xlu0 %798  ;;  %v763_v33 = vadd.f32 %v3368_v49, %v743_v58  ;;  %v1616_v49 = vsel %vm1557_vm4, %v1613_v12, %v1615_v39  ;;  %v762_v63 = vadd.f32 %v3374_v52, %v742_v11  ;;  %v1614_v48 = vsel %vm1557_vm4, %v1612_v45, %v1613_v12 }
 0x118   : > { %1480 = vrot.lane.b32.xlu1 %v1477_v23, %s2604_s8  ;;  %v1627_v23 = vstv %s3425_s29  ;;  %v1655_v44 = vrot.slane %v1649_v42, 5  ;;  %v1657_v41 = vrot.slane %v1650_v25, 5  ;;  %v1671_v52 = vmul.f32 %v1669_v35, %v2723_v14  ;;  %s3601_s29 = sld [smem:[#allocation3 + $0x2b]] }
 0x119   : > { %1478 = vrot.lane.b32.xlu0 %v1475_v56, %s2604_s8  ;;  %v1629_v16 = vmul.f32 %v1627_v23, %v2723_v14  ;;  %v1630_v38 = vmul.f32 %v1627_v23, %v2785_v60  ;;  %v1628_v62 = vmul.f32 %v1627_v23, %v2728_v21  ;;  %v785_v24 = vadd.f32 %v3389_v54, %v763_v33 }
 0x11a   : > { %v3430_v51 = vpop.permute.xlu1 %822  ;;  %v784_v29 = vadd.f32 %v3397_v22, %v762_v63  ;;  %v1654_v13 = vrot.slane %v1648_v59, 5  ;;  %v993_v23 = vstv %s3485_s9  ;;  %v1670_v0 = vmul.f32 %v1669_v35, %v2728_v21  ;;  %s3658_s9 = sld [smem:[#allocation3 + $0x5e]] }
 0x11b   : > { %v3440_v10 = vpop.permute.xlu0 %820  ;;  %v1635_v47 = vrot.slane %v1629_v16, 5  ;;  %v1637_v32 = vrot.slane %v1630_v38, 5  ;;  %v805_v19 = vadd.f32 %v3412_v61, %v785_v24  ;;  %v1672_v61 = vmul.f32 %v1669_v35, %v2785_v60 }
 0x11c   : > { %1500 = vrot.lane.b32.xlu1 %v1497_v53, %s2604_s8  ;;  %v1594_v53 = vsel %vm1557_vm4, %v1592_v55, %v1593_v37  ;;  %v804_v22 = vadd.f32 %v3420_v20, %v784_v29  ;;  %v1658_v5 = vsel %vm1557_vm4, %v1655_v44, %v1657_v41  ;;  %v1692_v1 = vmul.f32 %v1689_v2, %v2794_v4 }
 0x11d   : > { %1498 = vrot.lane.b32.xlu0 %v1495_v31, %s2604_s8  ;;  %v1634_v31 = vrot.slane %v1628_v62, 5  ;;  %v1638_v54 = vsel %vm1557_vm4, %v1635_v47, %v1637_v32  ;;  %v827_v46 = vadd.f32 %v3430_v51, %v805_v19  ;;  %v1711_v58 = vstv %s3495_s10  ;;  %s3667_s10 = sld [smem:[#allocation3 + $0x2e]] }
 0x11e   : > { %v3449_v6 = vpop.permute.xlu1 %842  ;;  %v826_v20 = vadd.f32 %v3440_v10, %v804_v22  ;;  %v1677_v55 = vrot.slane %v1671_v52, 5  ;;  %v1679_v36 = vrot.slane %v1672_v61, 5  ;;  %v3540_v38 = vmul.f32 %v993_v23, %v2740_v30 }
 0x11f   : > { %v3455_v9 = vpop.permute.xlu0 %840  ;;  %v1636_v27 = vsel %vm1557_vm4, %v1634_v31, %v1635_v47  ;;  %v847_v51 = vadd.f32 %v3449_v6, %v827_v46  ;;  %v1690_v39 = vmul.f32 %v1689_v2, %v2733_v26  ;;  %v1676_v62 = vrot.slane %v1670_v0, 5 }
 0x120   : > { %1522 = vrot.lane.b32.xlu1 %v1519_v7, %s2605_s12  ;;  %v976_v7 = vstv %s3470_s6  ;;  %v846_v17 = vadd.f32 %v3455_v9, %v826_v20  ;;  %v1713_v45 = vmul.f32 %v1711_v58, %v2723_v14  ;;  %v1714_v47 = vmul.f32 %v1711_v58, %v2785_v60  ;;  %s3636_s6 = sld [smem:[#allocation3 + $0x5d]] }
 0x121   : > { %1520 = vrot.lane.b32.xlu0 %v1517_v8, %s2605_s12  ;;  %v3526_v37 = vmul.f32 %v976_v7, %v2785_v60  ;;  %v3544_v12 = vmul.f32 %v976_v7, %v2728_v21  ;;  %v1001_v24 = vrot.slane %v3540_v38, 3  ;;  %v1696_v31 = vrot.slane %v1690_v39, 5 }
 0x122   : > { %v3463_v57 = vpop.permute.xlu1 %864  ;;  %v1731_v59 = vstv %s3521_s18  ;;  %v1712_v63 = vmul.f32 %v1711_v58, %v2728_v21  ;;  %v994_v61 = vmul.f32 %v993_v23, %v2733_v26  ;;  %s2423_s18 = sld [smem:[#allocation3 + $0x5f]] }
 0x123   : > { %v3472_v56 = vpop.permute.xlu0 %862  ;;  %v869_v6 = vadd.f32 %v3463_v57, %v847_v51  ;;  %v1656_v57 = vsel %vm1557_vm4, %v1654_v13, %v1655_v44  ;;  %v987_v25 = vrot.slane %v3526_v37, 3  ;;  %v1753_v44 = vstv %s3534_s25  ;;  %s2425_s25 = sld [smem:[#allocation3 + $0x60]] }
 0x124   : > { %1542 = vrot.lane.b32.xlu1 %v1539_v15, %s2605_s12  ;;  %v3518_v15 = vmul.f32 %v976_v7, %v2723_v14  ;;  %v868_v32 = vadd.f32 %v3472_v56, %v846_v17  ;;  %v1719_v7 = vrot.slane %v1713_v45, 5  ;;  %v1733_v29 = vmul.f32 %v1731_v59, %v2740_v30 }
 0x125   : > { %1540 = vrot.lane.b32.xlu0 %v1537_v43, %s2605_s12  ;;  %v1691_v43 = vmul.f32 %v1689_v2, %v2740_v30  ;;  %v984_v52 = vrot.slane %v3544_v12, 3  ;;  %v1718_v22 = vrot.slane %v1712_v63, 5  ;;  %v1755_v0 = vmul.f32 %v1753_v44, %v2723_v14 }
 0x126   : > { %v3482_v40 = vpop.permute.xlu1 %884  ;;  %v985_v9 = vrot.slane %v3518_v15, 3  ;;  %v1754_v12 = vmul.f32 %v1753_v44, %v2728_v21  ;;  %v1000_v17 = vrot.slane %v994_v61, 3  ;;  %v1872_v61 = vstv %s3601_s29  ;;  %s2415_s29 = sld [smem:[#allocation3 + $0x5b]] }
 0x127   : > { %v3490_v50 = vpop.permute.xlu0 %882  ;;  %v889_v10 = vadd.f32 %v3482_v40, %v869_v6  ;;  %v1697_v33 = vrot.slane %v1691_v43, 5  ;;  %v1680_v40 = vsel %vm1557_vm4, %v1677_v55, %v1679_v36 }
 0x128   : > { %1599 = vrot.lane.b32.xlu1 %v1596_v28, %s2601_s20  ;;  %v996_v28 = vmul.f32 %v993_v23, %v2794_v4  ;;  %v888_v35 = vadd.f32 %v3490_v50, %v868_v32  ;;  %v1734_v50 = vmul.f32 %v1731_v59, %v2794_v4  ;;  %v988_v51 = vsel %vm983_vm2, %v985_v9, %v987_v25 }
 0x129   : > { %1597 = vrot.lane.b32.xlu0 %v1594_v53, %s2601_s20  ;;  %v1699_v53 = vrot.slane %v1692_v1, 5  ;;  %v1698_v15 = vsel %vm1557_vm4, %v1696_v31, %v1697_v33  ;;  %v1739_v1 = vrot.slane %v1733_v29, 5  ;;  %v986_v39 = vsel %vm983_vm2, %v984_v52, %v985_v9 }
 0x12a   : > { %v907_v3 = vpop.permute.xlu1 %906  ;;  %v1003_v46 = vrot.slane %v996_v28, 3  ;;  %v1741_v58 = vrot.slane %v1734_v50, 5  ;;  %v1720_v28 = vsel %vm1557_vm4, %v1718_v22, %v1719_v7  ;;  %v1795_v32 = vstv %s3575_s27  ;;  %s2386_s27 = sld [smem:[#allocation3 + $0x1c]] }
 0x12b   : > { %v3506_v18 = vpop.permute.xlu0 %904  ;;  %v911_v42 = vadd.f32 %v907_v3, %v889_v10  ;;  %v1678_v3 = vsel %vm1557_vm4, %v1676_v62, %v1677_v55  ;;  %v1798_v63 = vmul.f32 %v1795_v32, %v2785_v60 }
 0x12c   : > { %1619 = vrot.lane.b32.xlu1 %v1616_v49, %s2601_s20  ;;  %v910_v41 = vadd.f32 %v3506_v18, %v888_v35  ;;  %v1004_v20 = vsel %vm983_vm2, %v1001_v24, %v1003_v46 }
 0x12d   : > { %1617 = vrot.lane.b32.xlu0 %v1614_v48, %s2601_s20  ;;  %v1700_v48 = vsel %vm1557_vm4, %v1697_v33, %v1699_v53  ;;  %v1761_v33 = vrot.slane %v1755_v0, 5  ;;  %v1805_v46 = vrot.slane %v1798_v63, 5  ;;  %v1874_v0 = vmul.f32 %v1872_v61, %v2723_v14 }
 0x12e   : > { %v927_v8 = vpop.permute.xlu1 %926  ;;  %v1934_v63 = vstv %s3636_s6 }
 0x12f   : > { %v925_v34 = vpop.permute.xlu0 %924  ;;  %v931_v56 = vadd.f32 %v927_v8, %v911_v42 }
 0x130   : > { %1641 = vrot.lane.b32.xlu1 %v1638_v54, %s2600_s13  ;;  %v1721_v54 = vrot.slane %v1714_v47, 5  ;;  %v930_v13 = vadd.f32 %v925_v34, %v910_v41  ;;  %v1773_v34 = vstv %s3556_s26  ;;  %s2427_s26 = sld [smem:[#allocation3 + $0x61]] }
 0x131   : > { %1639 = vrot.lane.b32.xlu0 %v1636_v27, %s2600_s13  ;;  %v1732_v27 = vmul.f32 %v1731_v59, %v2733_v26  ;;  %v1776_v62 = vmul.f32 %v1773_v34, %v2794_v4  ;;  %v1774_v25 = vmul.f32 %v1773_v34, %v2733_v26 }
 0x132   : > { %v949_v16 = vpop.permute.xlu1 %948  ;;  %v1722_v23 = vsel %vm1557_vm4, %v1719_v7, %v1721_v54 }
 0x133   : > { %v947_v11 = vpop.permute.xlu0 %946  ;;  %v953_v2 = vadd.f32 %v949_v16, %v931_v56  ;;  %v1738_v55 = vrot.slane %v1732_v27, 5  ;;  %v1783_v35 = vrot.slane %v1776_v62, 5 }
 0x134   : > { %1661 = vrot.lane.b32.xlu1 %v1658_v5, %s2600_s13  ;;  %v1756_v5 = vmul.f32 %v1753_v44, %v2785_v60  ;;  %v952_v43 = vadd.f32 %v947_v11, %v930_v13  ;;  %v1742_v11 = vsel %vm1557_vm4, %v1739_v1, %v1741_v58  ;;  %v1780_v44 = vrot.slane %v1774_v25, 5 }
 0x135   : > { %1659 = vrot.lane.b32.xlu0 %v1656_v57, %s2600_s13  ;;  %v1775_v57 = vmul.f32 %v1773_v34, %v2740_v30  ;;  %v1740_v47 = vsel %vm1557_vm4, %v1738_v55, %v1739_v1  ;;  %v1892_v34 = vstv %s3615_s4  ;;  %s2606_s4 = smov 3  }
 0x136   : > { %v969_v49 = vpop.permute.xlu1 %968  ;;  %v1763_v53 = vrot.slane %v1756_v5, 5  ;;  %v1875_v5 = vmul.f32 %v1872_v61, %v2785_v60 }
 0x137   : > { %v967_v19 = vpop.permute.xlu0 %966  ;;  %v973_v18 = vadd.f32 %v969_v49, %v953_v2  ;;  %v1002_v49 = vsel %vm983_vm2, %v1000_v17, %v1001_v24  ;;  %v1781_v59 = vrot.slane %v1775_v57, 5  ;;  %v1796_v24 = vmul.f32 %v1795_v32, %v2728_v21 }
 0x138   : > { %1683 = vrot.lane.b32.xlu1 %v1680_v40, %s2602_s21  ;;  %v972_v16 = vadd.f32 %v967_v19, %v952_v43  ;;  %v1760_v40 = vrot.slane %v1754_v12, 5  ;;  %v1764_v56 = vsel %vm1557_vm4, %v1761_v33, %v1763_v53  ;;  %v1815_v19 = vstv %s3586_s28  ;;  %s2414_s28 = sld [smem:[#allocation3 + $0x2a]] }
 0x139   : > { %1681 = vrot.lane.b32.xlu0 %v1678_v3, %s2602_s21  ;;  %v992_v36 = vadd.f32 %v988_v51, %v973_v18  ;;  %v1797_v3 = vmul.f32 %v1795_v32, %v2723_v14  ;;  %v1784_v2 = vsel %vm1557_vm4, %v1781_v59, %v1783_v35  ;;  %v1817_v29 = vmul.f32 %v1815_v19, %v2740_v30 }
 0x13a   : > { %v1026_v8 = vpop.permute.xlu1 %1025  ;;  %v991_v9 = vadd.f32 %v986_v39, %v972_v16  ;;  %v1762_v54 = vsel %vm1557_vm4, %v1760_v40, %v1761_v33  ;;  %v1818_v52 = vmul.f32 %v1815_v19, %v2794_v4  ;;  %v1802_v27 = vrot.slane %v1796_v24, 5 }
 0x13b   : > { %v3579_v37 = vpop.permute.xlu0 %1023  ;;  %v1008_v42 = vadd.f32 %v1004_v20, %v992_v36  ;;  %v1803_v50 = vrot.slane %v1797_v3, 5  ;;  %v1816_v22 = vmul.f32 %v1815_v19, %v2733_v26  ;;  %v1873_v16 = vmul.f32 %v1872_v61, %v2728_v21 }
 0x13c   : > { %1703 = vrot.lane.b32.xlu1 %v1700_v48, %s2602_s21  ;;  %v1007_v48 = vadd.f32 %v1002_v49, %v991_v9  ;;  %v1825_v58 = vrot.slane %v1818_v52, 5  ;;  %v1880_v12 = vrot.slane %v1874_v0, 6  ;;  %v1882_v39 = vrot.slane %v1875_v5, 6 }
 0x13d   : > { %1701 = vrot.lane.b32.xlu0 %v1698_v15, %s2602_s21  ;;  %v1030_v7 = vadd.f32 %v1026_v8, %v1008_v42  ;;  %v1782_v15 = vsel %vm1557_vm4, %v1780_v44, %v1781_v59  ;;  %v1806_v1 = vsel %vm1557_vm4, %v1803_v50, %v1805_v46  ;;  %v1804_v20 = vsel %vm1557_vm4, %v1802_v27, %v1803_v50 }
 0x13e   : > { %v1046_v6 = vpop.permute.xlu1 %1045  ;;  %v1029_v13 = vadd.f32 %v3579_v37, %v1007_v48  ;;  %v1822_v36 = vrot.slane %v1816_v22, 5  ;;  %v1894_v17 = vmul.f32 %v1892_v34, %v2740_v30  ;;  %v1895_v57 = vmul.f32 %v1892_v34, %v2794_v4 }
 0x13f   : > { %v3595_v10 = vpop.permute.xlu0 %1043  ;;  %v1050_v18 = vadd.f32 %v1046_v6, %v1030_v7  ;;  %v1914_v53 = vstv %s3625_s5  ;;  %v1879_v9 = vrot.slane %v1873_v16, 6  ;;  %v1883_v25 = vsel %vm1844_vm5, %v1880_v12, %v1882_v39  ;;  %s176_s5 = sand.u32 1, %s2589_s15  }
 0x140   : > { %1725 = vrot.lane.b32.xlu1 %v1722_v23, %s2603_s30  ;;  %v1823_v23 = vrot.slane %v1817_v29, 5  ;;  %v1049_v6 = vadd.f32 %v3595_v10, %v1029_v13  ;;  %v1900_v49 = vrot.slane %v1894_v17, 6  ;;  %v1916_v59 = vmul.f32 %v1914_v53, %v2723_v14  ;;  %s2329_s6 = sshll.u32 %s176_s5, 6 }
 0x141   : > { %1723 = vrot.lane.b32.xlu0 %v1720_v28, %s2603_s30  ;;  %v1917_v3 = vmul.f32 %v1914_v53, %v2785_v60  ;;  %v1881_v7 = vsel %vm1844_vm5, %v1879_v9, %v1880_v12  ;;  %v1937_v29 = vmul.f32 %v1934_v63, %v2794_v4  ;;  %v1956_v61 = vstv %s3647_s7  ;;  %s178_s7 = scalar_lea.vmem [#allocation6], %s2329_s6 }
 0x142   : > { %v1068_v45 = vpop.permute.xlu1 %1067  ;;  %v1826_v33 = vsel %vm1557_vm4, %v1823_v23, %v1825_v58  ;;  %v1824_v42 = vsel %vm1557_vm4, %v1822_v36, %v1823_v23  ;;  %v1922_v46 = vrot.slane %v1916_v59, 6  ;;  %v1935_v22 = vmul.f32 %v1934_v63, %v2733_v26 }
 0x143   : > { %v1066_v31 = vpop.permute.xlu0 %1065  ;;  %v1072_v43 = vadd.f32 %v1068_v45, %v1050_v18  ;;  %v1893_v45 = vmul.f32 %v1892_v34, %v2733_v26  ;;  %v1924_v52 = vrot.slane %v1917_v3, 6  ;;  %v1944_v0 = vrot.slane %v1937_v29, 6 }
 0x144   : > { %1745 = vrot.lane.b32.xlu1 %v1742_v11, %s2603_s30  ;;  %v1071_v62 = vadd.f32 %v1066_v31, %v1049_v6  ;;  %v1902_v31 = vrot.slane %v1895_v57, 6  ;;  %v1958_v5 = vmul.f32 %v1956_v61, %v2723_v14  ;;  %v1957_v36 = vmul.f32 %v1956_v61, %v2728_v21 }
 0x145   : > { %1743 = vrot.lane.b32.xlu0 %v1740_v47, %s2603_s30  ;;  %v1925_v58 = vsel %vm1844_vm5, %v1922_v46, %v1924_v52 }
 0x146   : > { %v1088_v38 = vpop.permute.xlu1 %1087  ;;  %v1964_v12 = vrot.slane %v1958_v5, 6 }
 0x147   : > { %v1086_v41 = vpop.permute.xlu0 %1085  ;;  %v1092_v55 = vadd.f32 %v1088_v38, %v1072_v43  ;;  %v1899_v38 = vrot.slane %v1893_v45, 6  ;;  %v1959_v43 = vmul.f32 %v1956_v61, %v2785_v60 }
 0x148   : > { %1767 = vrot.lane.b32.xlu1 %v1764_v56, %s2604_s8  ;;  %v1091_v47 = vadd.f32 %v1086_v41, %v1071_v62  ;;  %v1903_v41 = vsel %vm1844_vm5, %v1900_v49, %v1902_v31 }
 0x149   : > { %1765 = vrot.lane.b32.xlu0 %v1762_v54, %s2604_s8  ;;  %v1915_v54 = vmul.f32 %v1914_v53, %v2728_v21  ;;  %v1901_v27 = vsel %vm1844_vm5, %v1899_v38, %v1900_v49  ;;  %v1966_v39 = vrot.slane %v1959_v43, 6  ;;  %v2018_v49 = vstv %s2423_s18 }
 0x14a   : > { %v1110_v8 = vpop.permute.xlu1 %1109  ;;  %v2020_v38 = vmul.f32 %v2018_v49, %v2740_v30 }
 0x14b   : > { %v1108_v51 = vpop.permute.xlu0 %1107  ;;  %v1114_v11 = vadd.f32 %v1110_v8, %v1092_v55  ;;  %v1941_v55 = vrot.slane %v1935_v22, 6  ;;  %v1967_v9 = vsel %vm1844_vm5, %v1964_v12, %v1966_v39 }
 0x14c   : > { %1787 = vrot.lane.b32.xlu1 %v1784_v2, %s2604_s8  ;;  %v1113_v35 = vadd.f32 %v1108_v51, %v1091_v47  ;;  %v1936_v2 = vmul.f32 %v1934_v63, %v2740_v30 }
 0x14d   : > { %1785 = vrot.lane.b32.xlu0 %v1782_v15, %s2604_s8  ;;  %v1921_v15 = vrot.slane %v1915_v54, 6 }
 0x14e   : > { %v1130_v37 = vpop.permute.xlu1 %1129  ;;  %v1942_v23 = vrot.slane %v1936_v2, 6  ;;  %v2019_v2 = vmul.f32 %v2018_v49, %v2733_v26 }
 0x14f   : > { %v1128_v28 = vpop.permute.xlu0 %1127  ;;  %v1134_v32 = vadd.f32 %v1130_v37, %v1114_v11  ;;  %v1976_v37 = vstv %s3658_s9  ;;  %v1923_v6 = vsel %vm1844_vm5, %v1921_v15, %v1922_v46  ;;  %v1998_v11 = vstv %s3667_s10 }
 0x150   : > { %1809 = vrot.lane.b32.xlu1 %v1806_v1, %s2605_s12  ;;  %v1133_v24 = vadd.f32 %v1128_v28, %v1113_v35  ;;  %v1945_v28 = vsel %vm1844_vm5, %v1942_v23, %v1944_v0  ;;  %v1978_v57 = vmul.f32 %v1976_v37, %v2740_v30  ;;  %v1979_v62 = vmul.f32 %v1976_v37, %v2794_v4 }
 0x151   : > { %1807 = vrot.lane.b32.xlu0 %v1804_v20, %s2605_s12  ;;  %v1943_v53 = vsel %vm1844_vm5, %v1941_v55, %v1942_v23  ;;  %v1977_v45 = vmul.f32 %v1976_v37, %v2733_v26  ;;  %v2026_v46 = vrot.slane %v2020_v38, 6  ;;  %v2025_v15 = vrot.slane %v2019_v2, 6 }
 0x152   : > { %v1152_v10 = vpop.permute.xlu1 %1151 }
 0x153   : > { %v1150_v40 = vpop.permute.xlu0 %1149  ;;  %v1156_v56 = vadd.f32 %v1152_v10, %v1134_v32  ;;  %v1963_v10 = vrot.slane %v1957_v36, 6  ;;  %v2000_v32 = vmul.f32 %v1998_v11, %v2723_v14  ;;  %v1983_v35 = vrot.slane %v1977_v45, 6 }
 0x154   : > { %1829 = vrot.lane.b32.xlu1 %v1826_v33, %s2605_s12  ;;  %v1155_v50 = vadd.f32 %v1150_v40, %v1133_v24  ;;  %v1984_v40 = vrot.slane %v1978_v57, 6  ;;  %v2027_v37 = vsel %vm1844_vm5, %v2025_v15, %v2026_v46 }
 0x155   : > { %1827 = vrot.lane.b32.xlu0 %v1824_v42, %s2605_s12  ;;  %v2001_v42 = vmul.f32 %v1998_v11, %v2785_v60  ;;  %v1965_v59 = vsel %vm1844_vm5, %v1963_v10, %v1964_v12  ;;  %v2006_v63 = vrot.slane %v2000_v32, 6 }
 0x156   : > { %v1172_v19 = vpop.permute.xlu1 %1171 }
 0x157   : > { %v1176_v48 = vadd.f32 %v1172_v19, %v1156_v56  ;;  %v1170_v44 = vpop.permute.xlu0 %1169  ;;  %v1999_v56 = vmul.f32 %v1998_v11, %v2728_v21  ;;  %v2008_v19 = vrot.slane %v2001_v42, 6  ;;  %v2102_v11 = vstv %s2427_s26 }
 0x158   : > { %1886 = vrot.lane.b32.xlu1 %v1883_v25, %s2601_s20  ;;  %v1175_v13 = vadd.f32 %v1170_v44, %v1155_v50  ;;  %v1986_v25 = vrot.slane %v1979_v62, 6  ;;  %v1985_v44 = vsel %vm1844_vm5, %v1983_v35, %v1984_v40 }
 0x159   : > { %1884 = vrot.lane.b32.xlu0 %v1881_v7, %s2601_s20  ;;  %v2009_v50 = vsel %vm1844_vm5, %v2006_v63, %v2008_v19 }
 0x15a   : > { %v1194_v8 = vpop.permute.xlu1 %1193  ;;  %v1987_v24 = vsel %vm1844_vm5, %v1984_v40, %v1986_v25  ;;  %v2104_v25 = vmul.f32 %v2102_v11, %v2740_v30 }
 0x15b   : > { %v1198_v18 = vadd.f32 %v1194_v8, %v1176_v48  ;;  %v1192_v51 = vpop.permute.xlu0 %1191  ;;  %v2021_v48 = vmul.f32 %v2018_v49, %v2794_v4  ;;  %v2105_v49 = vmul.f32 %v2102_v11, %v2794_v4 }
 0x15c   : > { %1906 = vrot.lane.b32.xlu1 %v1903_v41, %s2601_s20  ;;  %v1197_v1 = vadd.f32 %v1192_v51, %v1175_v13  ;;  %v2005_v41 = vrot.slane %v1999_v56, 6 }
 0x15d   : > { %1904 = vrot.lane.b32.xlu0 %v1901_v27, %s2601_s20  ;;  %s2424_s20 = sld [smem:[#allocation3 + $0x2f]]  ;;  %v2028_v52 = vrot.slane %v2021_v48, 6  ;;  %v2060_v27 = vstv %s2425_s25  ;;  %v2112_v48 = vrot.slane %v2105_v49, 6  ;;  %s2607_s25 = smov [#allocation6]  }
 0x15e   : > { %v1214_v34 = vpop.permute.xlu1 %1213  ;;  %v2062_v23 = vmul.f32 %v2060_v27, %v2740_v30  ;;  %v2063_v0 = vmul.f32 %v2060_v27, %v2794_v4  ;;  %v2061_v55 = vmul.f32 %v2060_v27, %v2733_v26 }
 0x15f   : > { %v3678_v20 = vadd.f32 %v1214_v34, %v1198_v18  ;;  %v1212_v16 = vpop.permute.xlu0 %1211  ;;  %v2007_v18 = vsel %vm1844_vm5, %v2005_v41, %v2006_v63  ;;  %v2029_v5 = vsel %vm1844_vm5, %v2026_v46, %v2028_v52  ;;  %v2103_v63 = vmul.f32 %v2102_v11, %v2733_v26 }
 0x160   : > { %1928 = vrot.lane.b32.xlu1 %v1925_v58, %s2600_s13  ;;  %v3684_v17 = vadd.f32 %v1212_v16, %v1197_v1  ;;  %v2068_v16 = vrot.slane %v2062_v23, 6  ;;  %v2067_v10 = vrot.slane %v2061_v55, 6 }
 0x161   : > { %1926 = vrot.lane.b32.xlu0 %v1923_v6, %s2600_s13  ;;  %v2109_v41 = vrot.slane %v2103_v63, 6 }
 0x162   : > { %v3690_v33 = vpop.permute.xlu1 %1235  ;;  %v2069_v35 = vsel %vm1844_vm5, %v2067_v10, %v2068_v16 }
 0x163   : > { %v3694_v47 = vpop.permute.xlu0 %1233  ;;  %v2040_v54 = vstv %s2424_s20 }
 0x164   : > { %1948 = vrot.lane.b32.xlu1 %v1945_v28, %s2600_s13  ;;  %v2042_v61 = vmul.f32 %v2040_v54, %v2723_v14  ;;  %v2043_v8 = vmul.f32 %v2040_v54, %v2785_v60  ;;  %v2041_v22 = vmul.f32 %v2040_v54, %v2728_v21  ;;  %v2070_v28 = vrot.slane %v2063_v0, 6 }
 0x165   : > { %1946 = vrot.lane.b32.xlu0 %v1943_v53, %s2600_s13  ;;  %s2426_s13 = sld [smem:[#allocation3 + $0x30]] }
 0x166   : > { %v3701_v31 = vpop.permute.xlu1 %1255  ;;  %v2048_v43 = vrot.slane %v2042_v61, 6  ;;  %v2050_v1 = vrot.slane %v2043_v8, 6  ;;  %v2047_v6 = vrot.slane %v2041_v22, 6  ;;  %v2071_v42 = vsel %vm1844_vm5, %v2068_v16, %v2070_v28 }
 0x167   : > { %v3705_v3 = vpop.permute.xlu0 %1253  ;;  %v1239_v28 = vadd.f32 %v3694_v47, %v3684_v17 }
 0x168   : > { %1970 = vrot.lane.b32.xlu1 %v1967_v9, %s2602_s21  ;;  %v2051_v12 = vsel %vm1844_vm5, %v2048_v43, %v2050_v1  ;;  %v2049_v53 = vsel %vm1844_vm5, %v2047_v6, %v2048_v43 }
 0x169   : > { %1968 = vrot.lane.b32.xlu0 %v1965_v59, %s2602_s21  ;;  %v1259_v10 = vadd.f32 %v3705_v3, %v1239_v28 }
 0x16a   : > { %v3712_v7 = vpop.permute.xlu1 %1312 }
 0x16b   : > { %v3716_v29 = vpop.permute.xlu0 %1310  ;;  %v2082_v34 = vstv %s2426_s13  ;;  %s2535_s13 = sshll.u32 %s2607_s25, 4  ;;  %s2536_s13 = int_to_ptr.vmem [resolvable:$false] %s2535_s13 }
 0x16c   : > { %1990 = vrot.lane.b32.xlu1 %v1987_v24, %s2602_s21  ;;  %v2084_v39 = vmul.f32 %v2082_v34, %v2723_v14  ;;  %v2085_v57 = vmul.f32 %v2082_v34, %v2785_v60  ;;  %v2083_v45 = vmul.f32 %v2082_v34, %v2728_v21  ;;  %v2110_v24 = vrot.slane %v2104_v25, 6  ;;  %s2537_s26 = scalar_lea.vmem %s2536_s13, 2048 }
 0x16d   : > { %1988 = vrot.lane.b32.xlu0 %v1985_v44, %s2602_s21 }
 0x16e   : > { %v3723_v13 = vpop.permute.xlu1 %1332  ;;  %v2090_v9 = vrot.slane %v2084_v39, 6  ;;  %v2092_v40 = vrot.slane %v2085_v57, 6  ;;  %v2089_v56 = vrot.slane %v2083_v45, 6  ;;  %v2113_v46 = vsel %vm1844_vm5, %v2110_v24, %v2112_v48 }
 0x16f   : > { %v3727_v51 = vpop.permute.xlu0 %1330  ;;  %v2111_v61 = vsel %vm1844_vm5, %v2109_v41, %v2110_v24 }
 0x170   : > { %2012 = vrot.lane.b32.xlu1 %v2009_v50, %s2603_s30  ;;  %v2093_v38 = vsel %vm1844_vm5, %v2090_v9, %v2092_v40  ;;  %v2091_v44 = vsel %vm1844_vm5, %v2089_v56, %v2090_v9  ;;  %v1263_v50 = vstv %s2386_s27 }
 0x171   : > { %2010 = vrot.lane.b32.xlu0 %v2007_v18, %s2603_s30  ;;  %v1265_v8 = vmul.f32 %v1263_v50, %v2723_v14  ;;  %v1266_v27 = vmul.f32 %v1263_v50, %v2785_v60  ;;  %v1264_v22 = vmul.f32 %v1263_v50, %v2728_v21 }
 0x172   : > { %v3734_v58 = vpop.permute.xlu1 %1354 }
 0x173   : > { %v3738_v36 = vpop.permute.xlu0 %1352  ;;  %v1272_v0 = vrot.slane %v1265_v8, 4  ;;  %v1271_v6 = vrot.slane %v1264_v22, 4 }
 0x174   : > { %2032 = vrot.lane.b32.xlu1 %v2029_v5, %s2603_s30  ;;  %v1274_v5 = vrot.slane %v1266_v27, 4 }
 0x175   : > { %2030 = vrot.lane.b32.xlu0 %v2027_v37, %s2603_s30  ;;  %s2387_s30 = sld [smem:[#allocation3 + $0x4d]]  ;;  %v1240_v37 = vadd.f32 %v3690_v33, %v3678_v20  ;;  %v1273_v45 = vsel %vm1270_vm3, %v1271_v6, %v1272_v0 }
 0x176   : > { %v3745_v62 = vpop.permute.xlu1 %1374  ;;  %v1275_v39 = vsel %vm1270_vm3, %v1272_v0, %v1274_v5  ;;  %v1278_v25 = vadd.f32 %v1273_v45, %v1259_v10 }
 0x177   : > { %v3749_v32 = vpop.permute.xlu0 %1372 }
 0x178   : > { %2054 = vrot.lane.b32.xlu1 %v2051_v12, %s2604_s8  ;;  %v1260_v12 = vadd.f32 %v3701_v31, %v1240_v37 }
 0x179   : > { %2052 = vrot.lane.b32.xlu0 %v2049_v53, %s2604_s8 }
 0x17a   : > { %v3756_v59 = vpop.permute.xlu1 %1396  ;;  %v1279_v33 = vadd.f32 %v1275_v39, %v1260_v12 }
 0x17b   : > { %v3760_v19 = vpop.permute.xlu0 %1394  ;;  %v1280_v15 = vstv %s2387_s30 }
 0x17c   : > { %2074 = vrot.lane.b32.xlu1 %v2071_v42, %s2604_s8  ;;  %v1282_v43 = vmul.f32 %v1280_v15, %v2740_v30  ;;  %v1283_v1 = vmul.f32 %v1280_v15, %v2794_v4  ;;  %v1281_v55 = vmul.f32 %v1280_v15, %v2733_v26 }
 0x17d   : > { %2072 = vrot.lane.b32.xlu0 %v2069_v35, %s2604_s8  ;;  %s2400_s8 = sld [smem:[#allocation3 + $0x23]] }
 0x17e   : > { %v3765_v54 = vpop.permute.xlu1 %1416  ;;  %v1288_v57 = vrot.slane %v1282_v43, 4  ;;  %v1290_v11 = vrot.slane %v1283_v1, 4  ;;  %v1287_v42 = vrot.slane %v1281_v55, 4 }
 0x17f   : > { %v3768_v2 = vpop.permute.xlu0 %1414 }
 0x180   : > { %2096 = vrot.lane.b32.xlu1 %v2093_v38, %s2605_s12  ;;  %v1291_v9 = vsel %vm1270_vm3, %v1288_v57, %v1290_v11  ;;  %v1289_v17 = vsel %vm1270_vm3, %v1287_v42, %v1288_v57 }
 0x181   : > { %2094 = vrot.lane.b32.xlu0 %v2091_v44, %s2605_s12  ;;  %v1295_v31 = vadd.f32 %v1291_v9, %v1279_v33  ;;  %v1294_v35 = vadd.f32 %v1289_v17, %v1278_v25 }
 0x182   : > { %v1439_v52 = vpop.permute.xlu1 %1438 }
 0x183   : > { %v1437_v18 = vpop.permute.xlu0 %1436  ;;  %v1317_v63 = vadd.f32 %v3712_v7, %v1295_v31  ;;  %v1316_v3 = vadd.f32 %v3716_v29, %v1294_v35  ;;  %v1550_v5 = vstv %s2400_s8 }
 0x184   : > { %2116 = vrot.lane.b32.xlu1 %v2113_v46, %s2605_s12 }
 0x185   : > { %2114 = vrot.lane.b32.xlu0 %v2111_v61, %s2605_s12  ;;  %v1337_v48 = vadd.f32 %v3723_v13, %v1317_v63  ;;  %v1336_v41 = vadd.f32 %v3727_v51, %v1316_v3  ;;  %s2401_s12 = sld [smem:[#allocation3 + $0x54]] }
 0x186   : > { %v1459_v23 = vpop.permute.xlu1 %1458 }
 0x187   : > { %v1457_v34 = vpop.permute.xlu0 %1456  ;;  %v1359_v50 = vadd.f32 %v3734_v58, %v1337_v48  ;;  %v1358_v61 = vadd.f32 %v3738_v36, %v1336_v41 }
 0x189   : > { %v1379_v8 = vadd.f32 %v3745_v62, %v1359_v50  ;;  %v1378_v27 = vadd.f32 %v3749_v32, %v1358_v61  ;;  %v1552_v62 = vmul.f32 %v1550_v5, %v2723_v14  ;;  %v1553_v32 = vmul.f32 %v1550_v5, %v2785_v60 }
 0x18a   : > { %v1481_v16 = vpop.permute.xlu1 %1480 }
 0x18b   : > { %v1479_v53 = vpop.permute.xlu0 %1478  ;;  %v1401_v29 = vadd.f32 %v3756_v59, %v1379_v8  ;;  %v1400_v13 = vadd.f32 %v3760_v19, %v1378_v27  ;;  %v1567_v55 = vstv %s2401_s12  ;;  %v1551_v19 = vmul.f32 %v1550_v5, %v2728_v21 }
 0x18c   : > { %v1559_v39 = vrot.slane %v1552_v62, 5  ;;  %v1568_v45 = vmul.f32 %v1567_v55, %v2733_v26 }
 0x18d   : > { %v1421_v22 = vadd.f32 %v3765_v54, %v1401_v29  ;;  %v1420_v58 = vadd.f32 %v3768_v2, %v1400_v13  ;;  %v1561_v2 = vrot.slane %v1553_v32, 5  ;;  %v1558_v10 = vrot.slane %v1551_v19, 5 }
 0x18e   : > { %v1501_v20 = vpop.permute.xlu1 %1500  ;;  %v1574_v31 = vrot.slane %v1568_v45, 5 }
 0x18f   : > { %v1499_v40 = vpop.permute.xlu0 %1498  ;;  %v1443_v0 = vadd.f32 %v1439_v52, %v1421_v22  ;;  %v1442_v36 = vadd.f32 %v1437_v18, %v1420_v58  ;;  %v1569_v52 = vmul.f32 %v1567_v55, %v2740_v30  ;;  %v1570_v18 = vmul.f32 %v1567_v55, %v2794_v4 }
 0x190   : > { %v1562_v33 = vsel %vm1557_vm4, %v1559_v39, %v1561_v2  ;;  %v1560_v17 = vsel %vm1557_vm4, %v1558_v10, %v1559_v39 }
 0x191   : > { %v1463_v1 = vadd.f32 %v1459_v23, %v1443_v0  ;;  %v1462_v59 = vadd.f32 %v1457_v34, %v1442_v36  ;;  %v1575_v9 = vrot.slane %v1569_v52, 5 }
 0x192   : > { %v1523_v47 = vpop.permute.xlu1 %1522 }
 0x193   : > { %v1521_v49 = vpop.permute.xlu0 %1520  ;;  %v1485_v6 = vadd.f32 %v1481_v16, %v1463_v1  ;;  %v1484_v54 = vadd.f32 %v1479_v53, %v1462_v59  ;;  %v1577_v53 = vrot.slane %v1570_v18, 5  ;;  %v1576_v48 = vsel %vm1557_vm4, %v1574_v31, %v1575_v9 }
 0x195   : > { %v1505_v12 = vadd.f32 %v1501_v20, %v1485_v6  ;;  %v1504_v57 = vadd.f32 %v1499_v40, %v1484_v54  ;;  %v1578_v40 = vsel %vm1557_vm4, %v1575_v9, %v1577_v53 }
 0x196   : > { %v1543_v56 = vpop.permute.xlu1 %1542 }
 0x197   : > { %v1541_v38 = vpop.permute.xlu0 %1540  ;;  %v1527_v11 = vadd.f32 %v1523_v47, %v1505_v12  ;;  %v1526_v16 = vadd.f32 %v1521_v49, %v1504_v57 }
 0x199   : > { %v1547_v42 = vadd.f32 %v1543_v56, %v1527_v11  ;;  %v1546_v25 = vadd.f32 %v1541_v38, %v1526_v16 }
 0x19a   : > { %v3794_v24 = vpop.permute.xlu1 %1599 }
 0x19b   : > { %v3797_v44 = vpop.permute.xlu0 %1597  ;;  %v1566_v63 = vadd.f32 %v1562_v33, %v1547_v42  ;;  %v1565_v3 = vadd.f32 %v1560_v17, %v1546_v25 }
 0x19d   : > { %v1582_v49 = vadd.f32 %v1578_v40, %v1566_v63  ;;  %v1581_v50 = vadd.f32 %v1576_v48, %v1565_v3 }
 0x19e   : > { %v1620_v46 = vpop.permute.xlu1 %1619 }
 0x19f   : > { %v1618_v7 = vpop.permute.xlu0 %1617  ;;  %v1604_v8 = vadd.f32 %v3794_v24, %v1582_v49  ;;  %v1603_v38 = vadd.f32 %v3797_v44, %v1581_v50  ;;  %v1837_v44 = vstv %s2414_s28 }
 0x1a1   : > { %v1624_v13 = vadd.f32 %v1620_v46, %v1604_v8  ;;  %v1623_v58 = vadd.f32 %v1618_v7, %v1603_v38  ;;  %v1839_v7 = vmul.f32 %v1837_v44, %v2723_v14 }
 0x1a2   : > { %v1642_v15 = vpop.permute.xlu1 %1641 }
 0x1a3   : > { %v1640_v51 = vpop.permute.xlu0 %1639  ;;  %v1646_v0 = vadd.f32 %v1642_v15, %v1624_v13  ;;  %v1840_v15 = vmul.f32 %v1837_v44, %v2785_v60  ;;  %v1846_v11 = vrot.slane %v1839_v7, 6 }
 0x1a4   : > { %v1645_v36 = vadd.f32 %v1640_v51, %v1623_v58 }
 0x1a5   : > { %v1848_v10 = vrot.slane %v1840_v15, 6 }
 0x1a6   : > { %v1662_v43 = vpop.permute.xlu1 %1661 }
 0x1a7   : > { %v1660_v37 = vpop.permute.xlu0 %1659  ;;  %v1666_v1 = vadd.f32 %v1662_v43, %v1646_v0 }
 0x1a8   : > { %v1665_v32 = vadd.f32 %v1660_v37, %v1645_v36  ;;  %v1854_v37 = vstv %s2415_s29 }
 0x1a9   : > { %v1856_v45 = vmul.f32 %v1854_v37, %v2740_v30  ;;  %v1855_v60 = vmul.f32 %v1854_v37, %v2733_v26 }
 0x1aa   : > { %v1684_v28 = vpop.permute.xlu1 %1683 }
 0x1ab   : > { %v1682_v23 = vpop.permute.xlu0 %1681  ;;  %v1688_v59 = vadd.f32 %v1684_v28, %v1666_v1  ;;  %v1838_v28 = vmul.f32 %v1837_v44, %v2728_v21  ;;  %v1849_v21 = vsel %vm1844_vm5, %v1846_v11, %v1848_v10  ;;  %v1862_v25 = vrot.slane %v1856_v45, 6 }
 0x1ac   : > { %v1687_v55 = vadd.f32 %v1682_v23, %v1665_v32  ;;  %v1861_v30 = vrot.slane %v1855_v60, 6 }
 0x1ad   : > { %v1845_v33 = vrot.slane %v1838_v28, 6 }
 0x1ae   : > { %v1704_v34 = vpop.permute.xlu1 %1703  ;;  %v1863_v26 = vsel %vm1844_vm5, %v1861_v30, %v1862_v25 }
 0x1af   : > { %v1702_v20 = vpop.permute.xlu0 %1701  ;;  %v1708_v19 = vadd.f32 %v1704_v34, %v1688_v59  ;;  %v1857_v34 = vmul.f32 %v1854_v37, %v2794_v4  ;;  %v1847_v63 = vsel %vm1844_vm5, %v1845_v33, %v1846_v11 }
 0x1b0   : > { %v1707_v54 = vadd.f32 %v1702_v20, %v1687_v55 }
 0x1b1   : > { %v1864_v17 = vrot.slane %v1857_v34, 6 }
 0x1b2   : > { %v1726_v35 = vpop.permute.xlu1 %1725 }
 0x1b3   : > { %v1724_v47 = vpop.permute.xlu0 %1723  ;;  %v1730_v12 = vadd.f32 %v1726_v35, %v1708_v19 }
 0x1b4   : > { %v1729_v46 = vadd.f32 %v1724_v47, %v1707_v54  ;;  %v1865_v47 = vsel %vm1844_vm5, %v1862_v25, %v1864_v17 }
 0x1b6   : > { %v1746_v41 = vpop.permute.xlu1 %1745 }
 0x1b7   : > { %v1744_v56 = vpop.permute.xlu0 %1743  ;;  %v1750_v2 = vadd.f32 %v1746_v41, %v1730_v12 }
 0x1b8   : > { %v1749_v43 = vadd.f32 %v1744_v56, %v1729_v46 }
 0x1ba   : > { %v1768_v61 = vpop.permute.xlu1 %1767 }
 0x1bb   : > { %v1766_v27 = vpop.permute.xlu0 %1765  ;;  %v1772_v52 = vadd.f32 %v1768_v61, %v1750_v2 }
 0x1bc   : > { %v1771_v23 = vadd.f32 %v1766_v27, %v1749_v43 }
 0x1be   : > { %v1788_v29 = vpop.permute.xlu1 %1787 }
 0x1bf   : > { %v1786_v22 = vpop.permute.xlu0 %1785  ;;  %v1792_v57 = vadd.f32 %v1788_v29, %v1772_v52 }
 0x1c0   : > { %v1791_v42 = vadd.f32 %v1786_v22, %v1771_v23 }
 0x1c2   : > { %v1810_v5 = vpop.permute.xlu1 %1809 }
 0x1c3   : > { %v1808_v62 = vpop.permute.xlu0 %1807  ;;  %v1814_v14 = vadd.f32 %v1810_v5, %v1792_v57 }
 0x1c4   : > { %v1813_v53 = vadd.f32 %v1808_v62, %v1791_v42 }
 0x1c6   : > { %v1830_v6 = vpop.permute.xlu1 %1829 }
 0x1c7   : > { %v1828_v24 = vpop.permute.xlu0 %1827  ;;  %v1834_v20 = vadd.f32 %v1830_v6, %v1814_v14 }
 0x1c8   : > { %v1833_v35 = vadd.f32 %v1828_v24, %v1813_v53 }
 0x1c9   : > { %v1853_v4 = vadd.f32 %v1849_v21, %v1834_v20 }
 0x1ca   : > { %v1887_v39 = vpop.permute.xlu1 %1886  ;;  %v1852_v48 = vadd.f32 %v1847_v63, %v1833_v35  ;;  %v2505_v63 = vld [vmem:[%s2710_s11 + $0x18] sm:$0xff] }
 0x1cb   : > { %v1885_v51 = vpop.permute.xlu0 %1884  ;;  %v1869_v49 = vadd.f32 %v1865_v47, %v1853_v4 }
 0x1cc   : > { %v1868_v50 = vadd.f32 %v1863_v26, %v1852_v48  ;;  %v2507_v26 = vld [vmem:[%s2710_s11 + $0x28] sm:$0x3f] }
 0x1cd   : > { %v1891_v8 = vadd.f32 %v1887_v39, %v1869_v49  ;;  %v2508_v49 = vld [vmem:[%s2710_s11 + $0x48] sm:$0xff] }
 0x1ce   : > { %v1907_v18 = vpop.permute.xlu1 %1906  ;;  %v1890_v38 = vadd.f32 %v1885_v51, %v1868_v50 }
 0x1cf   : > { %v1905_v16 = vpop.permute.xlu0 %1904  ;;  %v1911_v13 = vadd.f32 %v1907_v18, %v1891_v8  ;;  %v2509_v8 = vld [vmem:[%s2710_s11 + $0x30] sm:$0xff] }
 0x1d0   : > { %v1910_v58 = vadd.f32 %v1905_v16, %v1890_v38 }
 0x1d2   : > { %v1929_v9 = vpop.permute.xlu1 %1928 }
 0x1d3   : > { %v1927_v31 = vpop.permute.xlu0 %1926  ;;  %v1933_v0 = vadd.f32 %v1929_v9, %v1911_v13 }
 0x1d4   : > { %v1932_v36 = vadd.f32 %v1927_v31, %v1910_v58  ;;  %v2504_v31 = vld [vmem:[%s2710_s11] sm:$0xff] }
 0x1d5   : > { %v2511_v58 = vld [vmem:[%s2710_s11 + $0x40] sm:$0x3f] }
 0x1d6   : > { %v1949_v40 = vpop.permute.xlu1 %1948 }
 0x1d7   : > { %v1947_v3 = vpop.permute.xlu0 %1946  ;;  %v1953_v1 = vadd.f32 %v1949_v40, %v1933_v0 }
 0x1d8   : > { %v1952_v32 = vadd.f32 %v1947_v3, %v1932_v36  ;;  %v2506_v3 = vld [vmem:[%s2710_s11 + $0x10] sm:$0x3f]  ;;  %v2512_v36 = vld [vmem:[%s2710_s11 + $0x38] sm:$0xff] }
 0x1da   : > { %v1971_v41 = vpop.permute.xlu1 %1970 }
 0x1db   : > { %v1969_v56 = vpop.permute.xlu0 %1968  ;;  %v1975_v59 = vadd.f32 %v1971_v41, %v1953_v1 }
 0x1dc   : > { %v1974_v55 = vadd.f32 %v1969_v56, %v1952_v32  ;;  %v2513_v32 = vld [vmem:[%s2710_s11 + $0x20] sm:$0xff] }
 0x1de   : > { %v1991_v61 = vpop.permute.xlu1 %1990 }
 0x1df   : > { %v1989_v27 = vpop.permute.xlu0 %1988  ;;  %v1995_v19 = vadd.f32 %v1991_v61, %v1975_v59 }
 0x1e0   : > { %v1994_v54 = vadd.f32 %v1989_v27, %v1974_v55  ;;  %v2514_v55 = vld [vmem:[%s2710_s11 + $0x58] sm:$0x3f] }
 0x1e2   : > { %v2013_v29 = vpop.permute.xlu1 %2012 }
 0x1e3   : > { %v2011_v22 = vpop.permute.xlu0 %2010  ;;  %v2017_v12 = vadd.f32 %v2013_v29, %v1995_v19  ;;  %v2510_v29 = vld [vmem:[%s2710_s11 + $0x8] sm:$0xff] }
 0x1e4   : > { %v2016_v39 = vadd.f32 %v2011_v22, %v1994_v54  ;;  %v2515_v54 = vld [vmem:[%s2710_s11 + $0x50] sm:$0xff]  ;;  %s2435_s11 = sshll.u32 %s2654_s1, 10  ;;  %s3876_s1 = scalar_lea.sflag [#allocation4], %s176_s5 }
 0x1e5   : > { %s3868_s18 = scalar_lea.hbm %s3920_s3, %s2435_s11 }
 0x1e6   : > { %v2033_v5 = vpop.permute.xlu1 %2032 }
 0x1e7   : > { %v2031_v62 = vpop.permute.xlu0 %2030  ;;  %v2037_v46 = vadd.f32 %v2033_v5, %v2017_v12 }
 0x1e8   : > { %v2036_v7 = vadd.f32 %v2031_v62, %v2016_v39 }
 0x1ea   : > { %v2055_v6 = vpop.permute.xlu1 %2054 }
 0x1eb   : > { %v2053_v24 = vpop.permute.xlu0 %2052  ;;  %v2059_v15 = vadd.f32 %v2055_v6, %v2037_v46 }
 0x1ec   : > { %v2058_v43 = vadd.f32 %v2053_v24, %v2036_v7 }
 0x1ee   : > { %v2075_v44 = vpop.permute.xlu1 %2074 }
 0x1ef   : > { %v2073_v2 = vpop.permute.xlu0 %2072  ;;  %v2079_v52 = vadd.f32 %v2075_v44, %v2059_v15 }
 0x1f0   : > { %v2078_v28 = vadd.f32 %v2073_v2, %v2058_v43 }
 0x1f2   : > { %v2097_v51 = vpop.permute.xlu1 %2096 }
 0x1f3   : > { %v2095_v37 = vpop.permute.xlu0 %2094  ;;  %v2101_v18 = vadd.f32 %v2097_v51, %v2079_v52 }
 0x1f4   : > { %v2100_v57 = vadd.f32 %v2095_v37, %v2078_v28 }
 0x1f6   : > { %v2117_v23 = vpop.permute.xlu1 %2116 }
 0x1f7   : > { %v2121_v11 = vadd.f32 %v2117_v23, %v2101_v18  ;;  %v2115_v10 = vpop.permute.xlu0 %2114 }
 0x1f8   : > { %v2120_v34 = vadd.f32 %v2115_v10, %v2100_v57 }
 0x1f9   : > { %v2429_v45 = vmul.f32 -1.442695, %v2121_v11 }
 0x1fa   : > { %v2428_v16 = vmul.f32 -1.442695, %v2120_v34 }
 0x1fb   : > { %2496 = vpow2.f32 %v2429_v45 }
 0x1fc   : > { %2498 = vpow2.f32 %v2428_v16 }
 0x205   : > { %v2497_v42 = vpop.eup %2496 }
 0x206   : > { %v2129_v14 = vadd.f32 1.0, %v2497_v42  ;;  %v2499_v33 = vpop.eup %2498 }
 0x207   : > { %v2128_v60 = vadd.f32 1.0, %v2499_v33 }
 0x208   : > { %2500 = vrcp.f32 %v2129_v14 }
 0x209   : > { %2502 = vrcp.f32 %v2128_v60 }
 0x212   : > { %v2501_v9 = vpop.eup %2500 }
 0x213   : > { %v2137_v53 = vrot.slane %v2501_v9, 5  ;;  %v2503_v20 = vpop.eup %2502 }
 0x214   : > { %v2136_v21 = vrot.slane %v2503_v20, 5 }
 0x216   : > { %2139 = vrot.lane.b32.xlu0 %v2136_v21, %s2606_s4  ;;  %v2138_v25 = vsel %vm1557_vm4, %v2136_v21, %v2137_v53 }
 0x217   : > { %2141 = vrot.lane.b32.xlu1 %v2138_v25, %s2606_s4 }
 0x21a   : > { %2143 = vrot.lane.b32.xlu0 %v2137_v53, %s2606_s4 }
 0x288   : > { %v2140_v17 = vpop.permute.xlu0 %2139 }
 0x289   : > { %v2148_v35 = vmul.f32 %v2504_v31, %v2140_v17  ;;  %v2151_v30 = vmul.f32 %v2505_v63, %v2140_v17  ;;  %v2157_v56 = vmul.f32 %v2508_v49, %v2140_v17  ;;  %v2154_v27 = vmul.f32 %v2509_v8, %v2140_v17  ;;  %v2142_v38 = vpop.permute.xlu1 %2141 }
 0x28a   : > { %v2149_v13 = vmul.f32 %v2510_v29, %v2142_v38  ;;  %v2155_v1 = vmul.f32 %v2512_v36, %v2142_v38  ;;  %v2152_v59 = vmul.f32 %v2513_v32, %v2142_v38  ;;  %v2158_v12 = vmul.f32 %v2515_v54, %v2142_v38 }
 0x28b   : > { %v2163_v40 = vadd.f32 %v2505_v63, %v2151_v30  ;;  %v2160_v4 = vadd.f32 %v2504_v31, %v2148_v35  ;;  %v2169_v22 = vadd.f32 %v2508_v49, %v2157_v56  ;;  %v2166_v5 = vadd.f32 %v2509_v8, %v2154_v27 }
 0x28c   : > { %v2144_v47 = vpop.permute.xlu0 %2143  ;;  %v2161_v62 = vadd.f32 %v2510_v29, %v2149_v13  ;;  %v2167_v24 = vadd.f32 %v2512_v36, %v2155_v1  ;;  %v2164_v44 = vadd.f32 %v2513_v32, %v2152_v59  ;;  %v2170_v46 = vadd.f32 %v2515_v54, %v2158_v12 }
 0x28d   : > { %v2150_v48 = vmul.f32 %v2506_v3, %v2144_v47  ;;  %v2153_v41 = vmul.f32 %v2507_v26, %v2144_v47  ;;  %2190 = vrot.lane.b32.xlu0 %v2163_v40, %s2602_s21  ;;  %2184 = vrot.lane.b32.xlu1 %v2160_v4, %s2602_s21  ;;  %v2156_v0 = vmul.f32 %v2511_v58, %v2144_v47 }
 0x28e   : > { %v2159_v19 = vmul.f32 %v2514_v55, %v2144_v47 }
 0x28f   : > { %v2165_v50 = vadd.f32 %v2507_v26, %v2153_v41  ;;  %v2162_v61 = vadd.f32 %v2506_v3, %v2150_v48  ;;  %v2168_v6 = vadd.f32 %v2511_v58, %v2156_v0 }
 0x290   : > { %v2171_v39 = vadd.f32 %v2514_v55, %v2159_v19 }
 0x291   : > { %2194 = vrot.lane.b32.xlu0 %v2165_v50, %s2602_s21  ;;  %2188 = vrot.lane.b32.xlu1 %v2162_v61, %s2602_s21 }
 0x295   : > { %2202 = vrot.lane.b32.xlu0 %v2169_v22, %s2602_s21  ;;  %2196 = vrot.lane.b32.xlu1 %v2166_v5, %s2602_s21 }
 0x299   : > { %2186 = vrot.lane.b32.xlu0 %v2161_v62, %s2602_s21  ;;  %2200 = vrot.lane.b32.xlu1 %v2168_v6, %s2602_s21 }
 0x29d   : > { %2198 = vrot.lane.b32.xlu0 %v2167_v24, %s2602_s21  ;;  %2192 = vrot.lane.b32.xlu1 %v2164_v44, %s2602_s21 }
 0x2a1   : > { %2206 = vrot.lane.b32.xlu0 %v2171_v39, %s2602_s21  ;;  %2204 = vrot.lane.b32.xlu1 %v2170_v46, %s2602_s21  ;;  %s2249_s21 = sshll.u32 %s178_s7, 4  ;;  %s3870_s21 = int_to_ptr.vmem [resolvable:$true] %s2249_s21 }
 0x2a2   : > { %s2531_s20 = scalar_lea.vmem %s3870_s21, 1024  ;;  %p2538_p13 = scmp.lt.s32.totalorder %s3870_s21, %s2536_s13 }
 0x2a3   : > { %p2532_p9 = scmp.ne.s32.totalorder %s3870_s21, %s2531_s20  ;;  %p2539_p0 = scmp.lt.s32.totalorder %s2537_s26, %s2531_s20 }
 0x2a5   : > { %p2533_p10 = pnand %p2532_p9, %p2671_p5  ;;  %p2540_p1 = por %p2539_p0, %p2538_p13 }
 0x2a7   : > { %p2534_p12 = pneg %p2533_p10 }
 0x2a9   : > { %p2541_p2 = pnand %p2540_p1, %p2534_p12 }
 0x2ff   : > { %v2191_v2 = vpop.permute.xlu0 %2190  ;;  %v2185_v7 = vpop.permute.xlu1 %2184 }
 0x300   : > { %2226 = vst.msk [vmem:[%s178_s7 + $0xd] sm:$0xf8] %vm2220_vm6, %v2191_v2  ;;  %2221 = vst.msk [vmem:[%s178_s7 - $0x3] sm:$0xf8] %vm2220_vm6, %v2185_v7 }
 0x303   : > { %v2195_v15 = vpop.permute.xlu0 %2194  ;;  %v2189_v51 = vpop.permute.xlu1 %2188 }
 0x304   : > { %2228 = vst.msk [vmem:[%s178_s7 + $0x1d] sm:$0x7] %vm2224_vm7, %v2195_v15  ;;  %2225 = vst.msk [vmem:[%s178_s7 + $0xd] sm:$0x7] %vm2224_vm7, %v2189_v51 }
 0x307   : > { %v2203_v43 = vpop.permute.xlu0 %2202  ;;  %v2197_v52 = vpop.permute.xlu1 %2196 }
 0x308   : > { %2232 = vst.msk [vmem:[%s178_s7 + $0x2d] sm:$0xf8] %vm2220_vm6, %v2203_v43  ;;  %2229 = vst.msk [vmem:[%s178_s7 + $0x1d] sm:$0xf8] %vm2220_vm6, %v2197_v52 }
 0x30b   : > { %v2187_v37 = vpop.permute.xlu0 %2186  ;;  %v2201_v28 = vpop.permute.xlu1 %2200 }
 0x30c   : > { %2223 = vst.msk [vmem:[%s178_s7 + $0x5] sm:$0xff] %vm2222_vm8, %v2187_v37 }
 0x30d   : > { %2231 = vst.msk [vmem:[%s178_s7 + $0x2d] sm:$0x7] %vm2224_vm7, %v2201_v28 }
 0x30f   : > { %v2199_v18 = vpop.permute.xlu0 %2198  ;;  %v2193_v23 = vpop.permute.xlu1 %2192 }
 0x310   : > { %2230 = vst.msk [vmem:[%s178_s7 + $0x25] sm:$0xff] %vm2222_vm8, %v2199_v18  ;;  %2227 = vst.msk [vmem:[%s178_s7 + $0x15] sm:$0xff] %vm2222_vm8, %v2193_v23 }
 0x313   : > { %v2207_v57 = vpop.permute.xlu0 %2206  ;;  %v2205_v11 = vpop.permute.xlu1 %2204 }
 0x314   : > { %2234 = vst.msk [vmem:[%s178_s7 + $0x3d] sm:$0x7] %vm2224_vm7, %v2207_v57 }
 0x315   : > { %2233 = vst.msk [vmem:[%s178_s7 + $0x35] sm:$0xff] %vm2222_vm8, %v2205_v11 }
 0x316   : > { %2544 = shalt.err (!%p2541_p2)
}
 0x317   : > { %s2545_s27 = scalar_lea.hbm %s3868_s18, 1024  ;;  %s2549_s12 = scalar_lea.hbm %s3920_s3, 2048 }
 0x318   : > { %p2546_p3 = scmp.ne.s32.totalorder %s3868_s18, %s2545_s27  ;;  %p2550_p8 = scmp.lt.u32.totalorder %s3868_s18, %s3920_s3 }
 0x319   : > { %p2551_p11 = scmp.lt.u32.totalorder %s2549_s12, %s2545_s27  ;;  %p2553_p10 = scmp.lt.u32.totalorder %s2545_s27, %s3868_s18 }
 0x31a   : > { %p2547_p4 = pnand %p2546_p3, %p2671_p5 }
 0x31b   : > { %p2552_p9 = por %p2551_p11, %p2550_p8 }
 0x31c   : > { %p2548_p7 = pneg %p2547_p4 }
 0x31d   : > { %p2554_p12 = por %p2553_p10, %p2552_p9 }
 0x31f   : > { %p2555_p13 = pnand %p2554_p12, %p2548_p7 }
 0x321   : > { %2558 = shalt.err (!%p2555_p13)
}
 0x322   : > { %s2608_s4 = smov 128   ;;  %s2609_s5 = smov 8  }
 0x323   : > { %2441 = dma.vmem_to_hbm [thread:$0]  (%p2671_p5), %s3870_s21, 1024, %s3868_s18, %s3876_s1, %s2608_s4, %s2608_s4, %s2609_s5  }
 0x324 PF: > { %p2453_p0 = scmp.ge.s32.totalorder %s2597_s17, 2  ;;  %s2264_s6 = sand.u32 1, %s2585_s14  }
 0x325   : > { %s2265_s7 = scalar_lea.sflag [#allocation4], %s2264_s6 }
 0x326   : > { %p2448_p1 = pnand %p2453_p0, %p2675_p6 }
 0x328   : > { %2580 = dma.done.wait (!%p2448_p1), %s2265_s7, 1024  }
 0x329   : > { %2582 = vsyncadd (!%p2448_p1), %s2265_s7, 4294966272  ;;  %p15_p2 = scmp.ge.s32.totalorder %s2658_s19, 4   ;;  %s3924_s14 = smov %s2589_s15 }
 0x32a   : > { %s3925_s15 = smov %s2593_s16  ;;  %s3926_s16 = smov %s2669_s22 }
 0x32b   : > { %s3927_s17 = smov %s2658_s19  ;;  %17 = sbr.rel (!%p15_p2) target bundleno = 6 (0x6), region = 72 }
 0x332   :  { %2270 = vsyncpa [#allocation4], 1 }
 0x333   :  { %2272 = vsyncpa [#allocation4 + $0x1], 1 }
 0x334   :  { %2273 = vsyncpa [#allocation5], 1 }
 0x335   :  { %2275 = vsyncpa [#allocation5 + $0x1], 1 }

</bundles_post_ra>
